<compile_context>
chip_gen: v7x
topology: tpu7x:2x2x1
jax: 0.10.0
libtpu: 0.0.40
codegen_flags: <defaults>
</compile_context>

<pallas_src>
import functools

import jax
import jax.numpy as jnp
from jax.experimental import pallas as pl
from jax.experimental.pallas import tpu as pltpu

# ----------------------------- config / vocab ------------------------------
PAD_ID = 0
START_ID = 1          # decoder_start_token_id
MSG_ID = 4
VOCAB = 64
D_MODEL = 32
D_FF = 64
ALPHA = 0.5
NEG_INF = -1e9
EPS = 1e-6
BETA = 100.0          # softargmax sharpness

_VMEM = pl.BlockSpec(memory_space=pltpu.MemorySpace.VMEM)


# --------------------------- in-kernel helpers ------------------------------
def _rmsnorm(x):
    return x * jax.lax.rsqrt(jnp.mean(x * x, axis=-1, keepdims=True) + EPS)


def _softmax(s):
    m = jnp.max(s, axis=-1, keepdims=True)
    p = jnp.exp(s - m)
    return p * pl.reciprocal(jnp.sum(p, axis=-1, keepdims=True), approx=True)


def _encoder_block(ids_b, key_b, iota_lv, E, wqkv, wo, w1, w2, scale, D):
    """One batch element: (L,1) ids -> (L,D) encoder hidden state."""
    onehot = (iota_lv == ids_b).astype(jnp.float32)                        # (L, V)
    h = jnp.dot(onehot, E, preferred_element_type=jnp.float32)             # (L, D)
    hn = _rmsnorm(h)
    qkv = jnp.dot(hn, wqkv, preferred_element_type=jnp.float32)            # (L, 3D)
    q, k, v = qkv[:, 0:D], qkv[:, D:2 * D], qkv[:, 2 * D:3 * D]
    s = jax.lax.dot_general(q, k, (((1,), (1,)), ((), ())),
                            preferred_element_type=jnp.float32) * scale    # (L, L)
    s = jnp.where(key_b, s, NEG_INF)                                       # key-padding mask
    a = jnp.dot(_softmax(s), v, preferred_element_type=jnp.float32)
    h = h + jnp.dot(a, wo, preferred_element_type=jnp.float32)
    ff = jnp.dot(jnp.maximum(jnp.dot(_rmsnorm(h), w1,
                                     preferred_element_type=jnp.float32), 0.0),
                 w2, preferred_element_type=jnp.float32)
    return _rmsnorm(h + ff)


def _decoder_block(dec_b, enc_b, key_b, iota_tv, causal,
                   E, wsqkv, wso, wcq, wckv, wco, w1, w2, scale, D):
    """One batch element: (T,1) decoder ids + (L,D) encoder states -> (T,V) logits."""
    onehot = (iota_tv == dec_b).astype(jnp.float32)                        # (T, V)
    d = jnp.dot(onehot, E, preferred_element_type=jnp.float32)             # (T, D)

    # causal self-attention
    dn = _rmsnorm(d)
    qkv = jnp.dot(dn, wsqkv, preferred_element_type=jnp.float32)
    q, k, v = qkv[:, 0:D], qkv[:, D:2 * D], qkv[:, 2 * D:3 * D]
    s = jax.lax.dot_general(q, k, (((1,), (1,)), ((), ())),
                            preferred_element_type=jnp.float32) * scale    # (T, T)
    s = jnp.where(causal, s, NEG_INF)
    a = jnp.dot(_softmax(s), v, preferred_element_type=jnp.float32)
    d = d + jnp.dot(a, wso, preferred_element_type=jnp.float32)

    # cross-attention over this batch's encoder states
    dn = _rmsnorm(d)
    cq = jnp.dot(dn, wcq, preferred_element_type=jnp.float32)              # (T, D)
    ckv = jnp.dot(enc_b, wckv, preferred_element_type=jnp.float32)         # (L, 2D)
    ck, cv = ckv[:, 0:D], ckv[:, D:2 * D]
    s = jax.lax.dot_general(cq, ck, (((1,), (1,)), ((), ())),
                            preferred_element_type=jnp.float32) * scale    # (T, L)
    s = jnp.where(key_b, s, NEG_INF)
    a = jnp.dot(_softmax(s), cv, preferred_element_type=jnp.float32)
    d = d + jnp.dot(a, wco, preferred_element_type=jnp.float32)

    # FFN + final norm
    ff = jnp.dot(jnp.maximum(jnp.dot(_rmsnorm(d), w1,
                                     preferred_element_type=jnp.float32), 0.0),
                 w2, preferred_element_type=jnp.float32)
    d = _rmsnorm(d + ff)

    # LM head (tied embeddings): contract on E's last dim, no transpose
    return jax.lax.dot_general(d, E, (((1,), (1,)), ((), ())),
                               preferred_element_type=jnp.float32)         # (T, V)


def _ce_terms(logits, tgt_b, iota_tv):
    """Per-batch cross-entropy pieces (sum of NLL over valid tokens, valid count, row max)."""
    labels = jnp.where(tgt_b == PAD_ID, -100, tgt_b)                       # (T, 1)
    valid = labels != -100
    tgt_oh = (iota_tv == jnp.where(valid, labels, 0)).astype(jnp.float32)  # (T, V)
    m = jnp.max(logits, axis=-1, keepdims=True)
    lse = jnp.log(jnp.sum(jnp.exp(logits - m), axis=-1, keepdims=True)) + m
    tl = jnp.sum(logits * tgt_oh, axis=-1, keepdims=True)
    validf = valid.astype(jnp.float32)
    return jnp.sum((lse - tl) * validf), jnp.sum(validf), m


# -------------------- stage 1: fully fused seq2seq kernel -------------------
@functools.lru_cache(maxsize=None)
def make_stage1_call(B, L, T, V, D, F):
    scale = 1.0 / (D ** 0.5)

    def kernel(src_col_ref, src_row_ref, dec_col_ref, tgt_col_ref,
               e_ref, ewqkv_ref, ewo_ref, ew1_ref, ew2_ref,
               dwsqkv_ref, dwso_ref, dwcq_ref, dwckv_ref, dwco_ref, dw1_ref, dw2_ref,
               loss_ref, pred_ref, enc_ref):
        src_col = src_col_ref[...]                    # (B*L, 1) int32
        dec_col = dec_col_ref[...]                    # (B*T, 1) int32
        tgt_col = tgt_col_ref[...]                    # (B*T, 1) int32
        E = e_ref[...]
        ewqkv, ewo, ew1, ew2 = ewqkv_ref[...], ewo_ref[...], ew1_ref[...], ew2_ref[...]
        dwsqkv, dwso = dwsqkv_ref[...], dwso_ref[...]
        dwcq, dwckv, dwco = dwcq_ref[...], dwckv_ref[...], dwco_ref[...]
        dw1, dw2 = dw1_ref[...], dw2_ref[...]

        # shared constants (built once, reused everywhere)
        iota_lv = jax.lax.broadcasted_iota(jnp.int32, (L, V), 1)
        iota_tv = jax.lax.broadcasted_iota(jnp.int32, (T, V), 1)
        idxf = iota_tv.astype(jnp.float32)
        causal = (jax.lax.broadcasted_iota(jnp.int32, (T, T), 1)
                  <= jax.lax.broadcasted_iota(jnp.int32, (T, T), 0))

        nll_sum = jnp.float32(0.0)
        cnt_sum = jnp.float32(0.0)
        for b in range(B):                             # static unroll: per-batch attention
            key_b = src_row_ref[b:b + 1, :] != PAD_ID  # (1, L) key-padding mask, in-kernel
            ids_b = src_col[b * L:(b + 1) * L, :]
            enc_b = _encoder_block(ids_b, key_b, iota_lv, E, ewqkv, ewo, ew1, ew2, scale, D)
            enc_ref[b * L:(b + 1) * L, :] = enc_b

            dec_b = dec_col[b * T:(b + 1) * T, :]
            logits = _decoder_block(dec_b, enc_b, key_b, iota_tv, causal, E,
                                    dwsqkv, dwso, dwcq, dwckv, dwco, dw1, dw2, scale, D)

            nll, cnt, m = _ce_terms(logits, tgt_col[b * T:(b + 1) * T, :], iota_tv)
            nll_sum = nll_sum + nll
            cnt_sum = cnt_sum + cnt

            # softargmax + round (exact normalization so rounding matches reference math)
            eb = jnp.exp((logits - m) * BETA)
            pb = eb / jnp.sum(eb, axis=-1, keepdims=True)
            pred_ref[b * T:(b + 1) * T, :] = jnp.round(
                jnp.sum(pb * idxf, axis=-1, keepdims=True))

        loss = nll_sum / jnp.maximum(cnt_sum, 1.0)     # ignore_index=-100, all-pad guarded
        loss_ref[...] = loss * jnp.ones((1, 1), jnp.float32)

    return pl.pallas_call(
        kernel,
        out_shape=(jax.ShapeDtypeStruct((1, 1), jnp.float32),      # loss1
                   jax.ShapeDtypeStruct((B * T, 1), jnp.float32),  # pred1 (softargmax, rounded)
                   jax.ShapeDtypeStruct((B * L, D), jnp.float32)), # encoder last hidden state
        in_specs=[_VMEM] * 16,
        out_specs=(_VMEM, _VMEM, _VMEM),
    )


# ---- stage 2: fused seq2seq + argmax + MSE(enc1, enc2) + total-loss kernel ----
@functools.lru_cache(maxsize=None)
def make_stage2_call(B, L, T, V, D, F, alpha, compare_embeddings):
    scale = 1.0 / (D ** 0.5)
    inv_mse = 1.0 / float(B * L * D)

    def kernel(inpt_col_ref, inpt_row_ref, dec_col_ref, tgt_col_ref, enc1_ref, loss1_ref,
               e_ref, ewqkv_ref, ewo_ref, ew1_ref, ew2_ref,
               dwsqkv_ref, dwso_ref, dwcq_ref, dwckv_ref, dwco_ref, dw1_ref, dw2_ref,
               total_ref, loss_ref, pred_ref):
        # rounded float token stream (src2 | <msg> | pred1) -> integer ids, in-kernel
        ids_col = jnp.clip(jnp.round(inpt_col_ref[...]), 0, V - 1).astype(jnp.int32)
        dec_col = dec_col_ref[...]
        tgt_col = tgt_col_ref[...]
        E = e_ref[...]
        ewqkv, ewo, ew1, ew2 = ewqkv_ref[...], ewo_ref[...], ew1_ref[...], ew2_ref[...]
        dwsqkv, dwso = dwsqkv_ref[...], dwso_ref[...]
        dwcq, dwckv, dwco = dwcq_ref[...], dwckv_ref[...], dwco_ref[...]
        dw1, dw2 = dw1_ref[...], dw2_ref[...]

        iota_lv = jax.lax.broadcasted_iota(jnp.int32, (L, V), 1)
        iota_tv = jax.lax.broadcasted_iota(jnp.int32, (T, V), 1)
        idxf = iota_tv.astype(jnp.float32)
        causal = (jax.lax.broadcasted_iota(jnp.int32, (T, T), 1)
                  <= jax.lax.broadcasted_iota(jnp.int32, (T, T), 0))

        nll_sum = jnp.float32(0.0)
        cnt_sum = jnp.float32(0.0)
        sq_sum = jnp.float32(0.0)
        for b in range(B):
            key_b = inpt_row_ref[b:b + 1, :] != float(PAD_ID)   # (1, L) !=pad mask, in-kernel
            ids_b = ids_col[b * L:(b + 1) * L, :]
            enc_b = _encoder_block(ids_b, key_b, iota_lv, E, ewqkv, ewo, ew1, ew2, scale, D)
            if compare_embeddings:                              # MSE folded into this kernel
                dlt = enc_b - enc1_ref[b * L:(b + 1) * L, :]
                sq_sum = sq_sum + jnp.sum(dlt * dlt)

            dec_b = dec_col[b * T:(b + 1) * T, :]
            logits = _decoder_block(dec_b, enc_b, key_b, iota_tv, causal, E,
                                    dwsqkv, dwso, dwcq, dwckv, dwco, dw1, dw2, scale, D)

            nll, cnt, m = _ce_terms(logits, tgt_col[b * T:(b + 1) * T, :], iota_tv)
            nll_sum = nll_sum + nll
            cnt_sum = cnt_sum + cnt

            # hard argmax (first index of the max), via float min-reduce
            hard = jnp.min(jnp.where(logits == m, idxf, float(V)), axis=-1, keepdims=True)
            pred_ref[b * T:(b + 1) * T, :] = hard.astype(jnp.int32)

        ones = jnp.ones((1, 1), jnp.float32)
        loss2 = nll_sum / jnp.maximum(cnt_sum, 1.0)
        loss_ref[...] = loss2 * ones
        total = alpha * loss1_ref[...] + ((1.0 - alpha) * loss2) * ones
        if compare_embeddings:
            total = total + (sq_sum * inv_mse) * ones
        total_ref[...] = total

    return pl.pallas_call(
        kernel,
        out_shape=(jax.ShapeDtypeStruct((1, 1), jnp.float32),      # total loss
                   jax.ShapeDtypeStruct((1, 1), jnp.float32),      # loss2
                   jax.ShapeDtypeStruct((B * T, 1), jnp.int32)),   # pred2 (argmax)
        in_specs=[_VMEM] * 18,
        out_specs=(_VMEM, _VMEM, _VMEM),
    )


# ---------------------------- JAX glue: the model ----------------------------
def init_params(key, vocab=VOCAB, d=D_MODEL, f=D_FF):
    shapes = {
        "E": (vocab, d),
        "enc_wqkv": (d, 3 * d), "enc_wo": (d, d), "enc_w1": (d, f), "enc_w2": (f, d),
        "dec_wsqkv": (d, 3 * d), "dec_wso": (d, d),
        "dec_wcq": (d, d), "dec_wckv": (d, 2 * d), "dec_wco": (d, d),
        "dec_w1": (d, f), "dec_w2": (f, d),
    }
    keys = jax.random.split(key, len(shapes))
    return {n: (0.02 * jax.random.normal(k, s)).astype(jnp.float32)
            for (n, s), k in zip(shapes.items(), keys)}


def _shift_right(tgt):
    """T5-style decoder input: [<start>, tgt[:-1]]; PAD labels stay PAD (== -100->PAD path)."""
    B = tgt.shape[0]
    return jnp.concatenate(
        [jnp.full((B, 1), START_ID, tgt.dtype), tgt[:, :-1]], axis=1)


def code_reviewer_forward(params1, params2, src1, src2, tgt1, tgt2,
                          alpha=ALPHA, compare_embeddings=True):
    """Mirrors CodeReviewer.forward: returns (total_loss, loss1, loss2, pred1, pred2)."""
    B, L1 = src1.shape
    T1 = tgt1.shape[1]
    T2 = tgt2.shape[1]
    V, D = params1["E"].shape
    F = params1["enc_w1"].shape[1]

    # ---------------- stage 1: one fused pallas_call ----------------
    src1 = src1.astype(jnp.int32)
    tgt1 = tgt1.astype(jnp.int32)
    dec1 = _shift_right(tgt1)
    loss1, psoft1, enc1 = make_stage1_call(B, L1, T1, V, D, F)(
        src1.reshape(B * L1, 1), src1, dec1.reshape(B * T1, 1), tgt1.reshape(B * T1, 1),
        params1["E"], params1["enc_wqkv"], params1["enc_wo"], params1["enc_w1"],
        params1["enc_w2"], params1["dec_wsqkv"], params1["dec_wso"], params1["dec_wcq"],
        params1["dec_wckv"], params1["dec_wco"], params1["dec_w1"], params1["dec_w2"])
    pred1 = psoft1.reshape(B, T1)                               # differentiable-round output

    # ---------------- stage 2: one fused pallas_call ----------------
    # inpt_2 = cat(src2, <msg>, pred1); round/clip/mask/labels/MSE/total handled in-kernel.
    msg = jnp.full((B, 1), float(MSG_ID), jnp.float32)
    inpt2 = jnp.concatenate([src2.astype(jnp.float32), msg, pred1], axis=1)  # (B, L2)
    L2 = inpt2.shape[1]
    if compare_embeddings and L2 != L1:
        raise ValueError("encoder lengths must match to compare embeddings")
    tgt2 = tgt2.astype(jnp.int32)
    dec2 = _shift_right(tgt2)
    total, loss2, pred2_col = make_stage2_call(
        B, L2, T2, V, D, F, float(alpha), bool(compare_embeddings))(
        inpt2.reshape(B * L2, 1), inpt2, dec2.reshape(B * T2, 1), tgt2.reshape(B * T2, 1),
        enc1, loss1,
        params2["E"], params2["enc_wqkv"], params2["enc_wo"], params2["enc_w1"],
        params2["enc_w2"], params2["dec_wsqkv"], params2["dec_wso"], params2["dec_wcq"],
        params2["dec_wckv"], params2["dec_wco"], params2["dec_w1"], params2["dec_w2"])
    pred2 = pred2_col.reshape(B, T2)

    return total[0, 0], loss1[0, 0], loss2[0, 0], pred1, pred2


# ----------------------------------- main -----------------------------------
if __name__ == "__main__":
    key = jax.random.PRNGKey(0)
    k_p1, k_p2, k_s1, k_s2, k_t1, k_t2 = jax.random.split(key, 6)

    params1 = init_params(k_p1)
    params2 = init_params(k_p2)

    B = 2
    L_SRC1 = 16   # chosen so len(src2) + 1 + len(tgt1) == len(src1) (embeddings comparable)
    L_SRC2 = 7
    T_TGT1 = 8
    T_TGT2 = 8

    src1 = jax.random.randint(k_s1, (B, L_SRC1), 5, VOCAB, dtype=jnp.int32)
    src1 = src1.at[:, -2:].set(PAD_ID)          # trailing padding -> exercises attention mask
    src2 = jax.random.randint(k_s2, (B, L_SRC2), 5, VOCAB, dtype=jnp.int32)
    tgt1 = jax.random.randint(k_t1, (B, T_TGT1), 5, VOCAB, dtype=jnp.int32)
    tgt1 = tgt1.at[:, -1].set(PAD_ID)           # exercises labels==pad -> -100 path
    tgt2 = jax.random.randint(k_t2, (B, T_TGT2), 5, VOCAB, dtype=jnp.int32)
    tgt2 = tgt2.at[:, -1].set(PAD_ID)

    fwd = jax.jit(code_reviewer_forward,
                  static_argnames=("alpha", "compare_embeddings"))
    total_loss, loss1, loss2, pred1, pred2 = fwd(
        params1, params2, src1, src2, tgt1, tgt2,
        alpha=ALPHA, compare_embeddings=True)

    jax.block_until_ready(total_loss)
    jax.block_until_ready(pred1)
    jax.block_until_ready(pred2)

    assert pred1.shape == (B, T_TGT1)
    assert pred2.shape == (B, T_TGT2)
    assert bool(jnp.isfinite(total_loss))
    print("KERNEL_OK")
</pallas_src>

<mosaic_0001>
module attributes {stable_mosaic.version = 11 : i64} {
  func.func @kernel(%arg0: memref<32x1xi32, #tpu.memory_space<vmem>>, %arg1: memref<2x16xi32, #tpu.memory_space<vmem>>, %arg2: memref<16x1xi32, #tpu.memory_space<vmem>>, %arg3: memref<16x1xi32, #tpu.memory_space<vmem>>, %arg4: memref<64x32xf32, #tpu.memory_space<vmem>>, %arg5: memref<32x96xf32, #tpu.memory_space<vmem>>, %arg6: memref<32x32xf32, #tpu.memory_space<vmem>>, %arg7: memref<32x64xf32, #tpu.memory_space<vmem>>, %arg8: memref<64x32xf32, #tpu.memory_space<vmem>>, %arg9: memref<32x96xf32, #tpu.memory_space<vmem>>, %arg10: memref<32x32xf32, #tpu.memory_space<vmem>>, %arg11: memref<32x32xf32, #tpu.memory_space<vmem>>, %arg12: memref<32x64xf32, #tpu.memory_space<vmem>>, %arg13: memref<32x32xf32, #tpu.memory_space<vmem>>, %arg14: memref<32x64xf32, #tpu.memory_space<vmem>>, %arg15: memref<64x32xf32, #tpu.memory_space<vmem>>, %arg16: memref<1x1xf32, #tpu.memory_space<vmem>>, %arg17: memref<16x1xf32, #tpu.memory_space<vmem>>, %arg18: memref<32x32xf32, #tpu.memory_space<vmem>>) attributes {dimension_semantics = [], scalar_prefetch = 0 : i64, scratch_operands = 0 : i64, tpu.core_type = #tpu.core_type<tc>} {
    %c0 = arith.constant 0 : index
    %c0_0 = arith.constant 0 : index
    %0 = vector.load %arg0[%c0, %c0_0] : memref<32x1xi32, #tpu.memory_space<vmem>>, vector<32x1xi32>
    %c0_1 = arith.constant 0 : index
    %c0_2 = arith.constant 0 : index
    %1 = vector.load %arg2[%c0_1, %c0_2] : memref<16x1xi32, #tpu.memory_space<vmem>>, vector<16x1xi32>
    %c0_3 = arith.constant 0 : index
    %c0_4 = arith.constant 0 : index
    %2 = vector.load %arg3[%c0_3, %c0_4] : memref<16x1xi32, #tpu.memory_space<vmem>>, vector<16x1xi32>
    %c0_5 = arith.constant 0 : index
    %c0_6 = arith.constant 0 : index
    %3 = vector.load %arg4[%c0_5, %c0_6] : memref<64x32xf32, #tpu.memory_space<vmem>>, vector<64x32xf32>
    %c0_7 = arith.constant 0 : index
    %c0_8 = arith.constant 0 : index
    %4 = vector.load %arg5[%c0_7, %c0_8] : memref<32x96xf32, #tpu.memory_space<vmem>>, vector<32x96xf32>
    %c0_9 = arith.constant 0 : index
    %c0_10 = arith.constant 0 : index
    %5 = vector.load %arg6[%c0_9, %c0_10] : memref<32x32xf32, #tpu.memory_space<vmem>>, vector<32x32xf32>
    %c0_11 = arith.constant 0 : index
    %c0_12 = arith.constant 0 : index
    %6 = vector.load %arg7[%c0_11, %c0_12] : memref<32x64xf32, #tpu.memory_space<vmem>>, vector<32x64xf32>
    %c0_13 = arith.constant 0 : index
    %c0_14 = arith.constant 0 : index
    %7 = vector.load %arg8[%c0_13, %c0_14] : memref<64x32xf32, #tpu.memory_space<vmem>>, vector<64x32xf32>
    %c0_15 = arith.constant 0 : index
    %c0_16 = arith.constant 0 : index
    %8 = vector.load %arg9[%c0_15, %c0_16] : memref<32x96xf32, #tpu.memory_space<vmem>>, vector<32x96xf32>
    %c0_17 = arith.constant 0 : index
    %c0_18 = arith.constant 0 : index
    %9 = vector.load %arg10[%c0_17, %c0_18] : memref<32x32xf32, #tpu.memory_space<vmem>>, vector<32x32xf32>
    %c0_19 = arith.constant 0 : index
    %c0_20 = arith.constant 0 : index
    %10 = vector.load %arg11[%c0_19, %c0_20] : memref<32x32xf32, #tpu.memory_space<vmem>>, vector<32x32xf32>
    %c0_21 = arith.constant 0 : index
    %c0_22 = arith.constant 0 : index
    %11 = vector.load %arg12[%c0_21, %c0_22] : memref<32x64xf32, #tpu.memory_space<vmem>>, vector<32x64xf32>
    %c0_23 = arith.constant 0 : index
    %c0_24 = arith.constant 0 : index
    %12 = vector.load %arg13[%c0_23, %c0_24] : memref<32x32xf32, #tpu.memory_space<vmem>>, vector<32x32xf32>
    %c0_25 = arith.constant 0 : index
    %c0_26 = arith.constant 0 : index
    %13 = vector.load %arg14[%c0_25, %c0_26] : memref<32x64xf32, #tpu.memory_space<vmem>>, vector<32x64xf32>
    %c0_27 = arith.constant 0 : index
    %c0_28 = arith.constant 0 : index
    %14 = vector.load %arg15[%c0_27, %c0_28] : memref<64x32xf32, #tpu.memory_space<vmem>>, vector<64x32xf32>
    %15 = tpu.iota {dimensions = array<i32: 1>} : vector<16x64xi32>
    %16 = tpu.iota {dimensions = array<i32: 1>} : vector<8x64xi32>
    %17 = arith.sitofp %16 : vector<8x64xi32> to vector<8x64xf32>
    %18 = tpu.iota {dimensions = array<i32: 1>} : vector<8x8xi32>
    %19 = tpu.iota {dimensions = array<i32: 0>} : vector<8x8xi32>
    %20 = arith.cmpi sle, %18, %19 : vector<8x8xi32>
    %c0_29 = arith.constant 0 : index
    %c0_30 = arith.constant 0 : index
    %21 = vector.load %arg1[%c0_29, %c0_30] : memref<2x16xi32, #tpu.memory_space<vmem>>, vector<1x16xi32>
    %c0_i32 = arith.constant 0 : i32
    %22 = vector.broadcast %c0_i32 : i32 to vector<1x16xi32>
    %23 = arith.cmpi ne, %21, %22 : vector<1x16xi32>
    %24 = vector.extract_strided_slice %0 {offsets = [0, 0], sizes = [16, 1], strides = [1, 1]} : vector<32x1xi32> to vector<16x1xi32>
    %25 = vector.broadcast %24 : vector<16x1xi32> to vector<16x64xi32>
    %26 = arith.cmpi eq, %15, %25 : vector<16x64xi32>
    %27 = arith.extui %26 : vector<16x64xi1> to vector<16x64xi32>
    %28 = arith.sitofp %27 : vector<16x64xi32> to vector<16x64xf32>
    %cst = arith.constant dense<0.000000e+00> : vector<16x32xf32>
    %29 = tpu.matmul %28, %3, %cst {dimension_numbers = #tpu.dot_dimension_numbers<[1], [0], [0], [1], [0, 0, 1, 1], [], []>} : vector<16x64xf32>, vector<64x32xf32>, vector<16x32xf32> -> vector<16x32xf32>
    %30 = arith.mulf %29, %29 : vector<16x32xf32>
    %cst_31 = arith.constant dense<0.000000e+00> : vector<16xf32>
    %31 = vector.multi_reduction <add>, %30, %cst_31 [1] : vector<16x32xf32> to vector<16xf32>
    %32 = vector.shape_cast %31 : vector<16xf32> to vector<16x1xf32>
    %cst_32 = arith.constant 3.200000e+01 : f32
    %33 = vector.broadcast %cst_32 : f32 to vector<16x1xf32>
    %34 = arith.divf %32, %33 : vector<16x1xf32>
    %cst_33 = arith.constant 9.99999997E-7 : f32
    %35 = vector.broadcast %cst_33 : f32 to vector<16x1xf32>
    %36 = arith.addf %34, %35 : vector<16x1xf32>
    %37 = math.rsqrt %36 : vector<16x1xf32>
    %38 = vector.broadcast %37 : vector<16x1xf32> to vector<16x32xf32>
    %39 = arith.mulf %29, %38 : vector<16x32xf32>
    %cst_34 = arith.constant dense<0.000000e+00> : vector<16x96xf32>
    %40 = tpu.matmul %39, %4, %cst_34 {dimension_numbers = #tpu.dot_dimension_numbers<[1], [0], [0], [1], [0, 0, 1, 1], [], []>} : vector<16x32xf32>, vector<32x96xf32>, vector<16x96xf32> -> vector<16x96xf32>
    %41 = vector.extract_strided_slice %40 {offsets = [0, 0], sizes = [16, 32], strides = [1, 1]} : vector<16x96xf32> to vector<16x32xf32>
    %42 = vector.extract_strided_slice %40 {offsets = [0, 32], sizes = [16, 32], strides = [1, 1]} : vector<16x96xf32> to vector<16x32xf32>
    %43 = vector.extract_strided_slice %40 {offsets = [0, 64], sizes = [16, 32], strides = [1, 1]} : vector<16x96xf32> to vector<16x32xf32>
    %cst_35 = arith.constant dense<0.000000e+00> : vector<16x16xf32>
    %44 = tpu.matmul %41, %42, %cst_35 {dimension_numbers = #tpu.dot_dimension_numbers<[1], [1], [0], [0], [0, 0, 1, 0], [], []>} : vector<16x32xf32>, vector<16x32xf32>, vector<16x16xf32> -> vector<16x16xf32>
    %cst_36 = arith.constant 0.176776692 : f32
    %45 = vector.broadcast %cst_36 : f32 to vector<16x16xf32>
    %46 = arith.mulf %44, %45 : vector<16x16xf32>
    %cst_37 = arith.constant -1.000000e+09 : f32
    %47 = vector.shape_cast %23 : vector<1x16xi1> to vector<1x16xi1>
    %48 = vector.broadcast %47 : vector<1x16xi1> to vector<16x16xi1>
    %49 = vector.broadcast %cst_37 : f32 to vector<16x16xf32>
    %50 = arith.select %48, %46, %49 : vector<16x16xi1>, vector<16x16xf32>
    %cst_38 = arith.constant dense<0xFF800000> : vector<16xf32>
    %51 = vector.multi_reduction <maximumf>, %50, %cst_38 [1] : vector<16x16xf32> to vector<16xf32>
    %52 = vector.shape_cast %51 : vector<16xf32> to vector<16x1xf32>
    %53 = vector.broadcast %52 : vector<16x1xf32> to vector<16x16xf32>
    %54 = arith.subf %50, %53 : vector<16x16xf32>
    %55 = math.exp %54 : vector<16x16xf32>
    %cst_39 = arith.constant dense<0.000000e+00> : vector<16xf32>
    %56 = vector.multi_reduction <add>, %55, %cst_39 [1] : vector<16x16xf32> to vector<16xf32>
    %57 = vector.shape_cast %56 : vector<16xf32> to vector<16x1xf32>
    %58 = tpu.reciprocal %57 {approx = true} : vector<16x1xf32> -> vector<16x1xf32>
    %59 = vector.broadcast %58 : vector<16x1xf32> to vector<16x16xf32>
    %60 = arith.mulf %55, %59 : vector<16x16xf32>
    %cst_40 = arith.constant dense<0.000000e+00> : vector<16x32xf32>
    %61 = tpu.matmul %60, %43, %cst_40 {dimension_numbers = #tpu.dot_dimension_numbers<[1], [0], [0], [1], [0, 0, 1, 1], [], []>} : vector<16x16xf32>, vector<16x32xf32>, vector<16x32xf32> -> vector<16x32xf32>
    %cst_41 = arith.constant dense<0.000000e+00> : vector<16x32xf32>
    %62 = tpu.matmul %61, %5, %cst_41 {dimension_numbers = #tpu.dot_dimension_numbers<[1], [0], [0], [1], [0, 0, 1, 1], [], []>} : vector<16x32xf32>, vector<32x32xf32>, vector<16x32xf32> -> vector<16x32xf32>
    %63 = arith.addf %29, %62 : vector<16x32xf32>
    %64 = arith.mulf %63, %63 : vector<16x32xf32>
    %cst_42 = arith.constant dense<0.000000e+00> : vector<16xf32>
    %65 = vector.multi_reduction <add>, %64, %cst_42 [1] : vector<16x32xf32> to vector<16xf32>
    %66 = vector.shape_cast %65 : vector<16xf32> to vector<16x1xf32>
    %cst_43 = arith.constant 3.200000e+01 : f32
    %67 = vector.broadcast %cst_43 : f32 to vector<16x1xf32>
    %68 = arith.divf %66, %67 : vector<16x1xf32>
    %cst_44 = arith.constant 9.99999997E-7 : f32
    %69 = vector.broadcast %cst_44 : f32 to vector<16x1xf32>
    %70 = arith.addf %68, %69 : vector<16x1xf32>
    %71 = math.rsqrt %70 : vector<16x1xf32>
    %72 = vector.broadcast %71 : vector<16x1xf32> to vector<16x32xf32>
    %73 = arith.mulf %63, %72 : vector<16x32xf32>
    %cst_45 = arith.constant dense<0.000000e+00> : vector<16x64xf32>
    %74 = tpu.matmul %73, %6, %cst_45 {dimension_numbers = #tpu.dot_dimension_numbers<[1], [0], [0], [1], [0, 0, 1, 1], [], []>} : vector<16x32xf32>, vector<32x64xf32>, vector<16x64xf32> -> vector<16x64xf32>
    %cst_46 = arith.constant 0.000000e+00 : f32
    %75 = vector.broadcast %cst_46 : f32 to vector<16x64xf32>
    %76 = arith.maximumf %74, %75 : vector<16x64xf32>
    %cst_47 = arith.constant dense<0.000000e+00> : vector<16x32xf32>
    %77 = tpu.matmul %76, %7, %cst_47 {dimension_numbers = #tpu.dot_dimension_numbers<[1], [0], [0], [1], [0, 0, 1, 1], [], []>} : vector<16x64xf32>, vector<64x32xf32>, vector<16x32xf32> -> vector<16x32xf32>
    %78 = arith.addf %63, %77 : vector<16x32xf32>
    %79 = arith.mulf %78, %78 : vector<16x32xf32>
    %cst_48 = arith.constant dense<0.000000e+00> : vector<16xf32>
    %80 = vector.multi_reduction <add>, %79, %cst_48 [1] : vector<16x32xf32> to vector<16xf32>
    %81 = vector.shape_cast %80 : vector<16xf32> to vector<16x1xf32>
    %cst_49 = arith.constant 3.200000e+01 : f32
    %82 = vector.broadcast %cst_49 : f32 to vector<16x1xf32>
    %83 = arith.divf %81, %82 : vector<16x1xf32>
    %cst_50 = arith.constant 9.99999997E-7 : f32
    %84 = vector.broadcast %cst_50 : f32 to vector<16x1xf32>
    %85 = arith.addf %83, %84 : vector<16x1xf32>
    %86 = math.rsqrt %85 : vector<16x1xf32>
    %87 = vector.broadcast %86 : vector<16x1xf32> to vector<16x32xf32>
    %88 = arith.mulf %78, %87 : vector<16x32xf32>
    %c0_51 = arith.constant 0 : index
    %c0_52 = arith.constant 0 : index
    %89 = vector.load %arg18[%c0_51, %c0_52] : memref<32x32xf32, #tpu.memory_space<vmem>>, vector<16x32xf32>
    tpu.vector_store %arg18[%c0_51, %c0_52], %88 {strides = array<i32>} : memref<32x32xf32, #tpu.memory_space<vmem>>, vector<16x32xf32>,
    %90 = vector.extract_strided_slice %1 {offsets = [0, 0], sizes = [8, 1], strides = [1, 1]} : vector<16x1xi32> to vector<8x1xi32>
    %91 = vector.broadcast %90 : vector<8x1xi32> to vector<8x64xi32>
    %92 = arith.cmpi eq, %16, %91 : vector<8x64xi32>
    %93 = arith.extui %92 : vector<8x64xi1> to vector<8x64xi32>
    %94 = arith.sitofp %93 : vector<8x64xi32> to vector<8x64xf32>
    %cst_53 = arith.constant dense<0.000000e+00> : vector<8x32xf32>
    %95 = tpu.matmul %94, %3, %cst_53 {dimension_numbers = #tpu.dot_dimension_numbers<[1], [0], [0], [1], [0, 0, 1, 1], [], []>} : vector<8x64xf32>, vector<64x32xf32>, vector<8x32xf32> -> vector<8x32xf32>
    %96 = arith.mulf %95, %95 : vector<8x32xf32>
    %cst_54 = arith.constant dense<0.000000e+00> : vector<8xf32>
    %97 = vector.multi_reduction <add>, %96, %cst_54 [1] : vector<8x32xf32> to vector<8xf32>
    %98 = vector.shape_cast %97 : vector<8xf32> to vector<8x1xf32>
    %cst_55 = arith.constant 3.200000e+01 : f32
    %99 = vector.broadcast %cst_55 : f32 to vector<8x1xf32>
    %100 = arith.divf %98, %99 : vector<8x1xf32>
    %cst_56 = arith.constant 9.99999997E-7 : f32
    %101 = vector.broadcast %cst_56 : f32 to vector<8x1xf32>
    %102 = arith.addf %100, %101 : vector<8x1xf32>
    %103 = math.rsqrt %102 : vector<8x1xf32>
    %104 = vector.broadcast %103 : vector<8x1xf32> to vector<8x32xf32>
    %105 = arith.mulf %95, %104 : vector<8x32xf32>
    %cst_57 = arith.constant dense<0.000000e+00> : vector<8x96xf32>
    %106 = tpu.matmul %105, %8, %cst_57 {dimension_numbers = #tpu.dot_dimension_numbers<[1], [0], [0], [1], [0, 0, 1, 1], [], []>} : vector<8x32xf32>, vector<32x96xf32>, vector<8x96xf32> -> vector<8x96xf32>
    %107 = vector.extract_strided_slice %106 {offsets = [0, 0], sizes = [8, 32], strides = [1, 1]} : vector<8x96xf32> to vector<8x32xf32>
    %108 = vector.extract_strided_slice %106 {offsets = [0, 32], sizes = [8, 32], strides = [1, 1]} : vector<8x96xf32> to vector<8x32xf32>
    %109 = vector.extract_strided_slice %106 {offsets = [0, 64], sizes = [8, 32], strides = [1, 1]} : vector<8x96xf32> to vector<8x32xf32>
    %cst_58 = arith.constant dense<0.000000e+00> : vector<8x8xf32>
    %110 = tpu.matmul %107, %108, %cst_58 {dimension_numbers = #tpu.dot_dimension_numbers<[1], [1], [0], [0], [0, 0, 1, 0], [], []>} : vector<8x32xf32>, vector<8x32xf32>, vector<8x8xf32> -> vector<8x8xf32>
    %cst_59 = arith.constant 0.176776692 : f32
    %111 = vector.broadcast %cst_59 : f32 to vector<8x8xf32>
    %112 = arith.mulf %110, %111 : vector<8x8xf32>
    %cst_60 = arith.constant -1.000000e+09 : f32
    %113 = vector.broadcast %cst_60 : f32 to vector<8x8xf32>
    %114 = arith.select %20, %112, %113 : vector<8x8xi1>, vector<8x8xf32>
    %cst_61 = arith.constant dense<0xFF800000> : vector<8xf32>
    %115 = vector.multi_reduction <maximumf>, %114, %cst_61 [1] : vector<8x8xf32> to vector<8xf32>
    %116 = vector.shape_cast %115 : vector<8xf32> to vector<8x1xf32>
    %117 = vector.broadcast %116 : vector<8x1xf32> to vector<8x8xf32>
    %118 = arith.subf %114, %117 : vector<8x8xf32>
    %119 = math.exp %118 : vector<8x8xf32>
    %cst_62 = arith.constant dense<0.000000e+00> : vector<8xf32>
    %120 = vector.multi_reduction <add>, %119, %cst_62 [1] : vector<8x8xf32> to vector<8xf32>
    %121 = vector.shape_cast %120 : vector<8xf32> to vector<8x1xf32>
    %122 = tpu.reciprocal %121 {approx = true} : vector<8x1xf32> -> vector<8x1xf32>
    %123 = vector.broadcast %122 : vector<8x1xf32> to vector<8x8xf32>
    %124 = arith.mulf %119, %123 : vector<8x8xf32>
    %cst_63 = arith.constant dense<0.000000e+00> : vector<8x32xf32>
    %125 = tpu.matmul %124, %109, %cst_63 {dimension_numbers = #tpu.dot_dimension_numbers<[1], [0], [0], [1], [0, 0, 1, 1], [], []>} : vector<8x8xf32>, vector<8x32xf32>, vector<8x32xf32> -> vector<8x32xf32>
    %cst_64 = arith.constant dense<0.000000e+00> : vector<8x32xf32>
    %126 = tpu.matmul %125, %9, %cst_64 {dimension_numbers = #tpu.dot_dimension_numbers<[1], [0], [0], [1], [0, 0, 1, 1], [], []>} : vector<8x32xf32>, vector<32x32xf32>, vector<8x32xf32> -> vector<8x32xf32>
    %127 = arith.addf %95, %126 : vector<8x32xf32>
    %128 = arith.mulf %127, %127 : vector<8x32xf32>
    %cst_65 = arith.constant dense<0.000000e+00> : vector<8xf32>
    %129 = vector.multi_reduction <add>, %128, %cst_65 [1] : vector<8x32xf32> to vector<8xf32>
    %130 = vector.shape_cast %129 : vector<8xf32> to vector<8x1xf32>
    %cst_66 = arith.constant 3.200000e+01 : f32
    %131 = vector.broadcast %cst_66 : f32 to vector<8x1xf32>
    %132 = arith.divf %130, %131 : vector<8x1xf32>
    %cst_67 = arith.constant 9.99999997E-7 : f32
    %133 = vector.broadcast %cst_67 : f32 to vector<8x1xf32>
    %134 = arith.addf %132, %133 : vector<8x1xf32>
    %135 = math.rsqrt %134 : vector<8x1xf32>
    %136 = vector.broadcast %135 : vector<8x1xf32> to vector<8x32xf32>
    %137 = arith.mulf %127, %136 : vector<8x32xf32>
    %cst_68 = arith.constant dense<0.000000e+00> : vector<8x32xf32>
    %138 = tpu.matmul %137, %10, %cst_68 {dimension_numbers = #tpu.dot_dimension_numbers<[1], [0], [0], [1], [0, 0, 1, 1], [], []>} : vector<8x32xf32>, vector<32x32xf32>, vector<8x32xf32> -> vector<8x32xf32>
    %cst_69 = arith.constant dense<0.000000e+00> : vector<16x64xf32>
    %139 = tpu.matmul %88, %11, %cst_69 {dimension_numbers = #tpu.dot_dimension_numbers<[1], [0], [0], [1], [0, 0, 1, 1], [], []>} : vector<16x32xf32>, vector<32x64xf32>, vector<16x64xf32> -> vector<16x64xf32>
    %140 = vector.extract_strided_slice %139 {offsets = [0, 0], sizes = [16, 32], strides = [1, 1]} : vector<16x64xf32> to vector<16x32xf32>
    %141 = vector.extract_strided_slice %139 {offsets = [0, 32], sizes = [16, 32], strides = [1, 1]} : vector<16x64xf32> to vector<16x32xf32>
    %cst_70 = arith.constant dense<0.000000e+00> : vector<8x16xf32>
    %142 = tpu.matmul %138, %140, %cst_70 {dimension_numbers = #tpu.dot_dimension_numbers<[1], [1], [0], [0], [0, 0, 1, 0], [], []>} : vector<8x32xf32>, vector<16x32xf32>, vector<8x16xf32> -> vector<8x16xf32>
    %cst_71 = arith.constant 0.176776692 : f32
    %143 = vector.broadcast %cst_71 : f32 to vector<8x16xf32>
    %144 = arith.mulf %142, %143 : vector<8x16xf32>
    %cst_72 = arith.constant -1.000000e+09 : f32
    %145 = vector.shape_cast %23 : vector<1x16xi1> to vector<1x16xi1>
    %146 = vector.broadcast %145 : vector<1x16xi1> to vector<8x16xi1>
    %147 = vector.broadcast %cst_72 : f32 to vector<8x16xf32>
    %148 = arith.select %146, %144, %147 : vector<8x16xi1>, vector<8x16xf32>
    %cst_73 = arith.constant dense<0xFF800000> : vector<8xf32>
    %149 = vector.multi_reduction <maximumf>, %148, %cst_73 [1] : vector<8x16xf32> to vector<8xf32>
    %150 = vector.shape_cast %149 : vector<8xf32> to vector<8x1xf32>
    %151 = vector.broadcast %150 : vector<8x1xf32> to vector<8x16xf32>
    %152 = arith.subf %148, %151 : vector<8x16xf32>
    %153 = math.exp %152 : vector<8x16xf32>
    %cst_74 = arith.constant dense<0.000000e+00> : vector<8xf32>
    %154 = vector.multi_reduction <add>, %153, %cst_74 [1] : vector<8x16xf32> to vector<8xf32>
    %155 = vector.shape_cast %154 : vector<8xf32> to vector<8x1xf32>
    %156 = tpu.reciprocal %155 {approx = true} : vector<8x1xf32> -> vector<8x1xf32>
    %157 = vector.broadcast %156 : vector<8x1xf32> to vector<8x16xf32>
    %158 = arith.mulf %153, %157 : vector<8x16xf32>
    %cst_75 = arith.constant dense<0.000000e+00> : vector<8x32xf32>
    %159 = tpu.matmul %158, %141, %cst_75 {dimension_numbers = #tpu.dot_dimension_numbers<[1], [0], [0], [1], [0, 0, 1, 1], [], []>} : vector<8x16xf32>, vector<16x32xf32>, vector<8x32xf32> -> vector<8x32xf32>
    %cst_76 = arith.constant dense<0.000000e+00> : vector<8x32xf32>
    %160 = tpu.matmul %159, %12, %cst_76 {dimension_numbers = #tpu.dot_dimension_numbers<[1], [0], [0], [1], [0, 0, 1, 1], [], []>} : vector<8x32xf32>, vector<32x32xf32>, vector<8x32xf32> -> vector<8x32xf32>
    %161 = arith.addf %127, %160 : vector<8x32xf32>
    %162 = arith.mulf %161, %161 : vector<8x32xf32>
    %cst_77 = arith.constant dense<0.000000e+00> : vector<8xf32>
    %163 = vector.multi_reduction <add>, %162, %cst_77 [1] : vector<8x32xf32> to vector<8xf32>
    %164 = vector.shape_cast %163 : vector<8xf32> to vector<8x1xf32>
    %cst_78 = arith.constant 3.200000e+01 : f32
    %165 = vector.broadcast %cst_78 : f32 to vector<8x1xf32>
    %166 = arith.divf %164, %165 : vector<8x1xf32>
    %cst_79 = arith.constant 9.99999997E-7 : f32
    %167 = vector.broadcast %cst_79 : f32 to vector<8x1xf32>
    %168 = arith.addf %166, %167 : vector<8x1xf32>
    %169 = math.rsqrt %168 : vector<8x1xf32>
    %170 = vector.broadcast %169 : vector<8x1xf32> to vector<8x32xf32>
    %171 = arith.mulf %161, %170 : vector<8x32xf32>
    %cst_80 = arith.constant dense<0.000000e+00> : vector<8x64xf32>
    %172 = tpu.matmul %171, %13, %cst_80 {dimension_numbers = #tpu.dot_dimension_numbers<[1], [0], [0], [1], [0, 0, 1, 1], [], []>} : vector<8x32xf32>, vector<32x64xf32>, vector<8x64xf32> -> vector<8x64xf32>
    %cst_81 = arith.constant 0.000000e+00 : f32
    %173 = vector.broadcast %cst_81 : f32 to vector<8x64xf32>
    %174 = arith.maximumf %172, %173 : vector<8x64xf32>
    %cst_82 = arith.constant dense<0.000000e+00> : vector<8x32xf32>
    %175 = tpu.matmul %174, %14, %cst_82 {dimension_numbers = #tpu.dot_dimension_numbers<[1], [0], [0], [1], [0, 0, 1, 1], [], []>} : vector<8x64xf32>, vector<64x32xf32>, vector<8x32xf32> -> vector<8x32xf32>
    %176 = arith.addf %161, %175 : vector<8x32xf32>
    %177 = arith.mulf %176, %176 : vector<8x32xf32>
    %cst_83 = arith.constant dense<0.000000e+00> : vector<8xf32>
    %178 = vector.multi_reduction <add>, %177, %cst_83 [1] : vector<8x32xf32> to vector<8xf32>
    %179 = vector.shape_cast %178 : vector<8xf32> to vector<8x1xf32>
    %cst_84 = arith.constant 3.200000e+01 : f32
    %180 = vector.broadcast %cst_84 : f32 to vector<8x1xf32>
    %181 = arith.divf %179, %180 : vector<8x1xf32>
    %cst_85 = arith.constant 9.99999997E-7 : f32
    %182 = vector.broadcast %cst_85 : f32 to vector<8x1xf32>
    %183 = arith.addf %181, %182 : vector<8x1xf32>
    %184 = math.rsqrt %183 : vector<8x1xf32>
    %185 = vector.broadcast %184 : vector<8x1xf32> to vector<8x32xf32>
    %186 = arith.mulf %176, %185 : vector<8x32xf32>
    %cst_86 = arith.constant dense<0.000000e+00> : vector<8x64xf32>
    %187 = tpu.matmul %186, %3, %cst_86 {dimension_numbers = #tpu.dot_dimension_numbers<[1], [1], [0], [0], [0, 0, 1, 0], [], []>} : vector<8x32xf32>, vector<64x32xf32>, vector<8x64xf32> -> vector<8x64xf32>
    %188 = vector.extract_strided_slice %2 {offsets = [0, 0], sizes = [8, 1], strides = [1, 1]} : vector<16x1xi32> to vector<8x1xi32>
    %c0_i32_87 = arith.constant 0 : i32
    %189 = vector.broadcast %c0_i32_87 : i32 to vector<8x1xi32>
    %190 = arith.cmpi eq, %188, %189 : vector<8x1xi32>
    %c-100_i32 = arith.constant -100 : i32
    %191 = vector.broadcast %c-100_i32 : i32 to vector<8x1xi32>
    %192 = arith.select %190, %191, %188 : vector<8x1xi1>, vector<8x1xi32>
    %c-100_i32_88 = arith.constant -100 : i32
    %193 = vector.broadcast %c-100_i32_88 : i32 to vector<8x1xi32>
    %194 = arith.cmpi ne, %192, %193 : vector<8x1xi32>
    %c0_i32_89 = arith.constant 0 : i32
    %195 = vector.broadcast %c0_i32_89 : i32 to vector<8x1xi32>
    %196 = arith.select %194, %192, %195 : vector<8x1xi1>, vector<8x1xi32>
    %197 = vector.broadcast %196 : vector<8x1xi32> to vector<8x64xi32>
    %198 = arith.cmpi eq, %16, %197 : vector<8x64xi32>
    %199 = arith.extui %198 : vector<8x64xi1> to vector<8x64xi32>
    %200 = arith.sitofp %199 : vector<8x64xi32> to vector<8x64xf32>
    %cst_90 = arith.constant dense<0xFF800000> : vector<8xf32>
    %201 = vector.multi_reduction <maximumf>, %187, %cst_90 [1] : vector<8x64xf32> to vector<8xf32>
    %202 = vector.shape_cast %201 : vector<8xf32> to vector<8x1xf32>
    %203 = vector.broadcast %202 : vector<8x1xf32> to vector<8x64xf32>
    %204 = arith.subf %187, %203 : vector<8x64xf32>
    %205 = math.exp %204 : vector<8x64xf32>
    %cst_91 = arith.constant dense<0.000000e+00> : vector<8xf32>
    %206 = vector.multi_reduction <add>, %205, %cst_91 [1] : vector<8x64xf32> to vector<8xf32>
    %207 = vector.shape_cast %206 : vector<8xf32> to vector<8x1xf32>
    %208 = math.log %207 : vector<8x1xf32>
    %209 = arith.addf %208, %202 : vector<8x1xf32>
    %210 = arith.mulf %187, %200 : vector<8x64xf32>
    %cst_92 = arith.constant dense<0.000000e+00> : vector<8xf32>
    %211 = vector.multi_reduction <add>, %210, %cst_92 [1] : vector<8x64xf32> to vector<8xf32>
    %212 = vector.shape_cast %211 : vector<8xf32> to vector<8x1xf32>
    %213 = arith.extui %194 : vector<8x1xi1> to vector<8x1xi32>
    %214 = arith.sitofp %213 : vector<8x1xi32> to vector<8x1xf32>
    %215 = arith.subf %209, %212 : vector<8x1xf32>
    %216 = arith.mulf %215, %214 : vector<8x1xf32>
    %217 = vector.shape_cast %216 : vector<8x1xf32> to vector<1x8x1xf32>
    %cst_93 = arith.constant dense<0.000000e+00> : vector<1xf32>
    %218 = vector.multi_reduction <add>, %217, %cst_93 [1, 2] : vector<1x8x1xf32> to vector<1xf32>
    %219 = vector.shape_cast %218 : vector<1xf32> to vector<1x1x1xf32>
    %220 = vector.extract %219[0, 0, 0] : f32 from vector<1x1x1xf32>
    %221 = vector.shape_cast %214 : vector<8x1xf32> to vector<1x8x1xf32>
    %cst_94 = arith.constant dense<0.000000e+00> : vector<1xf32>
    %222 = vector.multi_reduction <add>, %221, %cst_94 [1, 2] : vector<1x8x1xf32> to vector<1xf32>
    %223 = vector.shape_cast %222 : vector<1xf32> to vector<1x1x1xf32>
    %224 = vector.extract %223[0, 0, 0] : f32 from vector<1x1x1xf32>
    %cst_95 = arith.constant 0.000000e+00 : f32
    %225 = arith.addf %cst_95, %220 : f32
    %cst_96 = arith.constant 0.000000e+00 : f32
    %226 = arith.addf %cst_96, %224 : f32
    %227 = vector.broadcast %202 : vector<8x1xf32> to vector<8x64xf32>
    %228 = arith.subf %187, %227 : vector<8x64xf32>
    %cst_97 = arith.constant 1.000000e+02 : f32
    %229 = vector.broadcast %cst_97 : f32 to vector<8x64xf32>
    %230 = arith.mulf %228, %229 : vector<8x64xf32>
    %231 = math.exp %230 : vector<8x64xf32>
    %cst_98 = arith.constant dense<0.000000e+00> : vector<8xf32>
    %232 = vector.multi_reduction <add>, %231, %cst_98 [1] : vector<8x64xf32> to vector<8xf32>
    %233 = vector.shape_cast %232 : vector<8xf32> to vector<8x1xf32>
    %234 = vector.broadcast %233 : vector<8x1xf32> to vector<8x64xf32>
    %235 = arith.divf %231, %234 : vector<8x64xf32>
    %236 = arith.mulf %235, %17 : vector<8x64xf32>
    %cst_99 = arith.constant dense<0.000000e+00> : vector<8xf32>
    %237 = vector.multi_reduction <add>, %236, %cst_99 [1] : vector<8x64xf32> to vector<8xf32>
    %238 = vector.shape_cast %237 : vector<8xf32> to vector<8x1xf32>
    %239 = math.roundeven %238 : vector<8x1xf32>
    %c0_100 = arith.constant 0 : index
    %c0_101 = arith.constant 0 : index
    %240 = vector.load %arg17[%c0_100, %c0_101] : memref<16x1xf32, #tpu.memory_space<vmem>>, vector<8x1xf32>
    tpu.vector_store %arg17[%c0_100, %c0_101], %239 {strides = array<i32>} : memref<16x1xf32, #tpu.memory_space<vmem>>, vector<8x1xf32>,
    %c1 = arith.constant 1 : index
    %c0_102 = arith.constant 0 : index
    %241 = vector.load %arg1[%c1, %c0_102] : memref<2x16xi32, #tpu.memory_space<vmem>>, vector<1x16xi32>
    %c0_i32_103 = arith.constant 0 : i32
    %242 = vector.broadcast %c0_i32_103 : i32 to vector<1x16xi32>
    %243 = arith.cmpi ne, %241, %242 : vector<1x16xi32>
    %244 = vector.extract_strided_slice %0 {offsets = [16, 0], sizes = [16, 1], strides = [1, 1]} : vector<32x1xi32> to vector<16x1xi32>
    %245 = vector.broadcast %244 : vector<16x1xi32> to vector<16x64xi32>
    %246 = arith.cmpi eq, %15, %245 : vector<16x64xi32>
    %247 = arith.extui %246 : vector<16x64xi1> to vector<16x64xi32>
    %248 = arith.sitofp %247 : vector<16x64xi32> to vector<16x64xf32>
    %cst_104 = arith.constant dense<0.000000e+00> : vector<16x32xf32>
    %249 = tpu.matmul %248, %3, %cst_104 {dimension_numbers = #tpu.dot_dimension_numbers<[1], [0], [0], [1], [0, 0, 1, 1], [], []>} : vector<16x64xf32>, vector<64x32xf32>, vector<16x32xf32> -> vector<16x32xf32>
    %250 = arith.mulf %249, %249 : vector<16x32xf32>
    %cst_105 = arith.constant dense<0.000000e+00> : vector<16xf32>
    %251 = vector.multi_reduction <add>, %250, %cst_105 [1] : vector<16x32xf32> to vector<16xf32>
    %252 = vector.shape_cast %251 : vector<16xf32> to vector<16x1xf32>
    %cst_106 = arith.constant 3.200000e+01 : f32
    %253 = vector.broadcast %cst_106 : f32 to vector<16x1xf32>
    %254 = arith.divf %252, %253 : vector<16x1xf32>
    %cst_107 = arith.constant 9.99999997E-7 : f32
    %255 = vector.broadcast %cst_107 : f32 to vector<16x1xf32>
    %256 = arith.addf %254, %255 : vector<16x1xf32>
    %257 = math.rsqrt %256 : vector<16x1xf32>
    %258 = vector.broadcast %257 : vector<16x1xf32> to vector<16x32xf32>
    %259 = arith.mulf %249, %258 : vector<16x32xf32>
    %cst_108 = arith.constant dense<0.000000e+00> : vector<16x96xf32>
    %260 = tpu.matmul %259, %4, %cst_108 {dimension_numbers = #tpu.dot_dimension_numbers<[1], [0], [0], [1], [0, 0, 1, 1], [], []>} : vector<16x32xf32>, vector<32x96xf32>, vector<16x96xf32> -> vector<16x96xf32>
    %261 = vector.extract_strided_slice %260 {offsets = [0, 0], sizes = [16, 32], strides = [1, 1]} : vector<16x96xf32> to vector<16x32xf32>
    %262 = vector.extract_strided_slice %260 {offsets = [0, 32], sizes = [16, 32], strides = [1, 1]} : vector<16x96xf32> to vector<16x32xf32>
    %263 = vector.extract_strided_slice %260 {offsets = [0, 64], sizes = [16, 32], strides = [1, 1]} : vector<16x96xf32> to vector<16x32xf32>
    %cst_109 = arith.constant dense<0.000000e+00> : vector<16x16xf32>
    %264 = tpu.matmul %261, %262, %cst_109 {dimension_numbers = #tpu.dot_dimension_numbers<[1], [1], [0], [0], [0, 0, 1, 0], [], []>} : vector<16x32xf32>, vector<16x32xf32>, vector<16x16xf32> -> vector<16x16xf32>
    %cst_110 = arith.constant 0.176776692 : f32
    %265 = vector.broadcast %cst_110 : f32 to vector<16x16xf32>
    %266 = arith.mulf %264, %265 : vector<16x16xf32>
    %cst_111 = arith.constant -1.000000e+09 : f32
    %267 = vector.shape_cast %243 : vector<1x16xi1> to vector<1x16xi1>
    %268 = vector.broadcast %267 : vector<1x16xi1> to vector<16x16xi1>
    %269 = vector.broadcast %cst_111 : f32 to vector<16x16xf32>
    %270 = arith.select %268, %266, %269 : vector<16x16xi1>, vector<16x16xf32>
    %cst_112 = arith.constant dense<0xFF800000> : vector<16xf32>
    %271 = vector.multi_reduction <maximumf>, %270, %cst_112 [1] : vector<16x16xf32> to vector<16xf32>
    %272 = vector.shape_cast %271 : vector<16xf32> to vector<16x1xf32>
    %273 = vector.broadcast %272 : vector<16x1xf32> to vector<16x16xf32>
    %274 = arith.subf %270, %273 : vector<16x16xf32>
    %275 = math.exp %274 : vector<16x16xf32>
    %cst_113 = arith.constant dense<0.000000e+00> : vector<16xf32>
    %276 = vector.multi_reduction <add>, %275, %cst_113 [1] : vector<16x16xf32> to vector<16xf32>
    %277 = vector.shape_cast %276 : vector<16xf32> to vector<16x1xf32>
    %278 = tpu.reciprocal %277 {approx = true} : vector<16x1xf32> -> vector<16x1xf32>
    %279 = vector.broadcast %278 : vector<16x1xf32> to vector<16x16xf32>
    %280 = arith.mulf %275, %279 : vector<16x16xf32>
    %cst_114 = arith.constant dense<0.000000e+00> : vector<16x32xf32>
    %281 = tpu.matmul %280, %263, %cst_114 {dimension_numbers = #tpu.dot_dimension_numbers<[1], [0], [0], [1], [0, 0, 1, 1], [], []>} : vector<16x16xf32>, vector<16x32xf32>, vector<16x32xf32> -> vector<16x32xf32>
    %cst_115 = arith.constant dense<0.000000e+00> : vector<16x32xf32>
    %282 = tpu.matmul %281, %5, %cst_115 {dimension_numbers = #tpu.dot_dimension_numbers<[1], [0], [0], [1], [0, 0, 1, 1], [], []>} : vector<16x32xf32>, vector<32x32xf32>, vector<16x32xf32> -> vector<16x32xf32>
    %283 = arith.addf %249, %282 : vector<16x32xf32>
    %284 = arith.mulf %283, %283 : vector<16x32xf32>
    %cst_116 = arith.constant dense<0.000000e+00> : vector<16xf32>
    %285 = vector.multi_reduction <add>, %284, %cst_116 [1] : vector<16x32xf32> to vector<16xf32>
    %286 = vector.shape_cast %285 : vector<16xf32> to vector<16x1xf32>
    %cst_117 = arith.constant 3.200000e+01 : f32
    %287 = vector.broadcast %cst_117 : f32 to vector<16x1xf32>
    %288 = arith.divf %286, %287 : vector<16x1xf32>
    %cst_118 = arith.constant 9.99999997E-7 : f32
    %289 = vector.broadcast %cst_118 : f32 to vector<16x1xf32>
    %290 = arith.addf %288, %289 : vector<16x1xf32>
    %291 = math.rsqrt %290 : vector<16x1xf32>
    %292 = vector.broadcast %291 : vector<16x1xf32> to vector<16x32xf32>
    %293 = arith.mulf %283, %292 : vector<16x32xf32>
    %cst_119 = arith.constant dense<0.000000e+00> : vector<16x64xf32>
    %294 = tpu.matmul %293, %6, %cst_119 {dimension_numbers = #tpu.dot_dimension_numbers<[1], [0], [0], [1], [0, 0, 1, 1], [], []>} : vector<16x32xf32>, vector<32x64xf32>, vector<16x64xf32> -> vector<16x64xf32>
    %cst_120 = arith.constant 0.000000e+00 : f32
    %295 = vector.broadcast %cst_120 : f32 to vector<16x64xf32>
    %296 = arith.maximumf %294, %295 : vector<16x64xf32>
    %cst_121 = arith.constant dense<0.000000e+00> : vector<16x32xf32>
    %297 = tpu.matmul %296, %7, %cst_121 {dimension_numbers = #tpu.dot_dimension_numbers<[1], [0], [0], [1], [0, 0, 1, 1], [], []>} : vector<16x64xf32>, vector<64x32xf32>, vector<16x32xf32> -> vector<16x32xf32>
    %298 = arith.addf %283, %297 : vector<16x32xf32>
    %299 = arith.mulf %298, %298 : vector<16x32xf32>
    %cst_122 = arith.constant dense<0.000000e+00> : vector<16xf32>
    %300 = vector.multi_reduction <add>, %299, %cst_122 [1] : vector<16x32xf32> to vector<16xf32>
    %301 = vector.shape_cast %300 : vector<16xf32> to vector<16x1xf32>
    %cst_123 = arith.constant 3.200000e+01 : f32
    %302 = vector.broadcast %cst_123 : f32 to vector<16x1xf32>
    %303 = arith.divf %301, %302 : vector<16x1xf32>
    %cst_124 = arith.constant 9.99999997E-7 : f32
    %304 = vector.broadcast %cst_124 : f32 to vector<16x1xf32>
    %305 = arith.addf %303, %304 : vector<16x1xf32>
    %306 = math.rsqrt %305 : vector<16x1xf32>
    %307 = vector.broadcast %306 : vector<16x1xf32> to vector<16x32xf32>
    %308 = arith.mulf %298, %307 : vector<16x32xf32>
    %c16 = arith.constant 16 : index
    %c0_125 = arith.constant 0 : index
    %309 = vector.load %arg18[%c16, %c0_125] : memref<32x32xf32, #tpu.memory_space<vmem>>, vector<16x32xf32>
    tpu.vector_store %arg18[%c16, %c0_125], %308 {strides = array<i32>} : memref<32x32xf32, #tpu.memory_space<vmem>>, vector<16x32xf32>,
    %310 = vector.extract_strided_slice %1 {offsets = [8, 0], sizes = [8, 1], strides = [1, 1]} : vector<16x1xi32> to vector<8x1xi32>
    %311 = vector.broadcast %310 : vector<8x1xi32> to vector<8x64xi32>
    %312 = arith.cmpi eq, %16, %311 : vector<8x64xi32>
    %313 = arith.extui %312 : vector<8x64xi1> to vector<8x64xi32>
    %314 = arith.sitofp %313 : vector<8x64xi32> to vector<8x64xf32>
    %cst_126 = arith.constant dense<0.000000e+00> : vector<8x32xf32>
    %315 = tpu.matmul %314, %3, %cst_126 {dimension_numbers = #tpu.dot_dimension_numbers<[1], [0], [0], [1], [0, 0, 1, 1], [], []>} : vector<8x64xf32>, vector<64x32xf32>, vector<8x32xf32> -> vector<8x32xf32>
    %316 = arith.mulf %315, %315 : vector<8x32xf32>
    %cst_127 = arith.constant dense<0.000000e+00> : vector<8xf32>
    %317 = vector.multi_reduction <add>, %316, %cst_127 [1] : vector<8x32xf32> to vector<8xf32>
    %318 = vector.shape_cast %317 : vector<8xf32> to vector<8x1xf32>
    %cst_128 = arith.constant 3.200000e+01 : f32
    %319 = vector.broadcast %cst_128 : f32 to vector<8x1xf32>
    %320 = arith.divf %318, %319 : vector<8x1xf32>
    %cst_129 = arith.constant 9.99999997E-7 : f32
    %321 = vector.broadcast %cst_129 : f32 to vector<8x1xf32>
    %322 = arith.addf %320, %321 : vector<8x1xf32>
    %323 = math.rsqrt %322 : vector<8x1xf32>
    %324 = vector.broadcast %323 : vector<8x1xf32> to vector<8x32xf32>
    %325 = arith.mulf %315, %324 : vector<8x32xf32>
    %cst_130 = arith.constant dense<0.000000e+00> : vector<8x96xf32>
    %326 = tpu.matmul %325, %8, %cst_130 {dimension_numbers = #tpu.dot_dimension_numbers<[1], [0], [0], [1], [0, 0, 1, 1], [], []>} : vector<8x32xf32>, vector<32x96xf32>, vector<8x96xf32> -> vector<8x96xf32>
    %327 = vector.extract_strided_slice %326 {offsets = [0, 0], sizes = [8, 32], strides = [1, 1]} : vector<8x96xf32> to vector<8x32xf32>
    %328 = vector.extract_strided_slice %326 {offsets = [0, 32], sizes = [8, 32], strides = [1, 1]} : vector<8x96xf32> to vector<8x32xf32>
    %329 = vector.extract_strided_slice %326 {offsets = [0, 64], sizes = [8, 32], strides = [1, 1]} : vector<8x96xf32> to vector<8x32xf32>
    %cst_131 = arith.constant dense<0.000000e+00> : vector<8x8xf32>
    %330 = tpu.matmul %327, %328, %cst_131 {dimension_numbers = #tpu.dot_dimension_numbers<[1], [1], [0], [0], [0, 0, 1, 0], [], []>} : vector<8x32xf32>, vector<8x32xf32>, vector<8x8xf32> -> vector<8x8xf32>
    %cst_132 = arith.constant 0.176776692 : f32
    %331 = vector.broadcast %cst_132 : f32 to vector<8x8xf32>
    %332 = arith.mulf %330, %331 : vector<8x8xf32>
    %cst_133 = arith.constant -1.000000e+09 : f32
    %333 = vector.broadcast %cst_133 : f32 to vector<8x8xf32>
    %334 = arith.select %20, %332, %333 : vector<8x8xi1>, vector<8x8xf32>
    %cst_134 = arith.constant dense<0xFF800000> : vector<8xf32>
    %335 = vector.multi_reduction <maximumf>, %334, %cst_134 [1] : vector<8x8xf32> to vector<8xf32>
    %336 = vector.shape_cast %335 : vector<8xf32> to vector<8x1xf32>
    %337 = vector.broadcast %336 : vector<8x1xf32> to vector<8x8xf32>
    %338 = arith.subf %334, %337 : vector<8x8xf32>
    %339 = math.exp %338 : vector<8x8xf32>
    %cst_135 = arith.constant dense<0.000000e+00> : vector<8xf32>
    %340 = vector.multi_reduction <add>, %339, %cst_135 [1] : vector<8x8xf32> to vector<8xf32>
    %341 = vector.shape_cast %340 : vector<8xf32> to vector<8x1xf32>
    %342 = tpu.reciprocal %341 {approx = true} : vector<8x1xf32> -> vector<8x1xf32>
    %343 = vector.broadcast %342 : vector<8x1xf32> to vector<8x8xf32>
    %344 = arith.mulf %339, %343 : vector<8x8xf32>
    %cst_136 = arith.constant dense<0.000000e+00> : vector<8x32xf32>
    %345 = tpu.matmul %344, %329, %cst_136 {dimension_numbers = #tpu.dot_dimension_numbers<[1], [0], [0], [1], [0, 0, 1, 1], [], []>} : vector<8x8xf32>, vector<8x32xf32>, vector<8x32xf32> -> vector<8x32xf32>
    %cst_137 = arith.constant dense<0.000000e+00> : vector<8x32xf32>
    %346 = tpu.matmul %345, %9, %cst_137 {dimension_numbers = #tpu.dot_dimension_numbers<[1], [0], [0], [1], [0, 0, 1, 1], [], []>} : vector<8x32xf32>, vector<32x32xf32>, vector<8x32xf32> -> vector<8x32xf32>
    %347 = arith.addf %315, %346 : vector<8x32xf32>
    %348 = arith.mulf %347, %347 : vector<8x32xf32>
    %cst_138 = arith.constant dense<0.000000e+00> : vector<8xf32>
    %349 = vector.multi_reduction <add>, %348, %cst_138 [1] : vector<8x32xf32> to vector<8xf32>
    %350 = vector.shape_cast %349 : vector<8xf32> to vector<8x1xf32>
    %cst_139 = arith.constant 3.200000e+01 : f32
    %351 = vector.broadcast %cst_139 : f32 to vector<8x1xf32>
    %352 = arith.divf %350, %351 : vector<8x1xf32>
    %cst_140 = arith.constant 9.99999997E-7 : f32
    %353 = vector.broadcast %cst_140 : f32 to vector<8x1xf32>
    %354 = arith.addf %352, %353 : vector<8x1xf32>
    %355 = math.rsqrt %354 : vector<8x1xf32>
    %356 = vector.broadcast %355 : vector<8x1xf32> to vector<8x32xf32>
    %357 = arith.mulf %347, %356 : vector<8x32xf32>
    %cst_141 = arith.constant dense<0.000000e+00> : vector<8x32xf32>
    %358 = tpu.matmul %357, %10, %cst_141 {dimension_numbers = #tpu.dot_dimension_numbers<[1], [0], [0], [1], [0, 0, 1, 1], [], []>} : vector<8x32xf32>, vector<32x32xf32>, vector<8x32xf32> -> vector<8x32xf32>
    %cst_142 = arith.constant dense<0.000000e+00> : vector<16x64xf32>
    %359 = tpu.matmul %308, %11, %cst_142 {dimension_numbers = #tpu.dot_dimension_numbers<[1], [0], [0], [1], [0, 0, 1, 1], [], []>} : vector<16x32xf32>, vector<32x64xf32>, vector<16x64xf32> -> vector<16x64xf32>
    %360 = vector.extract_strided_slice %359 {offsets = [0, 0], sizes = [16, 32], strides = [1, 1]} : vector<16x64xf32> to vector<16x32xf32>
    %361 = vector.extract_strided_slice %359 {offsets = [0, 32], sizes = [16, 32], strides = [1, 1]} : vector<16x64xf32> to vector<16x32xf32>
    %cst_143 = arith.constant dense<0.000000e+00> : vector<8x16xf32>
    %362 = tpu.matmul %358, %360, %cst_143 {dimension_numbers = #tpu.dot_dimension_numbers<[1], [1], [0], [0], [0, 0, 1, 0], [], []>} : vector<8x32xf32>, vector<16x32xf32>, vector<8x16xf32> -> vector<8x16xf32>
    %cst_144 = arith.constant 0.176776692 : f32
    %363 = vector.broadcast %cst_144 : f32 to vector<8x16xf32>
    %364 = arith.mulf %362, %363 : vector<8x16xf32>
    %cst_145 = arith.constant -1.000000e+09 : f32
    %365 = vector.shape_cast %243 : vector<1x16xi1> to vector<1x16xi1>
    %366 = vector.broadcast %365 : vector<1x16xi1> to vector<8x16xi1>
    %367 = vector.broadcast %cst_145 : f32 to vector<8x16xf32>
    %368 = arith.select %366, %364, %367 : vector<8x16xi1>, vector<8x16xf32>
    %cst_146 = arith.constant dense<0xFF800000> : vector<8xf32>
    %369 = vector.multi_reduction <maximumf>, %368, %cst_146 [1] : vector<8x16xf32> to vector<8xf32>
    %370 = vector.shape_cast %369 : vector<8xf32> to vector<8x1xf32>
    %371 = vector.broadcast %370 : vector<8x1xf32> to vector<8x16xf32>
    %372 = arith.subf %368, %371 : vector<8x16xf32>
    %373 = math.exp %372 : vector<8x16xf32>
    %cst_147 = arith.constant dense<0.000000e+00> : vector<8xf32>
    %374 = vector.multi_reduction <add>, %373, %cst_147 [1] : vector<8x16xf32> to vector<8xf32>
    %375 = vector.shape_cast %374 : vector<8xf32> to vector<8x1xf32>
    %376 = tpu.reciprocal %375 {approx = true} : vector<8x1xf32> -> vector<8x1xf32>
    %377 = vector.broadcast %376 : vector<8x1xf32> to vector<8x16xf32>
    %378 = arith.mulf %373, %377 : vector<8x16xf32>
    %cst_148 = arith.constant dense<0.000000e+00> : vector<8x32xf32>
    %379 = tpu.matmul %378, %361, %cst_148 {dimension_numbers = #tpu.dot_dimension_numbers<[1], [0], [0], [1], [0, 0, 1, 1], [], []>} : vector<8x16xf32>, vector<16x32xf32>, vector<8x32xf32> -> vector<8x32xf32>
    %cst_149 = arith.constant dense<0.000000e+00> : vector<8x32xf32>
    %380 = tpu.matmul %379, %12, %cst_149 {dimension_numbers = #tpu.dot_dimension_numbers<[1], [0], [0], [1], [0, 0, 1, 1], [], []>} : vector<8x32xf32>, vector<32x32xf32>, vector<8x32xf32> -> vector<8x32xf32>
    %381 = arith.addf %347, %380 : vector<8x32xf32>
    %382 = arith.mulf %381, %381 : vector<8x32xf32>
    %cst_150 = arith.constant dense<0.000000e+00> : vector<8xf32>
    %383 = vector.multi_reduction <add>, %382, %cst_150 [1] : vector<8x32xf32> to vector<8xf32>
    %384 = vector.shape_cast %383 : vector<8xf32> to vector<8x1xf32>
    %cst_151 = arith.constant 3.200000e+01 : f32
    %385 = vector.broadcast %cst_151 : f32 to vector<8x1xf32>
    %386 = arith.divf %384, %385 : vector<8x1xf32>
    %cst_152 = arith.constant 9.99999997E-7 : f32
    %387 = vector.broadcast %cst_152 : f32 to vector<8x1xf32>
    %388 = arith.addf %386, %387 : vector<8x1xf32>
    %389 = math.rsqrt %388 : vector<8x1xf32>
    %390 = vector.broadcast %389 : vector<8x1xf32> to vector<8x32xf32>
    %391 = arith.mulf %381, %390 : vector<8x32xf32>
    %cst_153 = arith.constant dense<0.000000e+00> : vector<8x64xf32>
    %392 = tpu.matmul %391, %13, %cst_153 {dimension_numbers = #tpu.dot_dimension_numbers<[1], [0], [0], [1], [0, 0, 1, 1], [], []>} : vector<8x32xf32>, vector<32x64xf32>, vector<8x64xf32> -> vector<8x64xf32>
    %cst_154 = arith.constant 0.000000e+00 : f32
    %393 = vector.broadcast %cst_154 : f32 to vector<8x64xf32>
    %394 = arith.maximumf %392, %393 : vector<8x64xf32>
    %cst_155 = arith.constant dense<0.000000e+00> : vector<8x32xf32>
    %395 = tpu.matmul %394, %14, %cst_155 {dimension_numbers = #tpu.dot_dimension_numbers<[1], [0], [0], [1], [0, 0, 1, 1], [], []>} : vector<8x64xf32>, vector<64x32xf32>, vector<8x32xf32> -> vector<8x32xf32>
    %396 = arith.addf %381, %395 : vector<8x32xf32>
    %397 = arith.mulf %396, %396 : vector<8x32xf32>
    %cst_156 = arith.constant dense<0.000000e+00> : vector<8xf32>
    %398 = vector.multi_reduction <add>, %397, %cst_156 [1] : vector<8x32xf32> to vector<8xf32>
    %399 = vector.shape_cast %398 : vector<8xf32> to vector<8x1xf32>
    %cst_157 = arith.constant 3.200000e+01 : f32
    %400 = vector.broadcast %cst_157 : f32 to vector<8x1xf32>
    %401 = arith.divf %399, %400 : vector<8x1xf32>
    %cst_158 = arith.constant 9.99999997E-7 : f32
    %402 = vector.broadcast %cst_158 : f32 to vector<8x1xf32>
    %403 = arith.addf %401, %402 : vector<8x1xf32>
    %404 = math.rsqrt %403 : vector<8x1xf32>
    %405 = vector.broadcast %404 : vector<8x1xf32> to vector<8x32xf32>
    %406 = arith.mulf %396, %405 : vector<8x32xf32>
    %cst_159 = arith.constant dense<0.000000e+00> : vector<8x64xf32>
    %407 = tpu.matmul %406, %3, %cst_159 {dimension_numbers = #tpu.dot_dimension_numbers<[1], [1], [0], [0], [0, 0, 1, 0], [], []>} : vector<8x32xf32>, vector<64x32xf32>, vector<8x64xf32> -> vector<8x64xf32>
    %408 = vector.extract_strided_slice %2 {offsets = [8, 0], sizes = [8, 1], strides = [1, 1]} : vector<16x1xi32> to vector<8x1xi32>
    %c0_i32_160 = arith.constant 0 : i32
    %409 = vector.broadcast %c0_i32_160 : i32 to vector<8x1xi32>
    %410 = arith.cmpi eq, %408, %409 : vector<8x1xi32>
    %c-100_i32_161 = arith.constant -100 : i32
    %411 = vector.broadcast %c-100_i32_161 : i32 to vector<8x1xi32>
    %412 = arith.select %410, %411, %408 : vector<8x1xi1>, vector<8x1xi32>
    %c-100_i32_162 = arith.constant -100 : i32
    %413 = vector.broadcast %c-100_i32_162 : i32 to vector<8x1xi32>
    %414 = arith.cmpi ne, %412, %413 : vector<8x1xi32>
    %c0_i32_163 = arith.constant 0 : i32
    %415 = vector.broadcast %c0_i32_163 : i32 to vector<8x1xi32>
    %416 = arith.select %414, %412, %415 : vector<8x1xi1>, vector<8x1xi32>
    %417 = vector.broadcast %416 : vector<8x1xi32> to vector<8x64xi32>
    %418 = arith.cmpi eq, %16, %417 : vector<8x64xi32>
    %419 = arith.extui %418 : vector<8x64xi1> to vector<8x64xi32>
    %420 = arith.sitofp %419 : vector<8x64xi32> to vector<8x64xf32>
    %cst_164 = arith.constant dense<0xFF800000> : vector<8xf32>
    %421 = vector.multi_reduction <maximumf>, %407, %cst_164 [1] : vector<8x64xf32> to vector<8xf32>
    %422 = vector.shape_cast %421 : vector<8xf32> to vector<8x1xf32>
    %423 = vector.broadcast %422 : vector<8x1xf32> to vector<8x64xf32>
    %424 = arith.subf %407, %423 : vector<8x64xf32>
    %425 = math.exp %424 : vector<8x64xf32>
    %cst_165 = arith.constant dense<0.000000e+00> : vector<8xf32>
    %426 = vector.multi_reduction <add>, %425, %cst_165 [1] : vector<8x64xf32> to vector<8xf32>
    %427 = vector.shape_cast %426 : vector<8xf32> to vector<8x1xf32>
    %428 = math.log %427 : vector<8x1xf32>
    %429 = arith.addf %428, %422 : vector<8x1xf32>
    %430 = arith.mulf %407, %420 : vector<8x64xf32>
    %cst_166 = arith.constant dense<0.000000e+00> : vector<8xf32>
    %431 = vector.multi_reduction <add>, %430, %cst_166 [1] : vector<8x64xf32> to vector<8xf32>
    %432 = vector.shape_cast %431 : vector<8xf32> to vector<8x1xf32>
    %433 = arith.extui %414 : vector<8x1xi1> to vector<8x1xi32>
    %434 = arith.sitofp %433 : vector<8x1xi32> to vector<8x1xf32>
    %435 = arith.subf %429, %432 : vector<8x1xf32>
    %436 = arith.mulf %435, %434 : vector<8x1xf32>
    %437 = vector.shape_cast %436 : vector<8x1xf32> to vector<1x8x1xf32>
    %cst_167 = arith.constant dense<0.000000e+00> : vector<1xf32>
    %438 = vector.multi_reduction <add>, %437, %cst_167 [1, 2] : vector<1x8x1xf32> to vector<1xf32>
    %439 = vector.shape_cast %438 : vector<1xf32> to vector<1x1x1xf32>
    %440 = vector.extract %439[0, 0, 0] : f32 from vector<1x1x1xf32>
    %441 = vector.shape_cast %434 : vector<8x1xf32> to vector<1x8x1xf32>
    %cst_168 = arith.constant dense<0.000000e+00> : vector<1xf32>
    %442 = vector.multi_reduction <add>, %441, %cst_168 [1, 2] : vector<1x8x1xf32> to vector<1xf32>
    %443 = vector.shape_cast %442 : vector<1xf32> to vector<1x1x1xf32>
    %444 = vector.extract %443[0, 0, 0] : f32 from vector<1x1x1xf32>
    %445 = arith.addf %225, %440 : f32
    %446 = arith.addf %226, %444 : f32
    %447 = vector.broadcast %422 : vector<8x1xf32> to vector<8x64xf32>
    %448 = arith.subf %407, %447 : vector<8x64xf32>
    %cst_169 = arith.constant 1.000000e+02 : f32
    %449 = vector.broadcast %cst_169 : f32 to vector<8x64xf32>
    %450 = arith.mulf %448, %449 : vector<8x64xf32>
    %451 = math.exp %450 : vector<8x64xf32>
    %cst_170 = arith.constant dense<0.000000e+00> : vector<8xf32>
    %452 = vector.multi_reduction <add>, %451, %cst_170 [1] : vector<8x64xf32> to vector<8xf32>
    %453 = vector.shape_cast %452 : vector<8xf32> to vector<8x1xf32>
    %454 = vector.broadcast %453 : vector<8x1xf32> to vector<8x64xf32>
    %455 = arith.divf %451, %454 : vector<8x64xf32>
    %456 = arith.mulf %455, %17 : vector<8x64xf32>
    %cst_171 = arith.constant dense<0.000000e+00> : vector<8xf32>
    %457 = vector.multi_reduction <add>, %456, %cst_171 [1] : vector<8x64xf32> to vector<8xf32>
    %458 = vector.shape_cast %457 : vector<8xf32> to vector<8x1xf32>
    %459 = math.roundeven %458 : vector<8x1xf32>
    %c8 = arith.constant 8 : index
    %c0_172 = arith.constant 0 : index
    %460 = vector.load %arg17[%c8, %c0_172] : memref<16x1xf32, #tpu.memory_space<vmem>>, vector<8x1xf32>
    tpu.vector_store %arg17[%c8, %c0_172], %459 {strides = array<i32>} : memref<16x1xf32, #tpu.memory_space<vmem>>, vector<8x1xf32>,
    %cst_173 = arith.constant 1.000000e+00 : f32
    %461 = arith.maximumf %446, %cst_173 : f32
    %462 = arith.divf %445, %461 : f32
    %cst_174 = arith.constant 1.000000e+00 : f32
    %463 = vector.broadcast %cst_174 : f32 to vector<1x1xf32>
    %464 = vector.broadcast %462 : f32 to vector<1x1xf32>
    %465 = arith.mulf %464, %463 : vector<1x1xf32>
    %c0_175 = arith.constant 0 : index
    %c0_176 = arith.constant 0 : index
    %466 = vector.load %arg16[%c0_175, %c0_176] : memref<1x1xf32, #tpu.memory_space<vmem>>, vector<1x1xf32>
    tpu.vector_store %arg16[%c0_175, %c0_176], %465 {strides = array<i32>} : memref<1x1xf32, #tpu.memory_space<vmem>>, vector<1x1xf32>,
    return
  }
}

module attributes {stable_mosaic.version = 11 : i64} {
  func.func @kernel(%arg0: memref<32x1xf32, #tpu.memory_space<vmem>>, %arg1: memref<2x16xf32, #tpu.memory_space<vmem>>, %arg2: memref<16x1xi32, #tpu.memory_space<vmem>>, %arg3: memref<16x1xi32, #tpu.memory_space<vmem>>, %arg4: memref<32x32xf32, #tpu.memory_space<vmem>>, %arg5: memref<1x1xf32, #tpu.memory_space<vmem>>, %arg6: memref<64x32xf32, #tpu.memory_space<vmem>>, %arg7: memref<32x96xf32, #tpu.memory_space<vmem>>, %arg8: memref<32x32xf32, #tpu.memory_space<vmem>>, %arg9: memref<32x64xf32, #tpu.memory_space<vmem>>, %arg10: memref<64x32xf32, #tpu.memory_space<vmem>>, %arg11: memref<32x96xf32, #tpu.memory_space<vmem>>, %arg12: memref<32x32xf32, #tpu.memory_space<vmem>>, %arg13: memref<32x32xf32, #tpu.memory_space<vmem>>, %arg14: memref<32x64xf32, #tpu.memory_space<vmem>>, %arg15: memref<32x32xf32, #tpu.memory_space<vmem>>, %arg16: memref<32x64xf32, #tpu.memory_space<vmem>>, %arg17: memref<64x32xf32, #tpu.memory_space<vmem>>, %arg18: memref<1x1xf32, #tpu.memory_space<vmem>>, %arg19: memref<1x1xf32, #tpu.memory_space<vmem>>, %arg20: memref<16x1xi32, #tpu.memory_space<vmem>>) attributes {dimension_semantics = [], scalar_prefetch = 0 : i64, scratch_operands = 0 : i64, tpu.core_type = #tpu.core_type<tc>} {
    %c0 = arith.constant 0 : index
    %c0_0 = arith.constant 0 : index
    %0 = vector.load %arg0[%c0, %c0_0] : memref<32x1xf32, #tpu.memory_space<vmem>>, vector<32x1xf32>
    %1 = math.roundeven %0 : vector<32x1xf32>
    %c0_i32 = arith.constant 0 : i32
    %c63_i32 = arith.constant 63 : i32
    %2 = arith.sitofp %c0_i32 : i32 to f32
    %3 = vector.broadcast %2 : f32 to vector<32x1xf32>
    %4 = arith.maximumf %3, %1 : vector<32x1xf32>
    %5 = arith.sitofp %c63_i32 : i32 to f32
    %6 = vector.broadcast %5 : f32 to vector<32x1xf32>
    %7 = arith.minimumf %6, %4 : vector<32x1xf32>
    %8 = arith.fptosi %7 : vector<32x1xf32> to vector<32x1xi32>
    %c0_1 = arith.constant 0 : index
    %c0_2 = arith.constant 0 : index
    %9 = vector.load %arg2[%c0_1, %c0_2] : memref<16x1xi32, #tpu.memory_space<vmem>>, vector<16x1xi32>
    %c0_3 = arith.constant 0 : index
    %c0_4 = arith.constant 0 : index
    %10 = vector.load %arg3[%c0_3, %c0_4] : memref<16x1xi32, #tpu.memory_space<vmem>>, vector<16x1xi32>
    %c0_5 = arith.constant 0 : index
    %c0_6 = arith.constant 0 : index
    %11 = vector.load %arg6[%c0_5, %c0_6] : memref<64x32xf32, #tpu.memory_space<vmem>>, vector<64x32xf32>
    %c0_7 = arith.constant 0 : index
    %c0_8 = arith.constant 0 : index
    %12 = vector.load %arg7[%c0_7, %c0_8] : memref<32x96xf32, #tpu.memory_space<vmem>>, vector<32x96xf32>
    %c0_9 = arith.constant 0 : index
    %c0_10 = arith.constant 0 : index
    %13 = vector.load %arg8[%c0_9, %c0_10] : memref<32x32xf32, #tpu.memory_space<vmem>>, vector<32x32xf32>
    %c0_11 = arith.constant 0 : index
    %c0_12 = arith.constant 0 : index
    %14 = vector.load %arg9[%c0_11, %c0_12] : memref<32x64xf32, #tpu.memory_space<vmem>>, vector<32x64xf32>
    %c0_13 = arith.constant 0 : index
    %c0_14 = arith.constant 0 : index
    %15 = vector.load %arg10[%c0_13, %c0_14] : memref<64x32xf32, #tpu.memory_space<vmem>>, vector<64x32xf32>
    %c0_15 = arith.constant 0 : index
    %c0_16 = arith.constant 0 : index
    %16 = vector.load %arg11[%c0_15, %c0_16] : memref<32x96xf32, #tpu.memory_space<vmem>>, vector<32x96xf32>
    %c0_17 = arith.constant 0 : index
    %c0_18 = arith.constant 0 : index
    %17 = vector.load %arg12[%c0_17, %c0_18] : memref<32x32xf32, #tpu.memory_space<vmem>>, vector<32x32xf32>
    %c0_19 = arith.constant 0 : index
    %c0_20 = arith.constant 0 : index
    %18 = vector.load %arg13[%c0_19, %c0_20] : memref<32x32xf32, #tpu.memory_space<vmem>>, vector<32x32xf32>
    %c0_21 = arith.constant 0 : index
    %c0_22 = arith.constant 0 : index
    %19 = vector.load %arg14[%c0_21, %c0_22] : memref<32x64xf32, #tpu.memory_space<vmem>>, vector<32x64xf32>
    %c0_23 = arith.constant 0 : index
    %c0_24 = arith.constant 0 : index
    %20 = vector.load %arg15[%c0_23, %c0_24] : memref<32x32xf32, #tpu.memory_space<vmem>>, vector<32x32xf32>
    %c0_25 = arith.constant 0 : index
    %c0_26 = arith.constant 0 : index
    %21 = vector.load %arg16[%c0_25, %c0_26] : memref<32x64xf32, #tpu.memory_space<vmem>>, vector<32x64xf32>
    %c0_27 = arith.constant 0 : index
    %c0_28 = arith.constant 0 : index
    %22 = vector.load %arg17[%c0_27, %c0_28] : memref<64x32xf32, #tpu.memory_space<vmem>>, vector<64x32xf32>
    %23 = tpu.iota {dimensions = array<i32: 1>} : vector<16x64xi32>
    %24 = tpu.iota {dimensions = array<i32: 1>} : vector<8x64xi32>
    %25 = arith.sitofp %24 : vector<8x64xi32> to vector<8x64xf32>
    %26 = tpu.iota {dimensions = array<i32: 1>} : vector<8x8xi32>
    %27 = tpu.iota {dimensions = array<i32: 0>} : vector<8x8xi32>
    %28 = arith.cmpi sle, %26, %27 : vector<8x8xi32>
    %c0_29 = arith.constant 0 : index
    %c0_30 = arith.constant 0 : index
    %29 = vector.load %arg1[%c0_29, %c0_30] : memref<2x16xf32, #tpu.memory_space<vmem>>, vector<1x16xf32>
    %cst = arith.constant 0.000000e+00 : f32
    %30 = vector.broadcast %cst : f32 to vector<1x16xf32>
    %31 = arith.cmpf one, %29, %30 : vector<1x16xf32>
    %32 = vector.extract_strided_slice %8 {offsets = [0, 0], sizes = [16, 1], strides = [1, 1]} : vector<32x1xi32> to vector<16x1xi32>
    %33 = vector.broadcast %32 : vector<16x1xi32> to vector<16x64xi32>
    %34 = arith.cmpi eq, %23, %33 : vector<16x64xi32>
    %35 = arith.extui %34 : vector<16x64xi1> to vector<16x64xi32>
    %36 = arith.sitofp %35 : vector<16x64xi32> to vector<16x64xf32>
    %cst_31 = arith.constant dense<0.000000e+00> : vector<16x32xf32>
    %37 = tpu.matmul %36, %11, %cst_31 {dimension_numbers = #tpu.dot_dimension_numbers<[1], [0], [0], [1], [0, 0, 1, 1], [], []>} : vector<16x64xf32>, vector<64x32xf32>, vector<16x32xf32> -> vector<16x32xf32>
    %38 = arith.mulf %37, %37 : vector<16x32xf32>
    %cst_32 = arith.constant dense<0.000000e+00> : vector<16xf32>
    %39 = vector.multi_reduction <add>, %38, %cst_32 [1] : vector<16x32xf32> to vector<16xf32>
    %40 = vector.shape_cast %39 : vector<16xf32> to vector<16x1xf32>
    %cst_33 = arith.constant 3.200000e+01 : f32
    %41 = vector.broadcast %cst_33 : f32 to vector<16x1xf32>
    %42 = arith.divf %40, %41 : vector<16x1xf32>
    %cst_34 = arith.constant 9.99999997E-7 : f32
    %43 = vector.broadcast %cst_34 : f32 to vector<16x1xf32>
    %44 = arith.addf %42, %43 : vector<16x1xf32>
    %45 = math.rsqrt %44 : vector<16x1xf32>
    %46 = vector.broadcast %45 : vector<16x1xf32> to vector<16x32xf32>
    %47 = arith.mulf %37, %46 : vector<16x32xf32>
    %cst_35 = arith.constant dense<0.000000e+00> : vector<16x96xf32>
    %48 = tpu.matmul %47, %12, %cst_35 {dimension_numbers = #tpu.dot_dimension_numbers<[1], [0], [0], [1], [0, 0, 1, 1], [], []>} : vector<16x32xf32>, vector<32x96xf32>, vector<16x96xf32> -> vector<16x96xf32>
    %49 = vector.extract_strided_slice %48 {offsets = [0, 0], sizes = [16, 32], strides = [1, 1]} : vector<16x96xf32> to vector<16x32xf32>
    %50 = vector.extract_strided_slice %48 {offsets = [0, 32], sizes = [16, 32], strides = [1, 1]} : vector<16x96xf32> to vector<16x32xf32>
    %51 = vector.extract_strided_slice %48 {offsets = [0, 64], sizes = [16, 32], strides = [1, 1]} : vector<16x96xf32> to vector<16x32xf32>
    %cst_36 = arith.constant dense<0.000000e+00> : vector<16x16xf32>
    %52 = tpu.matmul %49, %50, %cst_36 {dimension_numbers = #tpu.dot_dimension_numbers<[1], [1], [0], [0], [0, 0, 1, 0], [], []>} : vector<16x32xf32>, vector<16x32xf32>, vector<16x16xf32> -> vector<16x16xf32>
    %cst_37 = arith.constant 0.176776692 : f32
    %53 = vector.broadcast %cst_37 : f32 to vector<16x16xf32>
    %54 = arith.mulf %52, %53 : vector<16x16xf32>
    %cst_38 = arith.constant -1.000000e+09 : f32
    %55 = vector.shape_cast %31 : vector<1x16xi1> to vector<1x16xi1>
    %56 = vector.broadcast %55 : vector<1x16xi1> to vector<16x16xi1>
    %57 = vector.broadcast %cst_38 : f32 to vector<16x16xf32>
    %58 = arith.select %56, %54, %57 : vector<16x16xi1>, vector<16x16xf32>
    %cst_39 = arith.constant dense<0xFF800000> : vector<16xf32>
    %59 = vector.multi_reduction <maximumf>, %58, %cst_39 [1] : vector<16x16xf32> to vector<16xf32>
    %60 = vector.shape_cast %59 : vector<16xf32> to vector<16x1xf32>
    %61 = vector.broadcast %60 : vector<16x1xf32> to vector<16x16xf32>
    %62 = arith.subf %58, %61 : vector<16x16xf32>
    %63 = math.exp %62 : vector<16x16xf32>
    %cst_40 = arith.constant dense<0.000000e+00> : vector<16xf32>
    %64 = vector.multi_reduction <add>, %63, %cst_40 [1] : vector<16x16xf32> to vector<16xf32>
    %65 = vector.shape_cast %64 : vector<16xf32> to vector<16x1xf32>
    %66 = tpu.reciprocal %65 {approx = true} : vector<16x1xf32> -> vector<16x1xf32>
    %67 = vector.broadcast %66 : vector<16x1xf32> to vector<16x16xf32>
    %68 = arith.mulf %63, %67 : vector<16x16xf32>
    %cst_41 = arith.constant dense<0.000000e+00> : vector<16x32xf32>
    %69 = tpu.matmul %68, %51, %cst_41 {dimension_numbers = #tpu.dot_dimension_numbers<[1], [0], [0], [1], [0, 0, 1, 1], [], []>} : vector<16x16xf32>, vector<16x32xf32>, vector<16x32xf32> -> vector<16x32xf32>
    %cst_42 = arith.constant dense<0.000000e+00> : vector<16x32xf32>
    %70 = tpu.matmul %69, %13, %cst_42 {dimension_numbers = #tpu.dot_dimension_numbers<[1], [0], [0], [1], [0, 0, 1, 1], [], []>} : vector<16x32xf32>, vector<32x32xf32>, vector<16x32xf32> -> vector<16x32xf32>
    %71 = arith.addf %37, %70 : vector<16x32xf32>
    %72 = arith.mulf %71, %71 : vector<16x32xf32>
    %cst_43 = arith.constant dense<0.000000e+00> : vector<16xf32>
    %73 = vector.multi_reduction <add>, %72, %cst_43 [1] : vector<16x32xf32> to vector<16xf32>
    %74 = vector.shape_cast %73 : vector<16xf32> to vector<16x1xf32>
    %cst_44 = arith.constant 3.200000e+01 : f32
    %75 = vector.broadcast %cst_44 : f32 to vector<16x1xf32>
    %76 = arith.divf %74, %75 : vector<16x1xf32>
    %cst_45 = arith.constant 9.99999997E-7 : f32
    %77 = vector.broadcast %cst_45 : f32 to vector<16x1xf32>
    %78 = arith.addf %76, %77 : vector<16x1xf32>
    %79 = math.rsqrt %78 : vector<16x1xf32>
    %80 = vector.broadcast %79 : vector<16x1xf32> to vector<16x32xf32>
    %81 = arith.mulf %71, %80 : vector<16x32xf32>
    %cst_46 = arith.constant dense<0.000000e+00> : vector<16x64xf32>
    %82 = tpu.matmul %81, %14, %cst_46 {dimension_numbers = #tpu.dot_dimension_numbers<[1], [0], [0], [1], [0, 0, 1, 1], [], []>} : vector<16x32xf32>, vector<32x64xf32>, vector<16x64xf32> -> vector<16x64xf32>
    %cst_47 = arith.constant 0.000000e+00 : f32
    %83 = vector.broadcast %cst_47 : f32 to vector<16x64xf32>
    %84 = arith.maximumf %82, %83 : vector<16x64xf32>
    %cst_48 = arith.constant dense<0.000000e+00> : vector<16x32xf32>
    %85 = tpu.matmul %84, %15, %cst_48 {dimension_numbers = #tpu.dot_dimension_numbers<[1], [0], [0], [1], [0, 0, 1, 1], [], []>} : vector<16x64xf32>, vector<64x32xf32>, vector<16x32xf32> -> vector<16x32xf32>
    %86 = arith.addf %71, %85 : vector<16x32xf32>
    %87 = arith.mulf %86, %86 : vector<16x32xf32>
    %cst_49 = arith.constant dense<0.000000e+00> : vector<16xf32>
    %88 = vector.multi_reduction <add>, %87, %cst_49 [1] : vector<16x32xf32> to vector<16xf32>
    %89 = vector.shape_cast %88 : vector<16xf32> to vector<16x1xf32>
    %cst_50 = arith.constant 3.200000e+01 : f32
    %90 = vector.broadcast %cst_50 : f32 to vector<16x1xf32>
    %91 = arith.divf %89, %90 : vector<16x1xf32>
    %cst_51 = arith.constant 9.99999997E-7 : f32
    %92 = vector.broadcast %cst_51 : f32 to vector<16x1xf32>
    %93 = arith.addf %91, %92 : vector<16x1xf32>
    %94 = math.rsqrt %93 : vector<16x1xf32>
    %95 = vector.broadcast %94 : vector<16x1xf32> to vector<16x32xf32>
    %96 = arith.mulf %86, %95 : vector<16x32xf32>
    %c0_52 = arith.constant 0 : index
    %c0_53 = arith.constant 0 : index
    %97 = vector.load %arg4[%c0_52, %c0_53] : memref<32x32xf32, #tpu.memory_space<vmem>>, vector<16x32xf32>
    %98 = arith.subf %96, %97 : vector<16x32xf32>
    %99 = arith.mulf %98, %98 : vector<16x32xf32>
    %100 = vector.shape_cast %99 : vector<16x32xf32> to vector<1x16x32xf32>
    %cst_54 = arith.constant dense<0.000000e+00> : vector<1xf32>
    %101 = vector.multi_reduction <add>, %100, %cst_54 [1, 2] : vector<1x16x32xf32> to vector<1xf32>
    %102 = vector.shape_cast %101 : vector<1xf32> to vector<1x1x1xf32>
    %103 = vector.extract %102[0, 0, 0] : f32 from vector<1x1x1xf32>
    %cst_55 = arith.constant 0.000000e+00 : f32
    %104 = arith.addf %cst_55, %103 : f32
    %105 = vector.extract_strided_slice %9 {offsets = [0, 0], sizes = [8, 1], strides = [1, 1]} : vector<16x1xi32> to vector<8x1xi32>
    %106 = vector.broadcast %105 : vector<8x1xi32> to vector<8x64xi32>
    %107 = arith.cmpi eq, %24, %106 : vector<8x64xi32>
    %108 = arith.extui %107 : vector<8x64xi1> to vector<8x64xi32>
    %109 = arith.sitofp %108 : vector<8x64xi32> to vector<8x64xf32>
    %cst_56 = arith.constant dense<0.000000e+00> : vector<8x32xf32>
    %110 = tpu.matmul %109, %11, %cst_56 {dimension_numbers = #tpu.dot_dimension_numbers<[1], [0], [0], [1], [0, 0, 1, 1], [], []>} : vector<8x64xf32>, vector<64x32xf32>, vector<8x32xf32> -> vector<8x32xf32>
    %111 = arith.mulf %110, %110 : vector<8x32xf32>
    %cst_57 = arith.constant dense<0.000000e+00> : vector<8xf32>
    %112 = vector.multi_reduction <add>, %111, %cst_57 [1] : vector<8x32xf32> to vector<8xf32>
    %113 = vector.shape_cast %112 : vector<8xf32> to vector<8x1xf32>
    %cst_58 = arith.constant 3.200000e+01 : f32
    %114 = vector.broadcast %cst_58 : f32 to vector<8x1xf32>
    %115 = arith.divf %113, %114 : vector<8x1xf32>
    %cst_59 = arith.constant 9.99999997E-7 : f32
    %116 = vector.broadcast %cst_59 : f32 to vector<8x1xf32>
    %117 = arith.addf %115, %116 : vector<8x1xf32>
    %118 = math.rsqrt %117 : vector<8x1xf32>
    %119 = vector.broadcast %118 : vector<8x1xf32> to vector<8x32xf32>
    %120 = arith.mulf %110, %119 : vector<8x32xf32>
    %cst_60 = arith.constant dense<0.000000e+00> : vector<8x96xf32>
    %121 = tpu.matmul %120, %16, %cst_60 {dimension_numbers = #tpu.dot_dimension_numbers<[1], [0], [0], [1], [0, 0, 1, 1], [], []>} : vector<8x32xf32>, vector<32x96xf32>, vector<8x96xf32> -> vector<8x96xf32>
    %122 = vector.extract_strided_slice %121 {offsets = [0, 0], sizes = [8, 32], strides = [1, 1]} : vector<8x96xf32> to vector<8x32xf32>
    %123 = vector.extract_strided_slice %121 {offsets = [0, 32], sizes = [8, 32], strides = [1, 1]} : vector<8x96xf32> to vector<8x32xf32>
    %124 = vector.extract_strided_slice %121 {offsets = [0, 64], sizes = [8, 32], strides = [1, 1]} : vector<8x96xf32> to vector<8x32xf32>
    %cst_61 = arith.constant dense<0.000000e+00> : vector<8x8xf32>
    %125 = tpu.matmul %122, %123, %cst_61 {dimension_numbers = #tpu.dot_dimension_numbers<[1], [1], [0], [0], [0, 0, 1, 0], [], []>} : vector<8x32xf32>, vector<8x32xf32>, vector<8x8xf32> -> vector<8x8xf32>
    %cst_62 = arith.constant 0.176776692 : f32
    %126 = vector.broadcast %cst_62 : f32 to vector<8x8xf32>
    %127 = arith.mulf %125, %126 : vector<8x8xf32>
    %cst_63 = arith.constant -1.000000e+09 : f32
    %128 = vector.broadcast %cst_63 : f32 to vector<8x8xf32>
    %129 = arith.select %28, %127, %128 : vector<8x8xi1>, vector<8x8xf32>
    %cst_64 = arith.constant dense<0xFF800000> : vector<8xf32>
    %130 = vector.multi_reduction <maximumf>, %129, %cst_64 [1] : vector<8x8xf32> to vector<8xf32>
    %131 = vector.shape_cast %130 : vector<8xf32> to vector<8x1xf32>
    %132 = vector.broadcast %131 : vector<8x1xf32> to vector<8x8xf32>
    %133 = arith.subf %129, %132 : vector<8x8xf32>
    %134 = math.exp %133 : vector<8x8xf32>
    %cst_65 = arith.constant dense<0.000000e+00> : vector<8xf32>
    %135 = vector.multi_reduction <add>, %134, %cst_65 [1] : vector<8x8xf32> to vector<8xf32>
    %136 = vector.shape_cast %135 : vector<8xf32> to vector<8x1xf32>
    %137 = tpu.reciprocal %136 {approx = true} : vector<8x1xf32> -> vector<8x1xf32>
    %138 = vector.broadcast %137 : vector<8x1xf32> to vector<8x8xf32>
    %139 = arith.mulf %134, %138 : vector<8x8xf32>
    %cst_66 = arith.constant dense<0.000000e+00> : vector<8x32xf32>
    %140 = tpu.matmul %139, %124, %cst_66 {dimension_numbers = #tpu.dot_dimension_numbers<[1], [0], [0], [1], [0, 0, 1, 1], [], []>} : vector<8x8xf32>, vector<8x32xf32>, vector<8x32xf32> -> vector<8x32xf32>
    %cst_67 = arith.constant dense<0.000000e+00> : vector<8x32xf32>
    %141 = tpu.matmul %140, %17, %cst_67 {dimension_numbers = #tpu.dot_dimension_numbers<[1], [0], [0], [1], [0, 0, 1, 1], [], []>} : vector<8x32xf32>, vector<32x32xf32>, vector<8x32xf32> -> vector<8x32xf32>
    %142 = arith.addf %110, %141 : vector<8x32xf32>
    %143 = arith.mulf %142, %142 : vector<8x32xf32>
    %cst_68 = arith.constant dense<0.000000e+00> : vector<8xf32>
    %144 = vector.multi_reduction <add>, %143, %cst_68 [1] : vector<8x32xf32> to vector<8xf32>
    %145 = vector.shape_cast %144 : vector<8xf32> to vector<8x1xf32>
    %cst_69 = arith.constant 3.200000e+01 : f32
    %146 = vector.broadcast %cst_69 : f32 to vector<8x1xf32>
    %147 = arith.divf %145, %146 : vector<8x1xf32>
    %cst_70 = arith.constant 9.99999997E-7 : f32
    %148 = vector.broadcast %cst_70 : f32 to vector<8x1xf32>
    %149 = arith.addf %147, %148 : vector<8x1xf32>
    %150 = math.rsqrt %149 : vector<8x1xf32>
    %151 = vector.broadcast %150 : vector<8x1xf32> to vector<8x32xf32>
    %152 = arith.mulf %142, %151 : vector<8x32xf32>
    %cst_71 = arith.constant dense<0.000000e+00> : vector<8x32xf32>
    %153 = tpu.matmul %152, %18, %cst_71 {dimension_numbers = #tpu.dot_dimension_numbers<[1], [0], [0], [1], [0, 0, 1, 1], [], []>} : vector<8x32xf32>, vector<32x32xf32>, vector<8x32xf32> -> vector<8x32xf32>
    %cst_72 = arith.constant dense<0.000000e+00> : vector<16x64xf32>
    %154 = tpu.matmul %96, %19, %cst_72 {dimension_numbers = #tpu.dot_dimension_numbers<[1], [0], [0], [1], [0, 0, 1, 1], [], []>} : vector<16x32xf32>, vector<32x64xf32>, vector<16x64xf32> -> vector<16x64xf32>
    %155 = vector.extract_strided_slice %154 {offsets = [0, 0], sizes = [16, 32], strides = [1, 1]} : vector<16x64xf32> to vector<16x32xf32>
    %156 = vector.extract_strided_slice %154 {offsets = [0, 32], sizes = [16, 32], strides = [1, 1]} : vector<16x64xf32> to vector<16x32xf32>
    %cst_73 = arith.constant dense<0.000000e+00> : vector<8x16xf32>
    %157 = tpu.matmul %153, %155, %cst_73 {dimension_numbers = #tpu.dot_dimension_numbers<[1], [1], [0], [0], [0, 0, 1, 0], [], []>} : vector<8x32xf32>, vector<16x32xf32>, vector<8x16xf32> -> vector<8x16xf32>
    %cst_74 = arith.constant 0.176776692 : f32
    %158 = vector.broadcast %cst_74 : f32 to vector<8x16xf32>
    %159 = arith.mulf %157, %158 : vector<8x16xf32>
    %cst_75 = arith.constant -1.000000e+09 : f32
    %160 = vector.shape_cast %31 : vector<1x16xi1> to vector<1x16xi1>
    %161 = vector.broadcast %160 : vector<1x16xi1> to vector<8x16xi1>
    %162 = vector.broadcast %cst_75 : f32 to vector<8x16xf32>
    %163 = arith.select %161, %159, %162 : vector<8x16xi1>, vector<8x16xf32>
    %cst_76 = arith.constant dense<0xFF800000> : vector<8xf32>
    %164 = vector.multi_reduction <maximumf>, %163, %cst_76 [1] : vector<8x16xf32> to vector<8xf32>
    %165 = vector.shape_cast %164 : vector<8xf32> to vector<8x1xf32>
    %166 = vector.broadcast %165 : vector<8x1xf32> to vector<8x16xf32>
    %167 = arith.subf %163, %166 : vector<8x16xf32>
    %168 = math.exp %167 : vector<8x16xf32>
    %cst_77 = arith.constant dense<0.000000e+00> : vector<8xf32>
    %169 = vector.multi_reduction <add>, %168, %cst_77 [1] : vector<8x16xf32> to vector<8xf32>
    %170 = vector.shape_cast %169 : vector<8xf32> to vector<8x1xf32>
    %171 = tpu.reciprocal %170 {approx = true} : vector<8x1xf32> -> vector<8x1xf32>
    %172 = vector.broadcast %171 : vector<8x1xf32> to vector<8x16xf32>
    %173 = arith.mulf %168, %172 : vector<8x16xf32>
    %cst_78 = arith.constant dense<0.000000e+00> : vector<8x32xf32>
    %174 = tpu.matmul %173, %156, %cst_78 {dimension_numbers = #tpu.dot_dimension_numbers<[1], [0], [0], [1], [0, 0, 1, 1], [], []>} : vector<8x16xf32>, vector<16x32xf32>, vector<8x32xf32> -> vector<8x32xf32>
    %cst_79 = arith.constant dense<0.000000e+00> : vector<8x32xf32>
    %175 = tpu.matmul %174, %20, %cst_79 {dimension_numbers = #tpu.dot_dimension_numbers<[1], [0], [0], [1], [0, 0, 1, 1], [], []>} : vector<8x32xf32>, vector<32x32xf32>, vector<8x32xf32> -> vector<8x32xf32>
    %176 = arith.addf %142, %175 : vector<8x32xf32>
    %177 = arith.mulf %176, %176 : vector<8x32xf32>
    %cst_80 = arith.constant dense<0.000000e+00> : vector<8xf32>
    %178 = vector.multi_reduction <add>, %177, %cst_80 [1] : vector<8x32xf32> to vector<8xf32>
    %179 = vector.shape_cast %178 : vector<8xf32> to vector<8x1xf32>
    %cst_81 = arith.constant 3.200000e+01 : f32
    %180 = vector.broadcast %cst_81 : f32 to vector<8x1xf32>
    %181 = arith.divf %179, %180 : vector<8x1xf32>
    %cst_82 = arith.constant 9.99999997E-7 : f32
    %182 = vector.broadcast %cst_82 : f32 to vector<8x1xf32>
    %183 = arith.addf %181, %182 : vector<8x1xf32>
    %184 = math.rsqrt %183 : vector<8x1xf32>
    %185 = vector.broadcast %184 : vector<8x1xf32> to vector<8x32xf32>
    %186 = arith.mulf %176, %185 : vector<8x32xf32>
    %cst_83 = arith.constant dense<0.000000e+00> : vector<8x64xf32>
    %187 = tpu.matmul %186, %21, %cst_83 {dimension_numbers = #tpu.dot_dimension_numbers<[1], [0], [0], [1], [0, 0, 1, 1], [], []>} : vector<8x32xf32>, vector<32x64xf32>, vector<8x64xf32> -> vector<8x64xf32>
    %cst_84 = arith.constant 0.000000e+00 : f32
    %188 = vector.broadcast %cst_84 : f32 to vector<8x64xf32>
    %189 = arith.maximumf %187, %188 : vector<8x64xf32>
    %cst_85 = arith.constant dense<0.000000e+00> : vector<8x32xf32>
    %190 = tpu.matmul %189, %22, %cst_85 {dimension_numbers = #tpu.dot_dimension_numbers<[1], [0], [0], [1], [0, 0, 1, 1], [], []>} : vector<8x64xf32>, vector<64x32xf32>, vector<8x32xf32> -> vector<8x32xf32>
    %191 = arith.addf %176, %190 : vector<8x32xf32>
    %192 = arith.mulf %191, %191 : vector<8x32xf32>
    %cst_86 = arith.constant dense<0.000000e+00> : vector<8xf32>
    %193 = vector.multi_reduction <add>, %192, %cst_86 [1] : vector<8x32xf32> to vector<8xf32>
    %194 = vector.shape_cast %193 : vector<8xf32> to vector<8x1xf32>
    %cst_87 = arith.constant 3.200000e+01 : f32
    %195 = vector.broadcast %cst_87 : f32 to vector<8x1xf32>
    %196 = arith.divf %194, %195 : vector<8x1xf32>
    %cst_88 = arith.constant 9.99999997E-7 : f32
    %197 = vector.broadcast %cst_88 : f32 to vector<8x1xf32>
    %198 = arith.addf %196, %197 : vector<8x1xf32>
    %199 = math.rsqrt %198 : vector<8x1xf32>
    %200 = vector.broadcast %199 : vector<8x1xf32> to vector<8x32xf32>
    %201 = arith.mulf %191, %200 : vector<8x32xf32>
    %cst_89 = arith.constant dense<0.000000e+00> : vector<8x64xf32>
    %202 = tpu.matmul %201, %11, %cst_89 {dimension_numbers = #tpu.dot_dimension_numbers<[1], [1], [0], [0], [0, 0, 1, 0], [], []>} : vector<8x32xf32>, vector<64x32xf32>, vector<8x64xf32> -> vector<8x64xf32>
    %203 = vector.extract_strided_slice %10 {offsets = [0, 0], sizes = [8, 1], strides = [1, 1]} : vector<16x1xi32> to vector<8x1xi32>
    %c0_i32_90 = arith.constant 0 : i32
    %204 = vector.broadcast %c0_i32_90 : i32 to vector<8x1xi32>
    %205 = arith.cmpi eq, %203, %204 : vector<8x1xi32>
    %c-100_i32 = arith.constant -100 : i32
    %206 = vector.broadcast %c-100_i32 : i32 to vector<8x1xi32>
    %207 = arith.select %205, %206, %203 : vector<8x1xi1>, vector<8x1xi32>
    %c-100_i32_91 = arith.constant -100 : i32
    %208 = vector.broadcast %c-100_i32_91 : i32 to vector<8x1xi32>
    %209 = arith.cmpi ne, %207, %208 : vector<8x1xi32>
    %c0_i32_92 = arith.constant 0 : i32
    %210 = vector.broadcast %c0_i32_92 : i32 to vector<8x1xi32>
    %211 = arith.select %209, %207, %210 : vector<8x1xi1>, vector<8x1xi32>
    %212 = vector.broadcast %211 : vector<8x1xi32> to vector<8x64xi32>
    %213 = arith.cmpi eq, %24, %212 : vector<8x64xi32>
    %214 = arith.extui %213 : vector<8x64xi1> to vector<8x64xi32>
    %215 = arith.sitofp %214 : vector<8x64xi32> to vector<8x64xf32>
    %cst_93 = arith.constant dense<0xFF800000> : vector<8xf32>
    %216 = vector.multi_reduction <maximumf>, %202, %cst_93 [1] : vector<8x64xf32> to vector<8xf32>
    %217 = vector.shape_cast %216 : vector<8xf32> to vector<8x1xf32>
    %218 = vector.broadcast %217 : vector<8x1xf32> to vector<8x64xf32>
    %219 = arith.subf %202, %218 : vector<8x64xf32>
    %220 = math.exp %219 : vector<8x64xf32>
    %cst_94 = arith.constant dense<0.000000e+00> : vector<8xf32>
    %221 = vector.multi_reduction <add>, %220, %cst_94 [1] : vector<8x64xf32> to vector<8xf32>
    %222 = vector.shape_cast %221 : vector<8xf32> to vector<8x1xf32>
    %223 = math.log %222 : vector<8x1xf32>
    %224 = arith.addf %223, %217 : vector<8x1xf32>
    %225 = arith.mulf %202, %215 : vector<8x64xf32>
    %cst_95 = arith.constant dense<0.000000e+00> : vector<8xf32>
    %226 = vector.multi_reduction <add>, %225, %cst_95 [1] : vector<8x64xf32> to vector<8xf32>
    %227 = vector.shape_cast %226 : vector<8xf32> to vector<8x1xf32>
    %228 = arith.extui %209 : vector<8x1xi1> to vector<8x1xi32>
    %229 = arith.sitofp %228 : vector<8x1xi32> to vector<8x1xf32>
    %230 = arith.subf %224, %227 : vector<8x1xf32>
    %231 = arith.mulf %230, %229 : vector<8x1xf32>
    %232 = vector.shape_cast %231 : vector<8x1xf32> to vector<1x8x1xf32>
    %cst_96 = arith.constant dense<0.000000e+00> : vector<1xf32>
    %233 = vector.multi_reduction <add>, %232, %cst_96 [1, 2] : vector<1x8x1xf32> to vector<1xf32>
    %234 = vector.shape_cast %233 : vector<1xf32> to vector<1x1x1xf32>
    %235 = vector.extract %234[0, 0, 0] : f32 from vector<1x1x1xf32>
    %236 = vector.shape_cast %229 : vector<8x1xf32> to vector<1x8x1xf32>
    %cst_97 = arith.constant dense<0.000000e+00> : vector<1xf32>
    %237 = vector.multi_reduction <add>, %236, %cst_97 [1, 2] : vector<1x8x1xf32> to vector<1xf32>
    %238 = vector.shape_cast %237 : vector<1xf32> to vector<1x1x1xf32>
    %239 = vector.extract %238[0, 0, 0] : f32 from vector<1x1x1xf32>
    %cst_98 = arith.constant 0.000000e+00 : f32
    %240 = arith.addf %cst_98, %235 : f32
    %cst_99 = arith.constant 0.000000e+00 : f32
    %241 = arith.addf %cst_99, %239 : f32
    %242 = vector.broadcast %217 : vector<8x1xf32> to vector<8x64xf32>
    %243 = arith.cmpf oeq, %202, %242 : vector<8x64xf32>
    %cst_100 = arith.constant 6.400000e+01 : f32
    %244 = vector.broadcast %cst_100 : f32 to vector<8x64xf32>
    %245 = arith.select %243, %25, %244 : vector<8x64xi1>, vector<8x64xf32>
    %cst_101 = arith.constant dense<0x7F800000> : vector<8xf32>
    %246 = vector.multi_reduction <minimumf>, %245, %cst_101 [1] : vector<8x64xf32> to vector<8xf32>
    %247 = vector.shape_cast %246 : vector<8xf32> to vector<8x1xf32>
    %248 = arith.fptosi %247 : vector<8x1xf32> to vector<8x1xi32>
    %c0_102 = arith.constant 0 : index
    %c0_103 = arith.constant 0 : index
    %249 = vector.load %arg20[%c0_102, %c0_103] : memref<16x1xi32, #tpu.memory_space<vmem>>, vector<8x1xi32>
    tpu.vector_store %arg20[%c0_102, %c0_103], %248 {strides = array<i32>} : memref<16x1xi32, #tpu.memory_space<vmem>>, vector<8x1xi32>,
    %c1 = arith.constant 1 : index
    %c0_104 = arith.constant 0 : index
    %250 = vector.load %arg1[%c1, %c0_104] : memref<2x16xf32, #tpu.memory_space<vmem>>, vector<1x16xf32>
    %cst_105 = arith.constant 0.000000e+00 : f32
    %251 = vector.broadcast %cst_105 : f32 to vector<1x16xf32>
    %252 = arith.cmpf one, %250, %251 : vector<1x16xf32>
    %253 = vector.extract_strided_slice %8 {offsets = [16, 0], sizes = [16, 1], strides = [1, 1]} : vector<32x1xi32> to vector<16x1xi32>
    %254 = vector.broadcast %253 : vector<16x1xi32> to vector<16x64xi32>
    %255 = arith.cmpi eq, %23, %254 : vector<16x64xi32>
    %256 = arith.extui %255 : vector<16x64xi1> to vector<16x64xi32>
    %257 = arith.sitofp %256 : vector<16x64xi32> to vector<16x64xf32>
    %cst_106 = arith.constant dense<0.000000e+00> : vector<16x32xf32>
    %258 = tpu.matmul %257, %11, %cst_106 {dimension_numbers = #tpu.dot_dimension_numbers<[1], [0], [0], [1], [0, 0, 1, 1], [], []>} : vector<16x64xf32>, vector<64x32xf32>, vector<16x32xf32> -> vector<16x32xf32>
    %259 = arith.mulf %258, %258 : vector<16x32xf32>
    %cst_107 = arith.constant dense<0.000000e+00> : vector<16xf32>
    %260 = vector.multi_reduction <add>, %259, %cst_107 [1] : vector<16x32xf32> to vector<16xf32>
    %261 = vector.shape_cast %260 : vector<16xf32> to vector<16x1xf32>
    %cst_108 = arith.constant 3.200000e+01 : f32
    %262 = vector.broadcast %cst_108 : f32 to vector<16x1xf32>
    %263 = arith.divf %261, %262 : vector<16x1xf32>
    %cst_109 = arith.constant 9.99999997E-7 : f32
    %264 = vector.broadcast %cst_109 : f32 to vector<16x1xf32>
    %265 = arith.addf %263, %264 : vector<16x1xf32>
    %266 = math.rsqrt %265 : vector<16x1xf32>
    %267 = vector.broadcast %266 : vector<16x1xf32> to vector<16x32xf32>
    %268 = arith.mulf %258, %267 : vector<16x32xf32>
    %cst_110 = arith.constant dense<0.000000e+00> : vector<16x96xf32>
    %269 = tpu.matmul %268, %12, %cst_110 {dimension_numbers = #tpu.dot_dimension_numbers<[1], [0], [0], [1], [0, 0, 1, 1], [], []>} : vector<16x32xf32>, vector<32x96xf32>, vector<16x96xf32> -> vector<16x96xf32>
    %270 = vector.extract_strided_slice %269 {offsets = [0, 0], sizes = [16, 32], strides = [1, 1]} : vector<16x96xf32> to vector<16x32xf32>
    %271 = vector.extract_strided_slice %269 {offsets = [0, 32], sizes = [16, 32], strides = [1, 1]} : vector<16x96xf32> to vector<16x32xf32>
    %272 = vector.extract_strided_slice %269 {offsets = [0, 64], sizes = [16, 32], strides = [1, 1]} : vector<16x96xf32> to vector<16x32xf32>
    %cst_111 = arith.constant dense<0.000000e+00> : vector<16x16xf32>
    %273 = tpu.matmul %270, %271, %cst_111 {dimension_numbers = #tpu.dot_dimension_numbers<[1], [1], [0], [0], [0, 0, 1, 0], [], []>} : vector<16x32xf32>, vector<16x32xf32>, vector<16x16xf32> -> vector<16x16xf32>
    %cst_112 = arith.constant 0.176776692 : f32
    %274 = vector.broadcast %cst_112 : f32 to vector<16x16xf32>
    %275 = arith.mulf %273, %274 : vector<16x16xf32>
    %cst_113 = arith.constant -1.000000e+09 : f32
    %276 = vector.shape_cast %252 : vector<1x16xi1> to vector<1x16xi1>
    %277 = vector.broadcast %276 : vector<1x16xi1> to vector<16x16xi1>
    %278 = vector.broadcast %cst_113 : f32 to vector<16x16xf32>
    %279 = arith.select %277, %275, %278 : vector<16x16xi1>, vector<16x16xf32>
    %cst_114 = arith.constant dense<0xFF800000> : vector<16xf32>
    %280 = vector.multi_reduction <maximumf>, %279, %cst_114 [1] : vector<16x16xf32> to vector<16xf32>
    %281 = vector.shape_cast %280 : vector<16xf32> to vector<16x1xf32>
    %282 = vector.broadcast %281 : vector<16x1xf32> to vector<16x16xf32>
    %283 = arith.subf %279, %282 : vector<16x16xf32>
    %284 = math.exp %283 : vector<16x16xf32>
    %cst_115 = arith.constant dense<0.000000e+00> : vector<16xf32>
    %285 = vector.multi_reduction <add>, %284, %cst_115 [1] : vector<16x16xf32> to vector<16xf32>
    %286 = vector.shape_cast %285 : vector<16xf32> to vector<16x1xf32>
    %287 = tpu.reciprocal %286 {approx = true} : vector<16x1xf32> -> vector<16x1xf32>
    %288 = vector.broadcast %287 : vector<16x1xf32> to vector<16x16xf32>
    %289 = arith.mulf %284, %288 : vector<16x16xf32>
    %cst_116 = arith.constant dense<0.000000e+00> : vector<16x32xf32>
    %290 = tpu.matmul %289, %272, %cst_116 {dimension_numbers = #tpu.dot_dimension_numbers<[1], [0], [0], [1], [0, 0, 1, 1], [], []>} : vector<16x16xf32>, vector<16x32xf32>, vector<16x32xf32> -> vector<16x32xf32>
    %cst_117 = arith.constant dense<0.000000e+00> : vector<16x32xf32>
    %291 = tpu.matmul %290, %13, %cst_117 {dimension_numbers = #tpu.dot_dimension_numbers<[1], [0], [0], [1], [0, 0, 1, 1], [], []>} : vector<16x32xf32>, vector<32x32xf32>, vector<16x32xf32> -> vector<16x32xf32>
    %292 = arith.addf %258, %291 : vector<16x32xf32>
    %293 = arith.mulf %292, %292 : vector<16x32xf32>
    %cst_118 = arith.constant dense<0.000000e+00> : vector<16xf32>
    %294 = vector.multi_reduction <add>, %293, %cst_118 [1] : vector<16x32xf32> to vector<16xf32>
    %295 = vector.shape_cast %294 : vector<16xf32> to vector<16x1xf32>
    %cst_119 = arith.constant 3.200000e+01 : f32
    %296 = vector.broadcast %cst_119 : f32 to vector<16x1xf32>
    %297 = arith.divf %295, %296 : vector<16x1xf32>
    %cst_120 = arith.constant 9.99999997E-7 : f32
    %298 = vector.broadcast %cst_120 : f32 to vector<16x1xf32>
    %299 = arith.addf %297, %298 : vector<16x1xf32>
    %300 = math.rsqrt %299 : vector<16x1xf32>
    %301 = vector.broadcast %300 : vector<16x1xf32> to vector<16x32xf32>
    %302 = arith.mulf %292, %301 : vector<16x32xf32>
    %cst_121 = arith.constant dense<0.000000e+00> : vector<16x64xf32>
    %303 = tpu.matmul %302, %14, %cst_121 {dimension_numbers = #tpu.dot_dimension_numbers<[1], [0], [0], [1], [0, 0, 1, 1], [], []>} : vector<16x32xf32>, vector<32x64xf32>, vector<16x64xf32> -> vector<16x64xf32>
    %cst_122 = arith.constant 0.000000e+00 : f32
    %304 = vector.broadcast %cst_122 : f32 to vector<16x64xf32>
    %305 = arith.maximumf %303, %304 : vector<16x64xf32>
    %cst_123 = arith.constant dense<0.000000e+00> : vector<16x32xf32>
    %306 = tpu.matmul %305, %15, %cst_123 {dimension_numbers = #tpu.dot_dimension_numbers<[1], [0], [0], [1], [0, 0, 1, 1], [], []>} : vector<16x64xf32>, vector<64x32xf32>, vector<16x32xf32> -> vector<16x32xf32>
    %307 = arith.addf %292, %306 : vector<16x32xf32>
    %308 = arith.mulf %307, %307 : vector<16x32xf32>
    %cst_124 = arith.constant dense<0.000000e+00> : vector<16xf32>
    %309 = vector.multi_reduction <add>, %308, %cst_124 [1] : vector<16x32xf32> to vector<16xf32>
    %310 = vector.shape_cast %309 : vector<16xf32> to vector<16x1xf32>
    %cst_125 = arith.constant 3.200000e+01 : f32
    %311 = vector.broadcast %cst_125 : f32 to vector<16x1xf32>
    %312 = arith.divf %310, %311 : vector<16x1xf32>
    %cst_126 = arith.constant 9.99999997E-7 : f32
    %313 = vector.broadcast %cst_126 : f32 to vector<16x1xf32>
    %314 = arith.addf %312, %313 : vector<16x1xf32>
    %315 = math.rsqrt %314 : vector<16x1xf32>
    %316 = vector.broadcast %315 : vector<16x1xf32> to vector<16x32xf32>
    %317 = arith.mulf %307, %316 : vector<16x32xf32>
    %c16 = arith.constant 16 : index
    %c0_127 = arith.constant 0 : index
    %318 = vector.load %arg4[%c16, %c0_127] : memref<32x32xf32, #tpu.memory_space<vmem>>, vector<16x32xf32>
    %319 = arith.subf %317, %318 : vector<16x32xf32>
    %320 = arith.mulf %319, %319 : vector<16x32xf32>
    %321 = vector.shape_cast %320 : vector<16x32xf32> to vector<1x16x32xf32>
    %cst_128 = arith.constant dense<0.000000e+00> : vector<1xf32>
    %322 = vector.multi_reduction <add>, %321, %cst_128 [1, 2] : vector<1x16x32xf32> to vector<1xf32>
    %323 = vector.shape_cast %322 : vector<1xf32> to vector<1x1x1xf32>
    %324 = vector.extract %323[0, 0, 0] : f32 from vector<1x1x1xf32>
    %325 = arith.addf %104, %324 : f32
    %326 = vector.extract_strided_slice %9 {offsets = [8, 0], sizes = [8, 1], strides = [1, 1]} : vector<16x1xi32> to vector<8x1xi32>
    %327 = vector.broadcast %326 : vector<8x1xi32> to vector<8x64xi32>
    %328 = arith.cmpi eq, %24, %327 : vector<8x64xi32>
    %329 = arith.extui %328 : vector<8x64xi1> to vector<8x64xi32>
    %330 = arith.sitofp %329 : vector<8x64xi32> to vector<8x64xf32>
    %cst_129 = arith.constant dense<0.000000e+00> : vector<8x32xf32>
    %331 = tpu.matmul %330, %11, %cst_129 {dimension_numbers = #tpu.dot_dimension_numbers<[1], [0], [0], [1], [0, 0, 1, 1], [], []>} : vector<8x64xf32>, vector<64x32xf32>, vector<8x32xf32> -> vector<8x32xf32>
    %332 = arith.mulf %331, %331 : vector<8x32xf32>
    %cst_130 = arith.constant dense<0.000000e+00> : vector<8xf32>
    %333 = vector.multi_reduction <add>, %332, %cst_130 [1] : vector<8x32xf32> to vector<8xf32>
    %334 = vector.shape_cast %333 : vector<8xf32> to vector<8x1xf32>
    %cst_131 = arith.constant 3.200000e+01 : f32
    %335 = vector.broadcast %cst_131 : f32 to vector<8x1xf32>
    %336 = arith.divf %334, %335 : vector<8x1xf32>
    %cst_132 = arith.constant 9.99999997E-7 : f32
    %337 = vector.broadcast %cst_132 : f32 to vector<8x1xf32>
    %338 = arith.addf %336, %337 : vector<8x1xf32>
    %339 = math.rsqrt %338 : vector<8x1xf32>
    %340 = vector.broadcast %339 : vector<8x1xf32> to vector<8x32xf32>
    %341 = arith.mulf %331, %340 : vector<8x32xf32>
    %cst_133 = arith.constant dense<0.000000e+00> : vector<8x96xf32>
    %342 = tpu.matmul %341, %16, %cst_133 {dimension_numbers = #tpu.dot_dimension_numbers<[1], [0], [0], [1], [0, 0, 1, 1], [], []>} : vector<8x32xf32>, vector<32x96xf32>, vector<8x96xf32> -> vector<8x96xf32>
    %343 = vector.extract_strided_slice %342 {offsets = [0, 0], sizes = [8, 32], strides = [1, 1]} : vector<8x96xf32> to vector<8x32xf32>
    %344 = vector.extract_strided_slice %342 {offsets = [0, 32], sizes = [8, 32], strides = [1, 1]} : vector<8x96xf32> to vector<8x32xf32>
    %345 = vector.extract_strided_slice %342 {offsets = [0, 64], sizes = [8, 32], strides = [1, 1]} : vector<8x96xf32> to vector<8x32xf32>
    %cst_134 = arith.constant dense<0.000000e+00> : vector<8x8xf32>
    %346 = tpu.matmul %343, %344, %cst_134 {dimension_numbers = #tpu.dot_dimension_numbers<[1], [1], [0], [0], [0, 0, 1, 0], [], []>} : vector<8x32xf32>, vector<8x32xf32>, vector<8x8xf32> -> vector<8x8xf32>
    %cst_135 = arith.constant 0.176776692 : f32
    %347 = vector.broadcast %cst_135 : f32 to vector<8x8xf32>
    %348 = arith.mulf %346, %347 : vector<8x8xf32>
    %cst_136 = arith.constant -1.000000e+09 : f32
    %349 = vector.broadcast %cst_136 : f32 to vector<8x8xf32>
    %350 = arith.select %28, %348, %349 : vector<8x8xi1>, vector<8x8xf32>
    %cst_137 = arith.constant dense<0xFF800000> : vector<8xf32>
    %351 = vector.multi_reduction <maximumf>, %350, %cst_137 [1] : vector<8x8xf32> to vector<8xf32>
    %352 = vector.shape_cast %351 : vector<8xf32> to vector<8x1xf32>
    %353 = vector.broadcast %352 : vector<8x1xf32> to vector<8x8xf32>
    %354 = arith.subf %350, %353 : vector<8x8xf32>
    %355 = math.exp %354 : vector<8x8xf32>
    %cst_138 = arith.constant dense<0.000000e+00> : vector<8xf32>
    %356 = vector.multi_reduction <add>, %355, %cst_138 [1] : vector<8x8xf32> to vector<8xf32>
    %357 = vector.shape_cast %356 : vector<8xf32> to vector<8x1xf32>
    %358 = tpu.reciprocal %357 {approx = true} : vector<8x1xf32> -> vector<8x1xf32>
    %359 = vector.broadcast %358 : vector<8x1xf32> to vector<8x8xf32>
    %360 = arith.mulf %355, %359 : vector<8x8xf32>
    %cst_139 = arith.constant dense<0.000000e+00> : vector<8x32xf32>
    %361 = tpu.matmul %360, %345, %cst_139 {dimension_numbers = #tpu.dot_dimension_numbers<[1], [0], [0], [1], [0, 0, 1, 1], [], []>} : vector<8x8xf32>, vector<8x32xf32>, vector<8x32xf32> -> vector<8x32xf32>
    %cst_140 = arith.constant dense<0.000000e+00> : vector<8x32xf32>
    %362 = tpu.matmul %361, %17, %cst_140 {dimension_numbers = #tpu.dot_dimension_numbers<[1], [0], [0], [1], [0, 0, 1, 1], [], []>} : vector<8x32xf32>, vector<32x32xf32>, vector<8x32xf32> -> vector<8x32xf32>
    %363 = arith.addf %331, %362 : vector<8x32xf32>
    %364 = arith.mulf %363, %363 : vector<8x32xf32>
    %cst_141 = arith.constant dense<0.000000e+00> : vector<8xf32>
    %365 = vector.multi_reduction <add>, %364, %cst_141 [1] : vector<8x32xf32> to vector<8xf32>
    %366 = vector.shape_cast %365 : vector<8xf32> to vector<8x1xf32>
    %cst_142 = arith.constant 3.200000e+01 : f32
    %367 = vector.broadcast %cst_142 : f32 to vector<8x1xf32>
    %368 = arith.divf %366, %367 : vector<8x1xf32>
    %cst_143 = arith.constant 9.99999997E-7 : f32
    %369 = vector.broadcast %cst_143 : f32 to vector<8x1xf32>
    %370 = arith.addf %368, %369 : vector<8x1xf32>
    %371 = math.rsqrt %370 : vector<8x1xf32>
    %372 = vector.broadcast %371 : vector<8x1xf32> to vector<8x32xf32>
    %373 = arith.mulf %363, %372 : vector<8x32xf32>
    %cst_144 = arith.constant dense<0.000000e+00> : vector<8x32xf32>
    %374 = tpu.matmul %373, %18, %cst_144 {dimension_numbers = #tpu.dot_dimension_numbers<[1], [0], [0], [1], [0, 0, 1, 1], [], []>} : vector<8x32xf32>, vector<32x32xf32>, vector<8x32xf32> -> vector<8x32xf32>
    %cst_145 = arith.constant dense<0.000000e+00> : vector<16x64xf32>
    %375 = tpu.matmul %317, %19, %cst_145 {dimension_numbers = #tpu.dot_dimension_numbers<[1], [0], [0], [1], [0, 0, 1, 1], [], []>} : vector<16x32xf32>, vector<32x64xf32>, vector<16x64xf32> -> vector<16x64xf32>
    %376 = vector.extract_strided_slice %375 {offsets = [0, 0], sizes = [16, 32], strides = [1, 1]} : vector<16x64xf32> to vector<16x32xf32>
    %377 = vector.extract_strided_slice %375 {offsets = [0, 32], sizes = [16, 32], strides = [1, 1]} : vector<16x64xf32> to vector<16x32xf32>
    %cst_146 = arith.constant dense<0.000000e+00> : vector<8x16xf32>
    %378 = tpu.matmul %374, %376, %cst_146 {dimension_numbers = #tpu.dot_dimension_numbers<[1], [1], [0], [0], [0, 0, 1, 0], [], []>} : vector<8x32xf32>, vector<16x32xf32>, vector<8x16xf32> -> vector<8x16xf32>
    %cst_147 = arith.constant 0.176776692 : f32
    %379 = vector.broadcast %cst_147 : f32 to vector<8x16xf32>
    %380 = arith.mulf %378, %379 : vector<8x16xf32>
    %cst_148 = arith.constant -1.000000e+09 : f32
    %381 = vector.shape_cast %252 : vector<1x16xi1> to vector<1x16xi1>
    %382 = vector.broadcast %381 : vector<1x16xi1> to vector<8x16xi1>
    %383 = vector.broadcast %cst_148 : f32 to vector<8x16xf32>
    %384 = arith.select %382, %380, %383 : vector<8x16xi1>, vector<8x16xf32>
    %cst_149 = arith.constant dense<0xFF800000> : vector<8xf32>
    %385 = vector.multi_reduction <maximumf>, %384, %cst_149 [1] : vector<8x16xf32> to vector<8xf32>
    %386 = vector.shape_cast %385 : vector<8xf32> to vector<8x1xf32>
    %387 = vector.broadcast %386 : vector<8x1xf32> to vector<8x16xf32>
    %388 = arith.subf %384, %387 : vector<8x16xf32>
    %389 = math.exp %388 : vector<8x16xf32>
    %cst_150 = arith.constant dense<0.000000e+00> : vector<8xf32>
    %390 = vector.multi_reduction <add>, %389, %cst_150 [1] : vector<8x16xf32> to vector<8xf32>
    %391 = vector.shape_cast %390 : vector<8xf32> to vector<8x1xf32>
    %392 = tpu.reciprocal %391 {approx = true} : vector<8x1xf32> -> vector<8x1xf32>
    %393 = vector.broadcast %392 : vector<8x1xf32> to vector<8x16xf32>
    %394 = arith.mulf %389, %393 : vector<8x16xf32>
    %cst_151 = arith.constant dense<0.000000e+00> : vector<8x32xf32>
    %395 = tpu.matmul %394, %377, %cst_151 {dimension_numbers = #tpu.dot_dimension_numbers<[1], [0], [0], [1], [0, 0, 1, 1], [], []>} : vector<8x16xf32>, vector<16x32xf32>, vector<8x32xf32> -> vector<8x32xf32>
    %cst_152 = arith.constant dense<0.000000e+00> : vector<8x32xf32>
    %396 = tpu.matmul %395, %20, %cst_152 {dimension_numbers = #tpu.dot_dimension_numbers<[1], [0], [0], [1], [0, 0, 1, 1], [], []>} : vector<8x32xf32>, vector<32x32xf32>, vector<8x32xf32> -> vector<8x32xf32>
    %397 = arith.addf %363, %396 : vector<8x32xf32>
    %398 = arith.mulf %397, %397 : vector<8x32xf32>
    %cst_153 = arith.constant dense<0.000000e+00> : vector<8xf32>
    %399 = vector.multi_reduction <add>, %398, %cst_153 [1] : vector<8x32xf32> to vector<8xf32>
    %400 = vector.shape_cast %399 : vector<8xf32> to vector<8x1xf32>
    %cst_154 = arith.constant 3.200000e+01 : f32
    %401 = vector.broadcast %cst_154 : f32 to vector<8x1xf32>
    %402 = arith.divf %400, %401 : vector<8x1xf32>
    %cst_155 = arith.constant 9.99999997E-7 : f32
    %403 = vector.broadcast %cst_155 : f32 to vector<8x1xf32>
    %404 = arith.addf %402, %403 : vector<8x1xf32>
    %405 = math.rsqrt %404 : vector<8x1xf32>
    %406 = vector.broadcast %405 : vector<8x1xf32> to vector<8x32xf32>
    %407 = arith.mulf %397, %406 : vector<8x32xf32>
    %cst_156 = arith.constant dense<0.000000e+00> : vector<8x64xf32>
    %408 = tpu.matmul %407, %21, %cst_156 {dimension_numbers = #tpu.dot_dimension_numbers<[1], [0], [0], [1], [0, 0, 1, 1], [], []>} : vector<8x32xf32>, vector<32x64xf32>, vector<8x64xf32> -> vector<8x64xf32>
    %cst_157 = arith.constant 0.000000e+00 : f32
    %409 = vector.broadcast %cst_157 : f32 to vector<8x64xf32>
    %410 = arith.maximumf %408, %409 : vector<8x64xf32>
    %cst_158 = arith.constant dense<0.000000e+00> : vector<8x32xf32>
    %411 = tpu.matmul %410, %22, %cst_158 {dimension_numbers = #tpu.dot_dimension_numbers<[1], [0], [0], [1], [0, 0, 1, 1], [], []>} : vector<8x64xf32>, vector<64x32xf32>, vector<8x32xf32> -> vector<8x32xf32>
    %412 = arith.addf %397, %411 : vector<8x32xf32>
    %413 = arith.mulf %412, %412 : vector<8x32xf32>
    %cst_159 = arith.constant dense<0.000000e+00> : vector<8xf32>
    %414 = vector.multi_reduction <add>, %413, %cst_159 [1] : vector<8x32xf32> to vector<8xf32>
    %415 = vector.shape_cast %414 : vector<8xf32> to vector<8x1xf32>
    %cst_160 = arith.constant 3.200000e+01 : f32
    %416 = vector.broadcast %cst_160 : f32 to vector<8x1xf32>
    %417 = arith.divf %415, %416 : vector<8x1xf32>
    %cst_161 = arith.constant 9.99999997E-7 : f32
    %418 = vector.broadcast %cst_161 : f32 to vector<8x1xf32>
    %419 = arith.addf %417, %418 : vector<8x1xf32>
    %420 = math.rsqrt %419 : vector<8x1xf32>
    %421 = vector.broadcast %420 : vector<8x1xf32> to vector<8x32xf32>
    %422 = arith.mulf %412, %421 : vector<8x32xf32>
    %cst_162 = arith.constant dense<0.000000e+00> : vector<8x64xf32>
    %423 = tpu.matmul %422, %11, %cst_162 {dimension_numbers = #tpu.dot_dimension_numbers<[1], [1], [0], [0], [0, 0, 1, 0], [], []>} : vector<8x32xf32>, vector<64x32xf32>, vector<8x64xf32> -> vector<8x64xf32>
    %424 = vector.extract_strided_slice %10 {offsets = [8, 0], sizes = [8, 1], strides = [1, 1]} : vector<16x1xi32> to vector<8x1xi32>
    %c0_i32_163 = arith.constant 0 : i32
    %425 = vector.broadcast %c0_i32_163 : i32 to vector<8x1xi32>
    %426 = arith.cmpi eq, %424, %425 : vector<8x1xi32>
    %c-100_i32_164 = arith.constant -100 : i32
    %427 = vector.broadcast %c-100_i32_164 : i32 to vector<8x1xi32>
    %428 = arith.select %426, %427, %424 : vector<8x1xi1>, vector<8x1xi32>
    %c-100_i32_165 = arith.constant -100 : i32
    %429 = vector.broadcast %c-100_i32_165 : i32 to vector<8x1xi32>
    %430 = arith.cmpi ne, %428, %429 : vector<8x1xi32>
    %c0_i32_166 = arith.constant 0 : i32
    %431 = vector.broadcast %c0_i32_166 : i32 to vector<8x1xi32>
    %432 = arith.select %430, %428, %431 : vector<8x1xi1>, vector<8x1xi32>
    %433 = vector.broadcast %432 : vector<8x1xi32> to vector<8x64xi32>
    %434 = arith.cmpi eq, %24, %433 : vector<8x64xi32>
    %435 = arith.extui %434 : vector<8x64xi1> to vector<8x64xi32>
    %436 = arith.sitofp %435 : vector<8x64xi32> to vector<8x64xf32>
    %cst_167 = arith.constant dense<0xFF800000> : vector<8xf32>
    %437 = vector.multi_reduction <maximumf>, %423, %cst_167 [1] : vector<8x64xf32> to vector<8xf32>
    %438 = vector.shape_cast %437 : vector<8xf32> to vector<8x1xf32>
    %439 = vector.broadcast %438 : vector<8x1xf32> to vector<8x64xf32>
    %440 = arith.subf %423, %439 : vector<8x64xf32>
    %441 = math.exp %440 : vector<8x64xf32>
    %cst_168 = arith.constant dense<0.000000e+00> : vector<8xf32>
    %442 = vector.multi_reduction <add>, %441, %cst_168 [1] : vector<8x64xf32> to vector<8xf32>
    %443 = vector.shape_cast %442 : vector<8xf32> to vector<8x1xf32>
    %444 = math.log %443 : vector<8x1xf32>
    %445 = arith.addf %444, %438 : vector<8x1xf32>
    %446 = arith.mulf %423, %436 : vector<8x64xf32>
    %cst_169 = arith.constant dense<0.000000e+00> : vector<8xf32>
    %447 = vector.multi_reduction <add>, %446, %cst_169 [1] : vector<8x64xf32> to vector<8xf32>
    %448 = vector.shape_cast %447 : vector<8xf32> to vector<8x1xf32>
    %449 = arith.extui %430 : vector<8x1xi1> to vector<8x1xi32>
    %450 = arith.sitofp %449 : vector<8x1xi32> to vector<8x1xf32>
    %451 = arith.subf %445, %448 : vector<8x1xf32>
    %452 = arith.mulf %451, %450 : vector<8x1xf32>
    %453 = vector.shape_cast %452 : vector<8x1xf32> to vector<1x8x1xf32>
    %cst_170 = arith.constant dense<0.000000e+00> : vector<1xf32>
    %454 = vector.multi_reduction <add>, %453, %cst_170 [1, 2] : vector<1x8x1xf32> to vector<1xf32>
    %455 = vector.shape_cast %454 : vector<1xf32> to vector<1x1x1xf32>
    %456 = vector.extract %455[0, 0, 0] : f32 from vector<1x1x1xf32>
    %457 = vector.shape_cast %450 : vector<8x1xf32> to vector<1x8x1xf32>
    %cst_171 = arith.constant dense<0.000000e+00> : vector<1xf32>
    %458 = vector.multi_reduction <add>, %457, %cst_171 [1, 2] : vector<1x8x1xf32> to vector<1xf32>
    %459 = vector.shape_cast %458 : vector<1xf32> to vector<1x1x1xf32>
    %460 = vector.extract %459[0, 0, 0] : f32 from vector<1x1x1xf32>
    %461 = arith.addf %240, %456 : f32
    %462 = arith.addf %241, %460 : f32
    %463 = vector.broadcast %438 : vector<8x1xf32> to vector<8x64xf32>
    %464 = arith.cmpf oeq, %423, %463 : vector<8x64xf32>
    %cst_172 = arith.constant 6.400000e+01 : f32
    %465 = vector.broadcast %cst_172 : f32 to vector<8x64xf32>
    %466 = arith.select %464, %25, %465 : vector<8x64xi1>, vector<8x64xf32>
    %cst_173 = arith.constant dense<0x7F800000> : vector<8xf32>
    %467 = vector.multi_reduction <minimumf>, %466, %cst_173 [1] : vector<8x64xf32> to vector<8xf32>
    %468 = vector.shape_cast %467 : vector<8xf32> to vector<8x1xf32>
    %469 = arith.fptosi %468 : vector<8x1xf32> to vector<8x1xi32>
    %c8 = arith.constant 8 : index
    %c0_174 = arith.constant 0 : index
    %470 = vector.load %arg20[%c8, %c0_174] : memref<16x1xi32, #tpu.memory_space<vmem>>, vector<8x1xi32>
    tpu.vector_store %arg20[%c8, %c0_174], %469 {strides = array<i32>} : memref<16x1xi32, #tpu.memory_space<vmem>>, vector<8x1xi32>,
    %cst_175 = arith.constant 1.000000e+00 : f32
    %471 = vector.broadcast %cst_175 : f32 to vector<1x1xf32>
    %cst_176 = arith.constant 1.000000e+00 : f32
    %472 = arith.maximumf %462, %cst_176 : f32
    %473 = arith.divf %461, %472 : f32
    %474 = vector.broadcast %473 : f32 to vector<1x1xf32>
    %475 = arith.mulf %474, %471 : vector<1x1xf32>
    %c0_177 = arith.constant 0 : index
    %c0_178 = arith.constant 0 : index
    %476 = vector.load %arg19[%c0_177, %c0_178] : memref<1x1xf32, #tpu.memory_space<vmem>>, vector<1x1xf32>
    tpu.vector_store %arg19[%c0_177, %c0_178], %475 {strides = array<i32>} : memref<1x1xf32, #tpu.memory_space<vmem>>, vector<1x1xf32>,
    %c0_179 = arith.constant 0 : index
    %c0_180 = arith.constant 0 : index
    %477 = vector.load %arg5[%c0_179, %c0_180] : memref<1x1xf32, #tpu.memory_space<vmem>>, vector<1x1xf32>
    %cst_181 = arith.constant 5.000000e-01 : f32
    %478 = vector.broadcast %cst_181 : f32 to vector<1x1xf32>
    %479 = arith.mulf %478, %477 : vector<1x1xf32>
    %cst_182 = arith.constant 5.000000e-01 : f32
    %480 = arith.mulf %cst_182, %473 : f32
    %481 = vector.broadcast %480 : f32 to vector<1x1xf32>
    %482 = arith.mulf %481, %471 : vector<1x1xf32>
    %483 = arith.addf %479, %482 : vector<1x1xf32>
    %cst_183 = arith.constant 9.765625E-4 : f32
    %484 = arith.mulf %325, %cst_183 : f32
    %485 = vector.broadcast %484 : f32 to vector<1x1xf32>
    %486 = arith.mulf %485, %471 : vector<1x1xf32>
    %487 = arith.addf %483, %486 : vector<1x1xf32>
    %c0_184 = arith.constant 0 : index
    %c0_185 = arith.constant 0 : index
    %488 = vector.load %arg18[%c0_184, %c0_185] : memref<1x1xf32, #tpu.memory_space<vmem>>, vector<1x1xf32>
    tpu.vector_store %arg18[%c0_184, %c0_185], %487 {strides = array<i32>} : memref<1x1xf32, #tpu.memory_space<vmem>>, vector<1x1xf32>,
    return
  }
}

</mosaic_0001>

<bundles_post_ra>
// kernel: code_reviewer_forward.3
= control target key start
LH: loop header
LB: loop body
LE: loop exit
PB: predicated region body
PF: predicated region fallthrough
CT: control target
= control target key end

     0   :  { %s6122_s0 = inlined_call_operand.vmem [shape: f32[32,1], index: 0, kind: input, shape index: {}]   ;;  %s6123_s1 = inlined_call_operand.vmem [shape: f32[2,16], index: 1, kind: input, shape index: {}]   ;;  %s6124_s2 = inlined_call_operand.vmem [shape: s32[16,1], index: 2, kind: input, shape index: {}]   ;;  %s6125_s3 = inlined_call_operand.vmem [shape: s32[16,1], index: 3, kind: input, shape index: {}]   ;;  %s6126_s4 = inlined_call_operand.vmem [shape: f32[32,32], index: 4, kind: input, shape index: {}]   ;;  %s6127_s5 = inlined_call_operand.<no memory space> [shape: f32[1,1], index: 5, kind: input, shape index: {}]   ;;  %s6128_s6 = inlined_call_operand.vmem [shape: f32[64,32], index: 6, kind: input, shape index: {}]   ;;  %s6129_s7 = inlined_call_operand.vmem [shape: f32[32,96], index: 7, kind: input, shape index: {}]   ;;  %s6130_s8 = inlined_call_operand.vmem [shape: f32[32,32], index: 8, kind: input, shape index: {}]   ;;  %s6131_s9 = inlined_call_operand.vmem [shape: f32[32,64], index: 9, kind: input, shape index: {}]   ;;  %s6132_s10 = inlined_call_operand.vmem [shape: f32[64,32], index: 10, kind: input, shape index: {}]   ;;  %s6133_s11 = inlined_call_operand.vmem [shape: f32[32,96], index: 11, kind: input, shape index: {}]   ;;  %s6134_s12 = inlined_call_operand.vmem [shape: f32[32,32], index: 12, kind: input, shape index: {}]   ;;  %s6135_s13 = inlined_call_operand.vmem [shape: f32[32,32], index: 13, kind: input, shape index: {}]   ;;  %s6136_s14 = inlined_call_operand.vmem [shape: f32[32,64], index: 14, kind: input, shape index: {}]   ;;  %s6137_s15 = inlined_call_operand.vmem [shape: f32[32,32], index: 15, kind: input, shape index: {}]   ;;  %s6138_s16 = inlined_call_operand.vmem [shape: f32[32,64], index: 16, kind: input, shape index: {}]   ;;  %s6139_s17 = inlined_call_operand.vmem [shape: f32[64,32], index: 17, kind: input, shape index: {}]   ;;  %s6140_s18 = inlined_call_operand.hbm [shape: f32[1,1], index: 18, kind: output, shape index: {0}]   ;;  %s6141_s19 = inlined_call_operand.hbm [shape: f32[1,1], index: 19, kind: output, shape index: {1}]   ;;  %s6142_s20 = inlined_call_operand.vmem [shape: s32[16,1], index: 20, kind: output, shape index: {2}]  }
   0x1   :  { %6148 = sst [smem:[#allocation9_spill]] %s6122_s0  ;;  %v26_v0 = vstv %s6127_s5 }
   0x2   :  { %6149 = sst [smem:[#allocation10_spill]] %s6123_s1  ;;  %27 = vst [vmem:[#allocation2] sm:$0x1] %v26_v0 }
   0x3   :  { %6150 = sst [smem:[#allocation11_spill]] %s6124_s2 }
   0x4   :  { %6151 = sst [smem:[#allocation12_spill]] %s6125_s3 }
   0x5   :  { %6152 = sst [smem:[#allocation13_spill]] %s6126_s4 }
   0x6   :  { %28 = vsyncpa [#allocation4], 0  ;;  %s6153_s2 = sld [smem:[#allocation9_spill]]  ;;  %v90_v3 = vld [vmem:[%s6128_s6] sm:$0xff]  ;;  %v5140_v4 = vmov 0   ;;  %v91_v7 = vld [vmem:[%s6128_s6 + $0x8] sm:$0xff] }
   0x7   :  { %4978 = vset.pattern.permute.xlu0 %v5140_v4  ;;  %v92_v8 = vld [vmem:[%s6128_s6 + $0x10] sm:$0xff]  ;;  %v93_v9 = vld [vmem:[%s6128_s6 + $0x18] sm:$0xff]  ;;  %4994 = vset.pattern.permute.xlu1 %v5140_v4  ;;  %v5277_v10 = vpack.c.bf16 %v91_v7, %v90_v3 }
   0x8   :  { %v5279_v11 = vpack.c.bf16 %v93_v9, %v92_v8 }
   0xc   :  { %v66_v1 = vld [vmem:[%s6153_s2] sm:$0xff]  ;;  %v67_v2 = vld [vmem:[%s6153_s2 + $0x8] sm:$0xff] }
   0xd   :  { %v3841_v5 = vmax.f32 %v66_v1, 0.0  ;;  %v3844_v6 = vmax.f32 %v67_v2, 0.0 }
   0xe   :  { %29 = vsyncpa [#allocation6], 0  ;;  %v94_v14 = vld [vmem:[%s6128_s6 + $0x20] sm:$0xff]  ;;  %v95_v15 = vld [vmem:[%s6128_s6 + $0x28] sm:$0xff]  ;;  %4638 = vmatprep.subr.bf16.mxu0 %v5277_v10  ;;  %v150_v22 = vlaneseq  ;;  %vm170_vm0 = vcmask 523264   ;;  %v5141_v25 = vmov 0.0  }
   0xf   :  { %v3842_v12 = vmin.f32 %v3841_v5, 63.0  ;;  %v3845_v13 = vmin.f32 %v3844_v6, 63.0  ;;  %4640 = vmatpush3.bf16.msra.mxu0 %v5277_v10  ;;  %v5290_v17 = vpack.c.bf16 %v95_v15, %v94_v14  ;;  %v96_v19 = vld [vmem:[%s6128_s6 + $0x30] sm:$0xff]  ;;  %v97_v20 = vld [vmem:[%s6128_s6 + $0x38] sm:$0xff]  ;;  %vm254_vm3 = vcmask 261120   ;;  %v98_v35 = vld [vmem:[%s6129_s7] sm:$0xff] }
  0x10   :  { %4642 = vmatprep.subr.bf16.mxu0 %v5279_v11  ;;  %v5300_v21 = vpack.c.bf16 %v97_v20, %v96_v19  ;;  %v5305_v23 = vand.u32 127, %v150_v22  ;;  %v99_v36 = vld [vmem:[%s6129_s7 + $0x8] sm:$0xff]  ;;  %v100_v37 = vld [vmem:[%s6129_s7 + $0x10] sm:$0xff]  ;;  %v101_v39 = vld [vmem:[%s6129_s7 + $0x18] sm:$0xff]  ;;  %s5142_s7 = smov 96   ;;  %s6156_s22 = sld [smem:[#allocation10_spill]] }
  0x11   :  { %v4941_v16 = vcvt.f32.s32 %v3842_v12  ;;  %v4944_v18 = vcvt.f32.s32 %v3845_v13  ;;  %v5332_v38 = vpack.c.bf16 %v99_v36, %v98_v35  ;;  %v5337_v40 = vpack.c.bf16 %v101_v39, %v100_v37  ;;  %vm5351_vm4 = vmpackc.low %vm254_vm3, %vm254_vm3  ;;  %s5143_s23 = smov 64   ;;  %s6157_s29 = sld [smem:[#allocation11_spill]] }
  0x12   :  { %v5363_v60 = vshrl.u32 %v150_v22, 7  ;;  %vm450_vm7 = vcmask 130048   ;;  %vm5145_vm8 = vmmov 0   ;;  %vm1099_vm11 = vcmask 64512   ;;  %s6159_s1 = sld [smem:[#allocation13_spill]]  ;;  %s5148_s21 = smov [#allocation3]  }
  0x13   :  { %159 = vperm.xlu0 %4978, %v4941_v16   ;;  %4644 = vmatpush3.bf16.msra.mxu0 %v5279_v11 }
  0x14   :  { %4646 = vmatprep.subr.bf16.mxu0 %v5290_v17  ;;  %v445_v61 = vsub.s32 0, %v5363_v60  ;;  %vm155_vm10 = vcmp.le.s32.totalorder %v5305_v23, %v5363_v60 }
  0x16   :  { %v156_v59 = vld [vmem:[%s6156_s22] sm:$0x1] }
  0x17   :  { %162 = vperm.xlu0 %4978, %v4944_v18   ;;  %4648 = vmatpush3.bf16.msra.mxu0 %v5290_v17  ;;  %vm157_vm5 = vcmp.ne.f32.partialorder %v156_v59, 0.0  ;;  %v109_v59 = vld [vmem:[%s6131_s9 + $0x18] sm:$0xff] }
  0x18   :  { %4650 = vmatprep.subr.bf16.mxu0 %v5300_v21  ;;  %v442_v62 = vsel %vm157_vm5, 1, %v5140_v4 }
  0x19   :  { %v5369_v63 = vrot.slane %v442_v62, %v445_v61 }
  0x1b   :  { %4652 = vmatpush3.bf16.msra.mxu0 %v5300_v21  ;;  %vm447_vm6 = vcmp.eq.s32.totalorder %v5369_v63, 1  ;;  %v135_v63 = vld [vmem:[%s6137_s15 + $0x8] sm:$0xff] }
  0x1c   :  { %4654 = vmatprep.subr.bf16.mxu0 %v5332_v38 }
  0x92   :  { %v160_v24 = vpop.permute.xlu0 %159 }
  0x93   :  { %vm164_vm1 = vcmp.eq.s32.totalorder %v5305_v23, %v160_v24  ;;  %v102_v24 = vld [vmem:[%s6130_s8] sm:$0xff] }
  0x94   :  { %v3853_v26 = vsel %vm164_vm1, 1.0, %v5141_v25 }
  0x95   :  { %4189 = vmatprep.mubr.msk.f32.mxu0 %vm170_vm0, %v3853_v26  ;;  %v103_v26 = vld [vmem:[%s6130_s8 + $0x8] sm:$0xff] }
  0x96   :  { %v163_v27 = vpop.permute.xlu0 %162 }
  0x97   :  { %vm165_vm2 = vcmp.eq.s32.totalorder %v5305_v23, %v163_v27  ;;  %v104_v27 = vld [vmem:[%s6130_s8 + $0x10] sm:$0xff] }
  0x98   :  { %v3854_v28 = vsel %vm165_vm2, 1.0, %v5141_v25 }
  0x99   :  { %4190 = vmatmul.mubr.msk.f32.vlgmr.msra.gmra.mrb[0].mxu0 %vm170_vm0, %v3854_v28  ;;  %v5390_v28 = vpack.c.bf16 %v103_v26, %v102_v24 }
  0x9a   :  { %4656 = vmatpush3.bf16.msra.mxu0 %v5332_v38 }
  0x9b   :  { %4658 = vmatprep.subr.bf16.mxu0 %v5337_v40 }
  0x9e   :  { %4660 = vmatpush3.bf16.msra.mxu0 %v5337_v40 }
 0x16c   :  { %v5313_v29 = vpop.f32.mrb[0].mxu0 }
 0x16d   :  { %v5315_v30 = vpop.f32.mrb[1].mxu0  ;;  %v253_v33 = vmul.f32 %v5313_v29, %v5313_v29 }
 0x16e   :  { %v252_v31 = vmul.f32 %v5315_v30, %v5315_v30 }
 0x16f   :  { %v258_v34 = vsel %vm254_vm3, %v253_v33, 0.0 }
 0x170   :  { %v255_v32 = vsel %vm254_vm3, %v252_v31, 0.0  ;;  %v105_v31 = vld [vmem:[%s6130_s8 + $0x18] sm:$0xff] }
 0x171   :  { %256 = vadd.xlane.f32.xlu1 %v255_v32  ;;  %v5395_v32 = vpack.c.bf16 %v105_v31, %v104_v27 }
 0x175   :  { %259 = vadd.xlane.f32.xlu1 %v258_v34 }
 0x1fe   :  { %v257_v41 = vpop.xlane.xlu1 %256 }
 0x1ff   :  { %v262_v42 = vmul.f32 0.03125, %v257_v41 }
 0x201   :  { %v264_v43 = vadd.f32 1e-06, %v262_v42 }
 0x202   :  { %v260_v44 = vpop.xlane.xlu1 %259 }
 0x203   :  { %5010 = vrsqrt.f32 %v264_v43  ;;  %v263_v45 = vmul.f32 0.03125, %v260_v44 }
 0x205   :  { %v265_v46 = vadd.f32 1e-06, %v263_v45 }
 0x207   :  { %5012 = vrsqrt.f32 %v265_v46 }
 0x20d   :  { %v5011_v47 = vpop.eup %5010 }
 0x20e   :  { %v268_v48 = vmul.f32 %v5011_v47, %v5315_v30 }
 0x210   :  { %4200 = vmatprep.mubr.msk.f32.mxu0 %vm254_vm3, %v268_v48 }
 0x211   :  { %v5013_v49 = vpop.eup %5012 }
 0x212   :  { %v269_v50 = vmul.f32 %v5013_v49, %v5313_v29 }
 0x214   :  { %4201 = vmatmul.mubr.msk.f32.vlgmr.msra.gmra.mrb[2].mxu0 %vm254_vm3, %v269_v50 }
 0x2e7   :  { %v4202_v51 = vpop.f32.mrb[2].mxu0 }
 0x2e8   :  { %v342_v52 = vpop.f32.mrb[3].mxu0 }
 0x2e9   :  { %v4984_v53 = vpack.i.bf16 %v4202_v51, %v342_v52  ;;  %4207 = vmatprep.mubr.msk.f32.mxu1 %vm254_vm3, %v342_v52 }
 0x2eb   :  { %4980 = vrot.lane.b32.xlu0 %v4984_v53, %s5142_s7 }
 0x35d   :  { %v4981_v54 = vpop.permute.xlu0 %4980 }
 0x35e   :  { %v4983_v55 = vunpack.i.h.bf16 %v4981_v54  ;;  %v4982_v56 = vunpack.i.l.bf16 %v4981_v54 }
 0x360   :  { %v4661_v58 = vpack.c.bf16 %v4983_v55, %v4982_v56  ;;  %v107_v55 = vld [vmem:[%s6131_s9 + $0x8] sm:$0xff] }
 0x362   :  { %4663 = vmatprep.subr.msk.bf16.mxu1 %vm5351_vm4, %v4661_v58 }
 0x363   :  { %4666 = vmatpush3.bf16.xpose.msk.msra.mxu1 %vm5351_vm4, %v4661_v58  ;;  %v108_v58 = vld [vmem:[%s6131_s9 + $0x10] sm:$0xff] }
 0x364   :  { %4672 = vmatprep.subr.bf16.mxu1 %v5390_v28  ;;  %v5435_v62 = vpack.c.bf16 %v109_v59, %v108_v58 }
 0x36a   :  { %4208 = vmatmul.mubr.msk.f32.vlgmr.msra.gmra.mrb[0].mxu1 %vm254_vm3, %v4202_v51 }
 0x36b   :  { %4674 = vmatpush3.bf16.msra.mxu1 %v5390_v28 }
 0x36c   :  { %4676 = vmatprep.subr.bf16.mxu1 %v5395_v32 }
 0x36f   :  { %4678 = vmatpush3.bf16.msra.mxu1 %v5395_v32 }
 0x43d   :  { %v4209_v0 = vpop.f32.mrb[0].mxu1 }
 0x43e   :  { %v441_v1 = vmul.f32 0.17677669, %v4209_v0  ;;  %v431_v2 = vpop.f32.mrb[1].mxu1  ;;  %v5144_v0 = vmov 0.0|0.0  }
 0x43f   :  { %v440_v3 = vmul.f32 0.17677669, %v431_v2  ;;  %v111_v2 = vld [vmem:[%s6132_s10 + $0x8] sm:$0xff] }
 0x440   :  { %v449_v5 = vsel %vm447_vm6, %v441_v1, -1e+09  ;;  %v110_v1 = vld [vmem:[%s6132_s10] sm:$0xff] }
 0x441   :  { %v454_v6 = vsel %vm450_vm7, %v449_v5, -inf  ;;  %v448_v7 = vsel %vm447_vm6, %v440_v3, -1e+09  ;;  %v112_v3 = vld [vmem:[%s6132_s10 + $0x10] sm:$0xff] }
 0x442   :  { %455 = vmax.xlane.f32.xlu0 %v454_v6  ;;  %v451_v8 = vsel %vm450_vm7, %v448_v7, -inf  ;;  %v113_v6 = vld [vmem:[%s6132_s10 + $0x18] sm:$0xff] }
 0x443   :  { %452 = vmax.xlane.f32.xlu1 %v451_v8  ;;  %v114_v8 = vld [vmem:[%s6132_s10 + $0x20] sm:$0xff] }
 0x4cf   :  { %v456_v9 = vpop.xlane.xlu0 %455 }
 0x4d0   :  { %v458_v12 = vsub.f32 %v449_v5, %v456_v9  ;;  %v453_v13 = vpop.xlane.xlu1 %452  ;;  %v5450_v5 = vpack.c.bf16 %v111_v2, %v110_v1  ;;  %v115_v9 = vld [vmem:[%s6132_s10 + $0x28] sm:$0xff] }
 0x4d1   :  { %v457_v14 = vsub.f32 %v448_v7, %v453_v13  ;;  %v5455_v7 = vpack.c.bf16 %v113_v6, %v112_v3 }
 0x4d2   :  { %v461_v15 = vmul.f32 1.442695, %v458_v12  ;;  %4688 = vmatprep.subr.bf16.mxu1 %v5450_v5  ;;  %v5466_v12 = vpack.c.bf16 %v115_v9, %v114_v8 }
 0x4d3   :  { %v459_v16 = vmul.f32 1.442695, %v457_v14 }
 0x4d4   :  { %5014 = vpow2.f32 %v461_v15 }
 0x4d5   :  { %5016 = vpow2.f32 %v459_v16 }
 0x4de   :  { %v5015_v18 = vpop.eup %5014 }
 0x4df   :  { %v466_v19 = vsel %vm450_vm7, %v5015_v18, 0.0  ;;  %v5017_v20 = vpop.eup %5016 }
 0x4e0   :  { %467 = vadd.xlane.f32.xlu1 %v466_v19  ;;  %v463_v22 = vsel %vm450_vm7, %v5017_v20, 0.0 }
 0x4e4   :  { %464 = vadd.xlane.f32.xlu1 %v463_v22 }
 0x4f5   :  { %4985 = vrot.lane.b32.xlu1 %v4984_v53, %s5143_s23 }
 0x56d   :  { %v468_v33 = vpop.xlane.xlu1 %467 }
 0x56e   :  { %5018 = vrcp.f32 %v468_v33  ;;  %v116_v33 = vld [vmem:[%s6132_s10 + $0x30] sm:$0xff] }
 0x571   :  { %v465_v34 = vpop.xlane.xlu1 %464 }
 0x572   :  { %5020 = vrcp.f32 %v465_v34  ;;  %v117_v34 = vld [vmem:[%s6132_s10 + $0x38] sm:$0xff] }
 0x575   :  { %v4986_v35 = vpop.permute.xlu1 %4985 }
 0x576   :  { %v4988_v36 = vunpack.i.h.bf16 %v4986_v35  ;;  %v4987_v37 = vunpack.i.l.bf16 %v4986_v35  ;;  %v5496_v35 = vpack.c.bf16 %v117_v34, %v116_v33  ;;  %v122_v34 = vld [vmem:[%s6134_s12] sm:$0xff] }
 0x578   :  { %v4667_v39 = vpack.c.bf16 %v4988_v36, %v4987_v37  ;;  %v5019_v41 = vpop.eup %5018 }
 0x579   :  { %v472_v44 = vmul.f32 %v5019_v41, %v5015_v18 }
 0x57a   :  { %4668 = vmatprep.subr.bf16.mxu0 %v4667_v39 }
 0x57b   :  { %4670 = vmatpush3.bf16.msra.mxu0 %v4667_v39 }
 0x57c   :  { %v5021_v42 = vpop.eup %5020 }
 0x57d   :  { %v471_v43 = vmul.f32 %v5021_v42, %v5017_v20 }
 0x57f   :  { %4214 = vmatprep.mubr.msk.f32.mxu0 %vm450_vm7, %v471_v43 }
 0x580   :  { %4215 = vmatmul.mubr.msk.f32.vlgmr.msra.gmra.mrb[4].mxu0 %vm450_vm7, %v472_v44 }
 0x653   :  { %v4216_v45 = vpop.f32.mrb[4].mxu0 }
 0x654   :  { %v551_v46 = vpop.f32.mrb[5].mxu0 }
 0x655   :  { %4225 = vmatprep.mubr.msk.f32.mxu1 %vm254_vm3, %v551_v46  ;;  %v118_v46 = vld [vmem:[%s6133_s11] sm:$0xff] }
 0x656   :  { %4226 = vmatmul.mubr.msk.f32.vlgmr.msra.gmra.mrb[2].mxu1 %vm254_vm3, %v4216_v45 }
 0x657   :  { %4690 = vmatpush3.bf16.msra.mxu1 %v5450_v5 }
 0x658   :  { %4692 = vmatprep.subr.bf16.mxu1 %v5455_v7 }
 0x65b   :  { %4694 = vmatpush3.bf16.msra.mxu1 %v5455_v7 }
 0x65c   :  { %4696 = vmatprep.subr.bf16.mxu1 %v5466_v12 }
 0x65f   :  { %4698 = vmatpush3.bf16.msra.mxu1 %v5466_v12 }
 0x660   :  { %4700 = vmatprep.subr.bf16.mxu1 %v5496_v35 }
 0x663   :  { %4702 = vmatpush3.bf16.msra.mxu1 %v5496_v35 }
 0x664   :  { %4715 = vmatprep.subr.bf16.mxu1 %v5144_v0 }
 0x729   :  { %v4227_v47 = vpop.f32.mrb[2].mxu1 }
 0x72a   :  { %v5406_v48 = vadd.f32 %v4227_v47, %v5313_v29  ;;  %v632_v49 = vpop.f32.mrb[3].mxu1  ;;  %v86_v29 = vld [vmem:[%s6157_s29] sm:$0xff]  ;;  %v119_v47 = vld [vmem:[%s6133_s11 + $0x8] sm:$0xff] }
 0x72b   :  { %v5409_v50 = vadd.f32 %v632_v49, %v5315_v30  ;;  %v106_v30 = vld [vmem:[%s6131_s9] sm:$0xff]  ;;  %v120_v49 = vld [vmem:[%s6133_s11 + $0x10] sm:$0xff] }
 0x72c   :  { %v644_v51 = vmul.f32 %v5406_v48, %v5406_v48  ;;  %v5426_v56 = vpack.c.bf16 %v107_v55, %v106_v30 }
 0x72d   :  { %v643_v52 = vmul.f32 %v5409_v50, %v5409_v50 }
 0x72e   :  { %v648_v53 = vsel %vm254_vm3, %v644_v51, 0.0  ;;  %4680 = vmatprep.subr.bf16.mxu0 %v5426_v56  ;;  %v5519_v51 = vpack.c.bf16 %v119_v47, %v118_v46  ;;  %v130_v47 = vld [vmem:[%s6136_s14] sm:$0xff] }
 0x72f   :  { %649 = vadd.xlane.f32.xlu0 %v648_v53  ;;  %v645_v54 = vsel %vm254_vm3, %v643_v52, 0.0  ;;  %4682 = vmatpush3.bf16.msra.mxu0 %v5426_v56  ;;  %v121_v52 = vld [vmem:[%s6133_s11 + $0x18] sm:$0xff] }
 0x730   :  { %646 = vadd.xlane.f32.xlu1 %v645_v54  ;;  %4684 = vmatprep.subr.bf16.mxu0 %v5435_v62  ;;  %v5525_v53 = vpack.c.bf16 %v121_v52, %v120_v49  ;;  %v131_v49 = vld [vmem:[%s6136_s14 + $0x8] sm:$0xff] }
 0x731   :  { %v5585_v52 = vpack.c.bf16 %v131_v49, %v130_v47 }
 0x733   :  { %4686 = vmatpush3.bf16.msra.mxu0 %v5435_v62 }
 0x734   :  { %4703 = vmatprep.subr.bf16.mxu0 %v5144_v0 }
 0x745   :  { %861 = vperm.xlu0 %4978, %v86_v29  }
 0x7bc   :  { %v650_v13 = vpop.xlane.xlu0 %649 }
 0x7bd   :  { %v652_v14 = vmul.f32 0.03125, %v650_v13  ;;  %v647_v15 = vpop.xlane.xlu1 %646 }
 0x7be   :  { %v651_v16 = vmul.f32 0.03125, %v647_v15 }
 0x7bf   :  { %v654_v18 = vadd.f32 1e-06, %v652_v14 }
 0x7c0   :  { %v653_v19 = vadd.f32 1e-06, %v651_v16 }
 0x7c1   :  { %5022 = vrsqrt.f32 %v654_v18 }
 0x7c2   :  { %5024 = vrsqrt.f32 %v653_v19 }
 0x7c4   :  { %v862_v27 = vpop.permute.xlu0 %861 }
 0x7c5   :  { %vm863_vm9 = vcmp.eq.s32.totalorder %v5305_v23, %v862_v27 }
 0x7c6   :  { %v3871_v31 = vsel %vm863_vm9, 1.0, %v5141_v25  ;;  %vm1959_vm9 = vcmask 7168  }
 0x7cb   :  { %v5023_v20 = vpop.eup %5022 }
 0x7cc   :  { %v5025_v22 = vpop.eup %5024  ;;  %v658_v26 = vmul.f32 %v5023_v20, %v5406_v48 }
 0x7cd   :  { %v657_v24 = vmul.f32 %v5025_v22, %v5409_v50 }
 0x7cf   :  { %4236 = vmatprep.mubr.msk.f32.mxu0 %vm254_vm3, %v657_v24 }
 0x7d0   :  { %4237 = vmatmul.mubr.msk.f32.vlgmr.msra.gmra.mrb[6].mxu0 %vm254_vm3, %v658_v26 }
 0x7d1   :  { %4705 = vmatpush3.bf16.msra.mxu0 %v5277_v10  ;;  %4274 = vmatprep.mubr.msk.f32.mxu0 %vm5145_vm8, %v5141_v25 }
 0x7d2   :  { %4706 = vmatprep.subr.bf16.mxu0 %v5144_v0 }
 0x7d5   :  { %4708 = vmatpush3.bf16.msra.mxu0 %v5279_v11 }
 0x7d6   :  { %4709 = vmatprep.subr.bf16.mxu0 %v5144_v0 }
 0x7d9   :  { %4711 = vmatpush3.bf16.msra.mxu0 %v5290_v17 }
 0x7da   :  { %4712 = vmatprep.subr.bf16.mxu0 %v5144_v0 }
 0x7dd   :  { %4714 = vmatpush3.bf16.msra.mxu0 %v5300_v21 }
 0x7de   :  { %4288 = vmatprep.subr.mxu0 %v5141_v25 }
 0x7e0   :  { %4275 = vmatmul.mubr.msk.f32.vlgmr.msra.gmra.mrb[8].mxu0 %vm170_vm0, %v3871_v31 }
 0x7e1   :  { %4290 = vmatprep.mubr.msk.f32.mxu0 %vm5145_vm8, %v5141_v25 }
 0x8a3   :  { %v4238_v36 = vpop.f32.mrb[6].mxu0 }
 0x8a4   :  { %v731_v37 = vpop.f32.mrb[7].mxu0  ;;  %v741_v41 = vmax.f32 %v4238_v36, 0.0  ;;  %v123_v36 = vld [vmem:[%s6134_s12 + $0x8] sm:$0xff] }
 0x8a5   :  { %v740_v39 = vmax.f32 %v731_v37, 0.0  ;;  %v124_v37 = vld [vmem:[%s6134_s12 + $0x10] sm:$0xff] }
 0x8a7   :  { %4255 = vmatprep.mubr.msk.f32.mxu1 %vm170_vm0, %v740_v39  ;;  %v5565_v39 = vpack.c.bf16 %v123_v36, %v122_v34  ;;  %v128_v34 = vld [vmem:[%s6135_s13 + $0x10] sm:$0xff]  ;;  %v129_v36 = vld [vmem:[%s6135_s13 + $0x18] sm:$0xff] }
 0x8a8   :  { %4256 = vmatmul.mubr.msk.f32.vlgmr.msra.gmra.mrb[4].mxu1 %vm170_vm0, %v741_v41 }
 0x8a9   :  { %4285 = vmatprep.mubr.msk.f32.mxu1 %vm5145_vm8, %v5141_v25  ;;  %4717 = vmatpush3.bf16.msra.mxu1 %v5519_v51 }
 0x8aa   :  { %4718 = vmatprep.subr.bf16.mxu1 %v5144_v0 }
 0x8ad   :  { %4720 = vmatpush3.bf16.msra.mxu1 %v5525_v53 }
 0x8ae   :  { %4721 = vmatprep.subr.bf16.mxu1 %v5144_v0 }
 0x8b3   :  { %v5505_v42 = vpop.f32.mrb[8].mxu0 }
 0x8b4   :  { %v4276_v43 = vpop.f32.mrb[9].mxu0  ;;  %v939_v44 = vmul.f32 %v5505_v42, %v5505_v42 }
 0x8b6   :  { %v940_v45 = vsel %vm254_vm3, %v939_v44, 0.0 }
 0x8b7   :  { %941 = vadd.xlane.f32.xlu0 %v940_v45 }
 0x944   :  { %v942_v54 = vpop.xlane.xlu0 %941 }
 0x945   :  { %v943_v29 = vmul.f32 0.03125, %v942_v54 }
 0x947   :  { %v944_v30 = vadd.f32 1e-06, %v943_v29 }
 0x949   :  { %5026 = vrsqrt.f32 %v944_v30 }
 0x953   :  { %v5027_v55 = vpop.eup %5026 }
 0x954   :  { %v946_v58 = vmul.f32 %v5027_v55, %v5505_v42 }
 0x956   :  { %4286 = vmatmul.mubr.msk.f32.vlgmr.msra.gmra.mrb[6].mxu1 %vm254_vm3, %v946_v58 }
 0x957   :  { %4306 = vmatprep.mubr.msk.f32.mxu1 %vm5145_vm8, %v5141_v25  ;;  %4723 = vmatpush3.bf16.msra.mxu1 %v5565_v39 }
 0x958   :  { %4724 = vmatprep.subr.bf16.mxu1 %v5144_v0 }
 0x97b   :  { %v4257_v59 = vpop.f32.mrb[4].mxu1 }
 0x97c   :  { %v814_v1 = vpop.f32.mrb[5].mxu1  ;;  %v5541_v8 = vadd.f32 %v4257_v59, %v5406_v48 }
 0x97d   :  { %v823_v27 = vadd.f32 %v814_v1, %v5409_v50  ;;  %v125_v50 = vld [vmem:[%s6134_s12 + $0x18] sm:$0xff]  ;;  %v132_v1 = vld [vmem:[%s6136_s14 + $0x10] sm:$0xff] }
 0x97e   :  { %v826_v18 = vmul.f32 %v5541_v8, %v5541_v8  ;;  %v5571_v41 = vpack.c.bf16 %v125_v50, %v124_v37  ;;  %v5633_v37 = vpack.c.bf16 %v129_v36, %v128_v34 }
 0x97f   :  { %v825_v31 = vmul.f32 %v823_v27, %v823_v27 }
 0x980   :  { %v830_v48 = vsel %vm254_vm3, %v826_v18, 0.0  ;;  %4726 = vmatpush3.bf16.msra.mxu1 %v5571_v41 }
 0x981   :  { %v827_v33 = vsel %vm254_vm3, %v825_v31, 0.0  ;;  %4734 = vmatprep.subr.bf16.mxu1 %v5585_v52  ;;  %v126_v31 = vld [vmem:[%s6135_s13] sm:$0xff] }
 0xa29   :  { %v1016_v2 = vpop.f32.mrb[6].mxu1 }
 0xa2a   :  { %1021 = vrot.lane.b32.xlu1 %v1016_v2, %s5142_s7  ;;  %v4287_v3 = vpop.f32.mrb[7].mxu1 }
 0xa9c   :  { %v1022_v6 = vpop.permute.xlu1 %1021 }
 0xa9d   :  { %4289 = vmatpush3.xpose.msk.msra.mxu0 %vm254_vm3, %v1022_v6 }
 0xa9e   :  { %4293 = vmatprep.subr.mxu0 %v5141_v25 }
 0xaa0   :  { %4291 = vmatmul.mubr.msk.f32.vlgmr.msra.gmra.mrb[10].mxu0 %vm254_vm3, %v1016_v2 }
 0xaa1   :  { %4295 = vmatprep.mubr.msk.f32.mxu0 %vm5145_vm8, %v5141_v25 }
 0xb73   :  { %v1093_v9 = vpop.f32.mrb[10].mxu0 }
 0xb74   :  { %v1097_v13 = vmul.f32 0.17677669, %v1093_v9  ;;  %v4292_v14 = vpop.f32.mrb[11].mxu0 }
 0xb76   :  { %v1098_v15 = vsel %vm155_vm10, %v1097_v13, -1e+09 }
 0xb77   :  { %v1100_v16 = vsel %vm1099_vm11, %v1098_v15, -inf }
 0xb78   :  { %1101 = vmax.xlane.f32.xlu1 %v1100_v16 }
 0xb7c   :  { %831 = vadd.xlane.f32.xlu1 %v830_v48 }
 0xc05   :  { %v1102_v19 = vpop.xlane.xlu1 %1101 }
 0xc06   :  { %v1103_v20 = vsub.f32 %v1098_v15, %v1102_v19 }
 0xc08   :  { %v1104_v22 = vmul.f32 1.442695, %v1103_v20 }
 0xc09   :  { %v832_v30 = vpop.xlane.xlu1 %831 }
 0xc0a   :  { %5028 = vpow2.f32 %v1104_v22  ;;  %v834_v58 = vmul.f32 0.03125, %v832_v30 }
 0xc0c   :  { %v836_v59 = vadd.f32 1e-06, %v834_v58 }
 0xc14   :  { %v5029_v24 = vpop.eup %5028 }
 0xc15   :  { %v1106_v26 = vsel %vm1099_vm11, %v5029_v24, 0.0 }
 0xc16   :  { %1107 = vadd.xlane.f32.xlu0 %v1106_v26 }
 0xc2c   :  { %1111 = vrot.lane.b32.xlu0 %v1016_v2, %s5143_s23  ;;  %v133_v2 = vld [vmem:[%s6136_s14 + $0x18] sm:$0xff]  ;;  %s5146_s14 = smov 1.0  }
 0xc2d   :  { %v5594_v6 = vpack.c.bf16 %v133_v2, %v132_v1 }
 0xc4b   :  { %828 = vadd.xlane.f32.xlu0 %v827_v33 }
 0xca3   :  { %v1108_v43 = vpop.xlane.xlu0 %1107 }
 0xca4   :  { %5030 = vrcp.f32 %v1108_v43 }
 0xca7   :  { %v1112_v44 = vpop.permute.xlu0 %1111 }
 0xca8   :  { %4294 = vmatpush3.msra.mxu0 %v1112_v44 }
 0xca9   :  { %4727 = vmatprep.subr.bf16.mxu0 %v5144_v0 }
 0xcae   :  { %v5031_v45 = vpop.eup %5030 }
 0xcaf   :  { %v1110_v46 = vmul.f32 %v5031_v45, %v5029_v24 }
 0xcb1   :  { %4296 = vmatmul.mubr.msk.f32.vlgmr.msra.gmra.mrb[12].mxu0 %vm1099_vm11, %v1110_v46 }
 0xcb2   :  { %4317 = vmatprep.mubr.msk.f32.mxu0 %vm5145_vm8, %v5141_v25 }
 0xcd8   :  { %v829_v54 = vpop.xlane.xlu0 %828 }
 0xcd9   :  { %v833_v29 = vmul.f32 0.03125, %v829_v54 }
 0xcdb   :  { %v835_v55 = vadd.f32 1e-06, %v833_v29 }
 0xcdd   :  { %5032 = vrsqrt.f32 %v835_v55 }
 0xcde   :  { %5034 = vrsqrt.f32 %v836_v59 }
 0xce7   :  { %v5033_v3 = vpop.eup %5032 }
 0xce8   :  { %v5596_v13 = vmul.f32 %v5033_v3, %v823_v27  ;;  %v5035_v15 = vpop.eup %5034 }
 0xce9   :  { %v5605_v16 = vmul.f32 %v5035_v15, %v5541_v8  ;;  %v136_v15 = vld [vmem:[%s6137_s15 + $0x10] sm:$0xff] }
 0xd84   :  { %v1183_v9 = vpop.f32.mrb[12].mxu0 }
 0xd85   :  { %v4297_v14 = vpop.f32.mrb[13].mxu0  ;;  %4307 = vmatmul.mubr.msk.f32.vlgmr.msra.gmra.mrb[8].mxu1 %vm254_vm3, %v1183_v9 }
 0xd86   :  { %4736 = vmatpush3.bf16.msra.mxu1 %v5585_v52  ;;  %4328 = vmatprep.mubr.msk.f32.mxu1 %vm254_vm3, %v5596_v13  ;;  %v134_v14 = vld [vmem:[%s6137_s15] sm:$0xff] }
 0xd87   :  { %4738 = vmatprep.subr.bf16.mxu1 %v5594_v6 }
 0xd8a   :  { %4740 = vmatpush3.bf16.msra.mxu1 %v5594_v6 }
 0xd8b   :  { %4745 = vmatprep.subr.bf16.mxu1 %v5144_v0 }
 0xd8d   :  { %4329 = vmatmul.mubr.msk.f32.vlgmr.msra.gmra.mrb[10].mxu1 %vm254_vm3, %v5605_v16 }
 0xd8e   :  { %4342 = vmatprep.mubr.msk.f32.mxu1 %vm5145_vm8, %v5141_v25 }
 0xe58   :  { %v1256_v18 = vpop.f32.mrb[8].mxu1 }
 0xe59   :  { %v5613_v48 = vadd.f32 %v1256_v18, %v5505_v42  ;;  %v4308_v19 = vpop.f32.mrb[9].mxu1  ;;  %v127_v42 = vld [vmem:[%s6135_s13 + $0x8] sm:$0xff]  ;;  %v5662_v18 = vpack.c.bf16 %v135_v63, %v134_v14 }
 0xe5a   :  { %v5624_v33 = vpack.c.bf16 %v127_v42, %v126_v31  ;;  %v137_v19 = vld [vmem:[%s6137_s15 + $0x18] sm:$0xff] }
 0xe5b   :  { %v1261_v20 = vmul.f32 %v5613_v48, %v5613_v48 }
 0xe5c   :  { %4729 = vmatpush3.bf16.msra.mxu0 %v5624_v33 }
 0xe5d   :  { %v1262_v22 = vsel %vm254_vm3, %v1261_v20, 0.0  ;;  %4730 = vmatprep.subr.bf16.mxu0 %v5144_v0  ;;  %v5668_v20 = vpack.c.bf16 %v137_v19, %v136_v15  ;;  %v144_v15 = vld [vmem:[%s6139_s17 + $0x10] sm:$0xff]  ;;  %v145_v19 = vld [vmem:[%s6139_s17 + $0x18] sm:$0xff] }
 0xe5e   :  { %1263 = vadd.xlane.f32.xlu1 %v1262_v22 }
 0xe60   :  { %v4330_v8 = vpop.f32.mrb[10].mxu1  ;;  %4732 = vmatpush3.bf16.msra.mxu0 %v5633_v37 }
 0xe61   :  { %v1414_v24 = vpop.f32.mrb[11].mxu1  ;;  %4741 = vmatprep.subr.bf16.mxu0 %v5144_v0 }
 0xe62   :  { %v4989_v26 = vpack.i.bf16 %v4330_v8, %v1414_v24  ;;  %v4742_v27 = vpack.c.bf16 %v4330_v8, %v1414_v24 }
 0xeeb   :  { %v1264_v50 = vpop.xlane.xlu1 %1263 }
 0xeec   :  { %v1265_v43 = vmul.f32 0.03125, %v1264_v50 }
 0xeee   :  { %v1266_v44 = vadd.f32 1e-06, %v1265_v43 }
 0xef0   :  { %5036 = vrsqrt.f32 %v1266_v44 }
 0xefa   :  { %v5037_v45 = vpop.eup %5036 }
 0xefb   :  { %v1268_v46 = vmul.f32 %v5037_v45, %v5613_v48 }
 0xefd   :  { %4318 = vmatmul.mubr.msk.f32.vlgmr.msra.gmra.mrb[14].mxu0 %vm254_vm3, %v1268_v46 }
 0xefe   :  { %4744 = vmatpush3.bf16.xpose.msk.msra.mxu0 %vm5351_vm4, %v4742_v27  ;;  %4335 = vmatprep.mubr.msk.f32.mxu0 %vm5145_vm8, %v5141_v25 }
 0xeff   :  { %4748 = vmatprep.subr.bf16.mxu0 %v5144_v0 }
 0xfd0   :  { %v1338_v47 = vpop.f32.mrb[14].mxu0 }
 0xfd1   :  { %v4319_v49 = vpop.f32.mrb[15].mxu0  ;;  %4336 = vmatmul.mubr.msk.f32.vlgmr.msra.gmra.mrb[16].mxu0 %vm254_vm3, %v1338_v47  ;;  %v69_v47 = vld [vmem:[%s6153_s2 + $0x18] sm:$0xff] }
 0xfd2   :  { %4353 = vmatprep.mubr.msk.f32.mxu0 %vm5145_vm8, %v5141_v25  ;;  %4750 = vmatpush3.bf16.msra.mxu0 %v5662_v18  ;;  %v3850_v49 = vmax.f32 %v69_v47, 0.0 }
 0xfd3   :  { %4751 = vmatprep.subr.bf16.mxu0 %v5144_v0 }
 0xfd6   :  { %4753 = vmatpush3.bf16.msra.mxu0 %v5668_v20 }
 0xfd7   :  { %4760 = vmatprep.subr.bf16.mxu0 %v5144_v0 }
0x10a4   :  { %v1498_v54 = vpop.f32.mrb[16].mxu0 }
0x10a5   :  { %v1502_v29 = vmul.f32 0.17677669, %v1498_v54  ;;  %v4337_v30 = vpop.f32.mrb[17].mxu0  ;;  %v3851_v54 = vmin.f32 %v3850_v49, 63.0 }
0x10a6   :  { %v139_v30 = vld [vmem:[%s6138_s16 + $0x8] sm:$0xff] }
0x10a7   :  { %v1503_v55 = vsel %vm447_vm6, %v1502_v29, -1e+09  ;;  %v4950_v29 = vcvt.f32.s32 %v3851_v54 }
0x10a8   :  { %v1504_v58 = vsel %vm450_vm7, %v1503_v55, -inf }
0x10a9   :  { %1505 = vmax.xlane.f32.xlu1 %v1504_v58  ;;  %v140_v58 = vld [vmem:[%s6138_s16 + $0x10] sm:$0xff] }
0x1136   :  { %v1506_v59 = vpop.xlane.xlu1 %1505 }
0x1137   :  { %v1507_v1 = vsub.f32 %v1503_v55, %v1506_v59  ;;  %v141_v59 = vld [vmem:[%s6138_s16 + $0x18] sm:$0xff] }
0x1139   :  { %v1508_v2 = vmul.f32 1.442695, %v1507_v1  ;;  %v5704_v1 = vpack.c.bf16 %v141_v59, %v140_v58 }
0x113b   :  { %5038 = vpow2.f32 %v1508_v2  ;;  %v68_v2 = vld [vmem:[%s6153_s2 + $0x10] sm:$0xff] }
0x113c   :  { %v3847_v14 = vmax.f32 %v68_v2, 0.0 }
0x1145   :  { %v5039_v3 = vpop.eup %5038 }
0x1146   :  { %v1510_v9 = vsel %vm450_vm7, %v5039_v3, 0.0 }
0x1147   :  { %1511 = vadd.xlane.f32.xlu1 %v1510_v9  ;;  %v143_v9 = vld [vmem:[%s6139_s17 + $0x8] sm:$0xff] }
0x1158   :  { %4990 = vrot.lane.b32.xlu1 %v4989_v26, %s5142_s7 }
0x11d4   :  { %v1512_v22 = vpop.xlane.xlu1 %1511 }
0x11d5   :  { %5040 = vrcp.f32 %v1512_v22  ;;  %v3848_v22 = vmin.f32 %v3847_v14, 63.0 }
0x11d8   :  { %v4991_v8 = vpop.permute.xlu1 %4990 }
0x11d9   :  { %v4993_v24 = vunpack.i.h.bf16 %v4991_v8  ;;  %v4992_v26 = vunpack.i.l.bf16 %v4991_v8  ;;  %v5727_v8 = vpack.c.bf16 %v145_v19, %v144_v15 }
0x11db   :  { %v4746_v27 = vpack.c.bf16 %v4993_v24, %v4992_v26  ;;  %v146_v24 = vld [vmem:[%s6139_s17 + $0x20] sm:$0xff]  ;;  %v147_v26 = vld [vmem:[%s6139_s17 + $0x28] sm:$0xff] }
0x11dd   :  { %4747 = vmatpush3.bf16.msra.mxu1 %v4746_v27  ;;  %v4947_v27 = vcvt.f32.s32 %v3848_v22 }
0x11de   :  { %4754 = vmatprep.subr.bf16.mxu1 %v5144_v0 }
0x11df   :  { %v5041_v31 = vpop.eup %5040  ;;  %1992 = vperm.xlu1 %4994, %v4947_v27  }
0x11e0   :  { %v1514_v42 = vmul.f32 %v5041_v31, %v5039_v3  ;;  %v142_v3 = vld [vmem:[%s6139_s17] sm:$0xff]  ;;  %v5737_v31 = vpack.c.bf16 %v147_v26, %v146_v24 }
0x11e1   :  { %v5718_v63 = vpack.c.bf16 %v143_v9, %v142_v3 }
0x11e2   :  { %4343 = vmatmul.mubr.msk.f32.vlgmr.msra.gmra.mrb[12].mxu1 %vm450_vm7, %v1514_v42  ;;  %v148_v42 = vld [vmem:[%s6139_s17 + $0x30] sm:$0xff] }
0x11e3   :  { %4364 = vmatprep.mubr.msk.f32.mxu1 %vm5145_vm8, %v5141_v25 }
0x125e   :  { %v1993_v49 = vpop.permute.xlu1 %1992 }
0x125f   :  { %vm1997_vm12 = vcmp.eq.s32.totalorder %v5305_v23, %v1993_v49 }
0x12b5   :  { %v1590_v34 = vpop.f32.mrb[12].mxu1 }
0x12b6   :  { %v4344_v36 = vpop.f32.mrb[13].mxu1  ;;  %4354 = vmatmul.mubr.msk.f32.vlgmr.msra.gmra.mrb[18].mxu0 %vm254_vm3, %v1590_v34  ;;  %v149_v34 = vld [vmem:[%s6139_s17 + $0x38] sm:$0xff] }
0x12b7   :  { %4383 = vmatprep.mubr.msk.f32.mxu0 %vm5145_vm8, %v5141_v25  ;;  %4762 = vmatpush3.bf16.msra.mxu0 %v5718_v63  ;;  %v5747_v36 = vpack.c.bf16 %v149_v34, %v148_v42 }
0x12b8   :  { %4763 = vmatprep.subr.bf16.mxu0 %v5144_v0 }
0x12bb   :  { %4765 = vmatpush3.bf16.msra.mxu0 %v5727_v8 }
0x12bc   :  { %4766 = vmatprep.subr.bf16.mxu0 %v5144_v0 }
0x12bf   :  { %4768 = vmatpush3.bf16.msra.mxu0 %v5737_v31 }
0x12c0   :  { %4769 = vmatprep.subr.bf16.mxu0 %v5144_v0 }
0x12c3   :  { %4771 = vmatpush3.bf16.msra.mxu0 %v5747_v36 }
0x12c4   :  { %4789 = vmatprep.subr.bf16.mxu0 %v5277_v10 }
0x1389   :  { %v1663_v50 = vpop.f32.mrb[18].mxu0 }
0x138a   :  { %v5681_v43 = vadd.f32 %v1663_v50, %v5613_v48  ;;  %v4355_v44 = vpop.f32.mrb[19].mxu0  ;;  %v138_v48 = vld [vmem:[%s6138_s16] sm:$0xff] }
0x138b   :  { %v5695_v55 = vpack.c.bf16 %v139_v30, %v138_v48  ;;  %v3899_v30 = vsel %vm1997_vm12, 1.0, %v5141_v25 }
0x138c   :  { %v1668_v45 = vmul.f32 %v5681_v43, %v5681_v43 }
0x138d   :  { %4756 = vmatpush3.bf16.msra.mxu1 %v5695_v55 }
0x138e   :  { %v1669_v46 = vsel %vm254_vm3, %v1668_v45, 0.0  ;;  %4757 = vmatprep.subr.bf16.mxu1 %v5144_v0 }
0x138f   :  { %1670 = vadd.xlane.f32.xlu0 %v1669_v46 }
0x1391   :  { %4759 = vmatpush3.bf16.msra.mxu1 %v5704_v1 }
0x1392   :  { %4772 = vmatprep.subr.bf16.mxu1 %v5144_v0 }
0x13a5   :  { %1995 = vperm.xlu0 %4978, %v4950_v29  }
0x141c   :  { %v1671_v50 = vpop.xlane.xlu0 %1670 }
0x141d   :  { %v1672_v44 = vmul.f32 0.03125, %v1671_v50 }
0x141f   :  { %v1673_v45 = vadd.f32 1e-06, %v1672_v44 }
0x1421   :  { %5042 = vrsqrt.f32 %v1673_v45 }
0x1424   :  { %v1996_v58 = vpop.permute.xlu0 %1995 }
0x1425   :  { %vm1998_vm13 = vcmp.eq.s32.totalorder %v5305_v23, %v1996_v58 }
0x1426   :  { %v3900_v59 = vsel %vm1998_vm13, 1.0, %v5141_v25 }
0x142b   :  { %v5043_v46 = vpop.eup %5042 }
0x142c   :  { %v1675_v47 = vmul.f32 %v5043_v46, %v5681_v43 }
0x142e   :  { %4365 = vmatmul.mubr.msk.f32.vlgmr.msra.gmra.mrb[14].mxu1 %vm254_vm3, %v1675_v47 }
0x142f   :  { %4775 = vmatpush3.bf16.xpose.msk.msra.mxu1 %vm5351_vm4, %v5277_v10  ;;  %4402 = vmatprep.mubr.msk.f32.mxu1 %vm5145_vm8, %v5141_v25 }
0x1430   :  { %4776 = vmatprep.subr.bf16.mxu1 %v5144_v0 }
0x1437   :  { %4779 = vmatpush3.bf16.xpose.msk.msra.mxu1 %vm5351_vm4, %v5279_v11 }
0x1438   :  { %4780 = vmatprep.subr.bf16.mxu1 %v5144_v0 }
0x143f   :  { %4783 = vmatpush3.bf16.xpose.msk.msra.mxu1 %vm5351_vm4, %v5290_v17 }
0x1440   :  { %4784 = vmatprep.subr.bf16.mxu1 %v5144_v0 }
0x1447   :  { %4787 = vmatpush3.bf16.xpose.msk.msra.mxu1 %vm5351_vm4, %v5300_v21 }
0x1501   :  { %v1745_v54 = vpop.f32.mrb[14].mxu1 }
0x1502   :  { %v1749_v29 = vmax.f32 %v1745_v54, 0.0  ;;  %v4366_v48 = vpop.f32.mrb[15].mxu1 }
0x1504   :  { %4384 = vmatmul.mubr.msk.f32.vlgmr.msra.gmra.mrb[20].mxu0 %vm170_vm0, %v1749_v29 }
0x1505   :  { %4791 = vmatpush3.bf16.msra.mxu0 %v5277_v10  ;;  %4421 = vmatprep.mubr.msk.f32.mxu0 %vm170_vm0, %v3899_v30 }
0x1506   :  { %4793 = vmatprep.subr.bf16.mxu0 %v5279_v11 }
0x1509   :  { %4795 = vmatpush3.bf16.msra.mxu0 %v5279_v11 }
0x150a   :  { %4797 = vmatprep.subr.bf16.mxu0 %v5290_v17 }
0x150d   :  { %4799 = vmatpush3.bf16.msra.mxu0 %v5290_v17 }
0x150e   :  { %4801 = vmatprep.subr.bf16.mxu0 %v5300_v21 }
0x1511   :  { %4803 = vmatpush3.bf16.msra.mxu0 %v5300_v21 }
0x1512   :  { %4805 = vmatprep.subr.bf16.mxu0 %v5332_v38 }
0x1514   :  { %4422 = vmatmul.mubr.msk.f32.vlgmr.msra.gmra.mrb[22].mxu0 %vm170_vm0, %v3900_v59 }
0x1515   :  { %4807 = vmatpush3.bf16.msra.mxu0 %v5332_v38 }
0x1516   :  { %4809 = vmatprep.subr.bf16.mxu0 %v5337_v40 }
0x1519   :  { %4811 = vmatpush3.bf16.msra.mxu0 %v5337_v40 }
0x15d7   :  { %v1819_v2 = vpop.f32.mrb[20].mxu0 }
0x15d8   :  { %v4385_v3 = vpop.f32.mrb[21].mxu0  ;;  %v1823_v9 = vadd.f32 %v1819_v2, %v5681_v43 }
0x15da   :  { %v1824_v40 = vmul.f32 %v1823_v9, %v1823_v9 }
0x15dc   :  { %v1825_v26 = vsel %vm254_vm3, %v1824_v40, 0.0 }
0x15e7   :  { %v5790_v14 = vpop.f32.mrb[22].mxu0 }
0x15e8   :  { %v5792_v15 = vpop.f32.mrb[23].mxu0  ;;  %v2085_v19 = vmul.f32 %v5790_v14, %v5790_v14 }
0x15e9   :  { %v2084_v22 = vmul.f32 %v5792_v15, %v5792_v15 }
0x15ea   :  { %v2089_v38 = vsel %vm254_vm3, %v2085_v19, 0.0 }
0x15eb   :  { %2090 = vadd.xlane.f32.xlu0 %v2089_v38  ;;  %v2086_v24 = vsel %vm254_vm3, %v2084_v22, 0.0 }
0x15ec   :  { %2087 = vadd.xlane.f32.xlu1 %v2086_v24 }
0x15f0   :  { %1826 = vadd.xlane.f32.xlu1 %v1825_v26 }
0x1678   :  { %v2091_v43 = vpop.xlane.xlu0 %2090 }
0x1679   :  { %v2093_v27 = vmul.f32 0.03125, %v2091_v43  ;;  %v2088_v42 = vpop.xlane.xlu1 %2087 }
0x167a   :  { %v2092_v34 = vmul.f32 0.03125, %v2088_v42 }
0x167b   :  { %v2095_v50 = vadd.f32 1e-06, %v2093_v27 }
0x167c   :  { %v2094_v44 = vadd.f32 1e-06, %v2092_v34 }
0x167d   :  { %5044 = vrsqrt.f32 %v2095_v50  ;;  %v1827_v45 = vpop.xlane.xlu1 %1826 }
0x167e   :  { %5046 = vrsqrt.f32 %v2094_v44  ;;  %v1828_v46 = vmul.f32 0.03125, %v1827_v45 }
0x1680   :  { %v1829_v47 = vadd.f32 1e-06, %v1828_v46 }
0x1682   :  { %5048 = vrsqrt.f32 %v1829_v47 }
0x1687   :  { %v5045_v49 = vpop.eup %5044 }
0x1688   :  { %v5047_v54 = vpop.eup %5046  ;;  %v2099_v48 = vmul.f32 %v5045_v49, %v5790_v14 }
0x1689   :  { %v2098_v29 = vmul.f32 %v5047_v54, %v5792_v15 }
0x168b   :  { %4432 = vmatprep.mubr.msk.f32.mxu0 %vm254_vm3, %v2098_v29 }
0x168c   :  { %v5049_v30 = vpop.eup %5048  ;;  %4433 = vmatmul.mubr.msk.f32.vlgmr.msra.gmra.mrb[24].mxu0 %vm254_vm3, %v2099_v48 }
0x168d   :  { %v1831_v58 = vmul.f32 %v5049_v30, %v1823_v9  ;;  %v1989_v9 = vld [vmem:[%s6156_s22 + $0x1] sm:$0x1] }
0x168e   :  { %vm1990_vm14 = vcmp.ne.f32.partialorder %v1989_v9, 0.0 }
0x168f   :  { %4403 = vmatmul.mubr.msk.f32.vlgmr.msra.gmra.mrb[16].mxu1 %vm254_vm3, %v1831_v58  ;;  %v2272_v43 = vsel %vm1990_vm14, 1, %v5140_v4 }
0x1690   :  { %v5826_v27 = vrot.slane %v2272_v43, %v445_v61 }
0x1692   :  { %vm2277_vm15 = vcmp.eq.s32.totalorder %v5826_v27, 1 }
0x175f   :  { %v4434_v59 = vpop.f32.mrb[24].mxu0 }
0x1760   :  { %v2172_v2 = vpop.f32.mrb[25].mxu0 }
0x1761   :  { %v5000_v3 = vpack.i.bf16 %v4434_v59, %v2172_v2  ;;  %4439 = vmatprep.mubr.msk.f32.mxu1 %vm254_vm3, %v2172_v2 }
0x1762   :  { %v5807_v19 = vpop.f32.mrb[16].mxu1 }
0x1763   :  { %4996 = vrot.lane.b32.xlu1 %v5000_v3, %s5142_s7  ;;  %v4404_v22 = vpop.f32.mrb[17].mxu1 }
0x17d5   :  { %v4997_v38 = vpop.permute.xlu1 %4996 }
0x17d6   :  { %v4999_v24 = vunpack.i.h.bf16 %v4997_v38  ;;  %v4998_v40 = vunpack.i.l.bf16 %v4997_v38 }
0x17d8   :  { %v4812_v26 = vpack.c.bf16 %v4999_v24, %v4998_v40 }
0x17da   :  { %4814 = vmatprep.subr.msk.bf16.mxu1 %vm5351_vm4, %v4812_v26 }
0x17db   :  { %4817 = vmatpush3.bf16.xpose.msk.msra.mxu1 %vm5351_vm4, %v4812_v26 }
0x17dc   :  { %4823 = vmatprep.subr.bf16.mxu1 %v5390_v28 }
0x17e2   :  { %4440 = vmatmul.mubr.msk.f32.vlgmr.msra.gmra.mrb[18].mxu1 %vm254_vm3, %v4434_v59 }
0x17e3   :  { %4825 = vmatpush3.bf16.msra.mxu1 %v5390_v28 }
0x17e4   :  { %4827 = vmatprep.subr.bf16.mxu1 %v5395_v32 }
0x17e7   :  { %4829 = vmatpush3.bf16.msra.mxu1 %v5395_v32 }
0x17e8   :  { %4839 = vmatprep.subr.bf16.mxu1 %v5450_v5 }
0x18b5   :  { %v4441_v42 = vpop.f32.mrb[18].mxu1 }
0x18b6   :  { %v2261_v34 = vpop.f32.mrb[19].mxu1  ;;  %v2271_v28 = vmul.f32 0.17677669, %v4441_v42 }
0x18b7   :  { %v2270_v50 = vmul.f32 0.17677669, %v2261_v34 }
0x18b8   :  { %v2279_v45 = vsel %vm2277_vm15, %v2271_v28, -1e+09 }
0x18b9   :  { %v2278_v32 = vsel %vm2277_vm15, %v2270_v50, -1e+09  ;;  %v2283_v4 = vsel %vm450_vm7, %v2279_v45, -inf }
0x18ba   :  { %v2280_v44 = vsel %vm450_vm7, %v2278_v32, -inf }
0x18bb   :  { %2281 = vmax.xlane.f32.xlu0 %v2280_v44 }
0x18bf   :  { %2284 = vmax.xlane.f32.xlu0 %v2283_v4 }
0x1948   :  { %v2282_v61 = vpop.xlane.xlu0 %2281 }
0x1949   :  { %v2286_v46 = vsub.f32 %v2278_v32, %v2282_v61 }
0x194b   :  { %v2288_v47 = vmul.f32 1.442695, %v2286_v46 }
0x194c   :  { %v2285_v49 = vpop.xlane.xlu0 %2284 }
0x194d   :  { %5050 = vpow2.f32 %v2288_v47  ;;  %v2287_v54 = vsub.f32 %v2279_v45, %v2285_v49 }
0x194f   :  { %v2290_v29 = vmul.f32 1.442695, %v2287_v54 }
0x1951   :  { %5052 = vpow2.f32 %v2290_v29 }
0x1957   :  { %v5051_v48 = vpop.eup %5050 }
0x1958   :  { %v2292_v30 = vsel %vm450_vm7, %v5051_v48, 0.0 }
0x1959   :  { %2293 = vadd.xlane.f32.xlu1 %v2292_v30 }
0x195b   :  { %v5053_v58 = vpop.eup %5052 }
0x195c   :  { %v2295_v59 = vsel %vm450_vm7, %v5053_v58, 0.0 }
0x195d   :  { %2296 = vadd.xlane.f32.xlu0 %v2295_v59 }
0x1973   :  { %5001 = vrot.lane.b32.xlu0 %v5000_v3, %s5143_s23 }
0x19e6   :  { %v2294_v2 = vpop.xlane.xlu1 %2293 }
0x19e7   :  { %5054 = vrcp.f32 %v2294_v2 }
0x19ea   :  { %v2297_v22 = vpop.xlane.xlu0 %2296 }
0x19eb   :  { %5056 = vrcp.f32 %v2297_v22 }
0x19ee   :  { %v5002_v38 = vpop.permute.xlu0 %5001 }
0x19ef   :  { %v5004_v24 = vunpack.i.h.bf16 %v5002_v38  ;;  %v5003_v40 = vunpack.i.l.bf16 %v5002_v38 }
0x19f1   :  { %v5055_v26 = vpop.eup %5054  ;;  %v4818_v9 = vpack.c.bf16 %v5004_v24, %v5003_v40 }
0x19f2   :  { %v2300_v43 = vmul.f32 %v5055_v26, %v5051_v48 }
0x19f3   :  { %4819 = vmatprep.subr.bf16.mxu0 %v4818_v9 }
0x19f4   :  { %4821 = vmatpush3.bf16.msra.mxu0 %v4818_v9  ;;  %4446 = vmatprep.mubr.msk.f32.mxu0 %vm450_vm7, %v2300_v43 }
0x19f5   :  { %v5057_v42 = vpop.eup %5056  ;;  %4831 = vmatprep.subr.bf16.mxu0 %v5426_v56 }
0x19f6   :  { %v2301_v34 = vmul.f32 %v5057_v42, %v5053_v58 }
0x19f8   :  { %4447 = vmatmul.mubr.msk.f32.vlgmr.msra.gmra.mrb[26].mxu0 %vm450_vm7, %v2301_v34 }
0x19f9   :  { %4833 = vmatpush3.bf16.msra.mxu0 %v5426_v56 }
0x19fa   :  { %4835 = vmatprep.subr.bf16.mxu0 %v5435_v62 }
0x19fd   :  { %4837 = vmatpush3.bf16.msra.mxu0 %v5435_v62 }
0x19fe   :  { %4854 = vmatprep.subr.bf16.mxu0 %v5144_v0 }
0x1acb   :  { %v4448_v3 = vpop.f32.mrb[26].mxu0 }
0x1acc   :  { %v2380_v28 = vpop.f32.mrb[27].mxu0 }
0x1acd   :  { %4457 = vmatprep.mubr.msk.f32.mxu1 %vm254_vm3, %v2380_v28 }
0x1ace   :  { %4458 = vmatmul.mubr.msk.f32.vlgmr.msra.gmra.mrb[20].mxu1 %vm254_vm3, %v4448_v3 }
0x1acf   :  { %4841 = vmatpush3.bf16.msra.mxu1 %v5450_v5 }
0x1ad0   :  { %4843 = vmatprep.subr.bf16.mxu1 %v5455_v7 }
0x1ad3   :  { %4845 = vmatpush3.bf16.msra.mxu1 %v5455_v7 }
0x1ad4   :  { %4847 = vmatprep.subr.bf16.mxu1 %v5466_v12 }
0x1ad7   :  { %4849 = vmatpush3.bf16.msra.mxu1 %v5466_v12 }
0x1ad8   :  { %4851 = vmatprep.subr.bf16.mxu1 %v5496_v35 }
0x1adb   :  { %4853 = vmatpush3.bf16.msra.mxu1 %v5496_v35 }
0x1adc   :  { %4866 = vmatprep.subr.bf16.mxu1 %v5144_v0 }
0x1ba1   :  { %v4459_v56 = vpop.f32.mrb[20].mxu1 }
0x1ba2   :  { %v5856_v62 = vadd.f32 %v4459_v56, %v5790_v14  ;;  %v2461_v50 = vpop.f32.mrb[21].mxu1  ;;  %v87_v14 = vld [vmem:[%s6157_s29 + $0x8] sm:$0xff]  ;;  %s6158_s29 = sld [smem:[#allocation12_spill]] }
0x1ba3   :  { %v5859_v5 = vadd.f32 %v2461_v50, %v5792_v15 }
0x1ba4   :  { %v2473_v7 = vmul.f32 %v5856_v62, %v5856_v62 }
0x1ba5   :  { %v2472_v12 = vmul.f32 %v5859_v5, %v5859_v5 }
0x1ba6   :  { %v2477_v32 = vsel %vm254_vm3, %v2473_v7, 0.0 }
0x1ba7   :  { %2478 = vadd.xlane.f32.xlu1 %v2477_v32  ;;  %v2474_v35 = vsel %vm254_vm3, %v2472_v12, 0.0 }
0x1ba8   :  { %2475 = vadd.xlane.f32.xlu0 %v2474_v35 }
0x1bb8   :  { %2690 = vperm.xlu1 %4994, %v87_v14  }
0x1c34   :  { %v2479_v44 = vpop.xlane.xlu1 %2478 }
0x1c35   :  { %v2481_v15 = vmul.f32 0.03125, %v2479_v44  ;;  %v2476_v45 = vpop.xlane.xlu0 %2475 }
0x1c36   :  { %v2480_v4 = vmul.f32 0.03125, %v2476_v45 }
0x1c37   :  { %v2483_v61 = vadd.f32 1e-06, %v2481_v15 }
0x1c38   :  { %v2482_v46 = vadd.f32 1e-06, %v2480_v4  ;;  %v2691_v48 = vpop.permute.xlu1 %2690 }
0x1c39   :  { %5058 = vrsqrt.f32 %v2483_v61  ;;  %vm2692_vm1 = vcmp.eq.s32.totalorder %v5305_v23, %v2691_v48 }
0x1c3a   :  { %5060 = vrsqrt.f32 %v2482_v46  ;;  %v3917_v30 = vsel %vm2692_vm1, 1.0, %v5141_v25 }
0x1c43   :  { %v5059_v47 = vpop.eup %5058 }
0x1c44   :  { %v5061_v49 = vpop.eup %5060  ;;  %v2487_v29 = vmul.f32 %v5059_v47, %v5856_v62 }
0x1c45   :  { %v2486_v54 = vmul.f32 %v5061_v49, %v5859_v5 }
0x1c47   :  { %4468 = vmatprep.mubr.msk.f32.mxu0 %vm254_vm3, %v2486_v54 }
0x1c48   :  { %4469 = vmatmul.mubr.msk.f32.vlgmr.msra.gmra.mrb[28].mxu0 %vm254_vm3, %v2487_v29 }
0x1c49   :  { %4856 = vmatpush3.bf16.msra.mxu0 %v5277_v10  ;;  %4506 = vmatprep.mubr.msk.f32.mxu0 %vm5145_vm8, %v5141_v25 }
0x1c4a   :  { %4857 = vmatprep.subr.bf16.mxu0 %v5144_v0 }
0x1c4d   :  { %4859 = vmatpush3.bf16.msra.mxu0 %v5279_v11 }
0x1c4e   :  { %4860 = vmatprep.subr.bf16.mxu0 %v5144_v0 }
0x1c51   :  { %4862 = vmatpush3.bf16.msra.mxu0 %v5290_v17 }
0x1c52   :  { %4863 = vmatprep.subr.bf16.mxu0 %v5144_v0 }
0x1c55   :  { %4865 = vmatpush3.bf16.msra.mxu0 %v5300_v21 }
0x1c56   :  { %4520 = vmatprep.subr.mxu0 %v5141_v25 }
0x1c58   :  { %4507 = vmatmul.mubr.msk.f32.vlgmr.msra.gmra.mrb[30].mxu0 %vm170_vm0, %v3917_v30 }
0x1c59   :  { %4522 = vmatprep.mubr.msk.f32.mxu0 %vm5145_vm8, %v5141_v25 }
0x1d1b   :  { %v4470_v58 = vpop.f32.mrb[28].mxu0 }
0x1d1c   :  { %v2560_v59 = vpop.f32.mrb[29].mxu0  ;;  %v2570_v22 = vmax.f32 %v4470_v58, 0.0 }
0x1d1d   :  { %v2569_v2 = vmax.f32 %v2560_v59, 0.0 }
0x1d1f   :  { %4487 = vmatprep.mubr.msk.f32.mxu1 %vm170_vm0, %v2569_v2 }
0x1d20   :  { %4488 = vmatmul.mubr.msk.f32.vlgmr.msra.gmra.mrb[22].mxu1 %vm170_vm0, %v2570_v22 }
0x1d21   :  { %4868 = vmatpush3.bf16.msra.mxu1 %v5519_v51  ;;  %4517 = vmatprep.mubr.msk.f32.mxu1 %vm5145_vm8, %v5141_v25 }
0x1d22   :  { %4869 = vmatprep.subr.bf16.mxu1 %v5144_v0 }
0x1d25   :  { %4871 = vmatpush3.bf16.msra.mxu1 %v5525_v53 }
0x1d26   :  { %4872 = vmatprep.subr.bf16.mxu1 %v5144_v0 }
0x1d2b   :  { %v5897_v38 = vpop.f32.mrb[30].mxu0 }
0x1d2c   :  { %v4508_v24 = vpop.f32.mrb[31].mxu0  ;;  %v2768_v40 = vmul.f32 %v5897_v38, %v5897_v38 }
0x1d2e   :  { %v2769_v26 = vsel %vm254_vm3, %v2768_v40, 0.0 }
0x1d2f   :  { %2770 = vadd.xlane.f32.xlu1 %v2769_v26 }
0x1dbc   :  { %v2771_v9 = vpop.xlane.xlu1 %2770 }
0x1dbd   :  { %v2772_v51 = vmul.f32 0.03125, %v2771_v9 }
0x1dbf   :  { %v2773_v43 = vadd.f32 1e-06, %v2772_v51 }
0x1dc1   :  { %5062 = vrsqrt.f32 %v2773_v43 }
0x1dcb   :  { %v5063_v42 = vpop.eup %5062 }
0x1dcc   :  { %v2775_v34 = vmul.f32 %v5063_v42, %v5897_v38 }
0x1dce   :  { %4518 = vmatmul.mubr.msk.f32.vlgmr.msra.gmra.mrb[24].mxu1 %vm254_vm3, %v2775_v34 }
0x1dcf   :  { %4874 = vmatpush3.bf16.msra.mxu1 %v5565_v39  ;;  %4538 = vmatprep.mubr.msk.f32.mxu1 %vm5145_vm8, %v5141_v25 }
0x1dd0   :  { %4875 = vmatprep.subr.bf16.mxu1 %v5144_v0 }
0x1dd3   :  { %4877 = vmatpush3.bf16.msra.mxu1 %v5571_v41 }
0x1dd4   :  { %4885 = vmatprep.subr.bf16.mxu1 %v5585_v52 }
0x1df3   :  { %v4489_v53 = vpop.f32.mrb[22].mxu1 }
0x1df4   :  { %v2643_v3 = vpop.f32.mrb[23].mxu1  ;;  %v2653_v60 = vadd.f32 %v4489_v53, %v5856_v62 }
0x1df5   :  { %v2652_v39 = vadd.f32 %v2643_v3, %v5859_v5 }
0x1df6   :  { %v2655_v46 = vmul.f32 %v2653_v60, %v2653_v60 }
0x1df7   :  { %v2654_v14 = vmul.f32 %v2652_v39, %v2652_v39 }
0x1df8   :  { %v2659_v47 = vsel %vm254_vm3, %v2655_v46, 0.0 }
0x1df9   :  { %v2656_v44 = vsel %vm254_vm3, %v2654_v14, 0.0 }
0x1ea1   :  { %v2845_v28 = vpop.f32.mrb[24].mxu1 }
0x1ea2   :  { %2850 = vrot.lane.b32.xlu0 %v2845_v28, %s5142_s7  ;;  %v4519_v56 = vpop.f32.mrb[25].mxu1 }
0x1f14   :  { %v2851_v50 = vpop.permute.xlu0 %2850 }
0x1f15   :  { %4521 = vmatpush3.xpose.msk.msra.mxu0 %vm254_vm3, %v2851_v50 }
0x1f16   :  { %4525 = vmatprep.subr.mxu0 %v5141_v25 }
0x1f18   :  { %4523 = vmatmul.mubr.msk.f32.vlgmr.msra.gmra.mrb[32].mxu0 %vm254_vm3, %v2845_v28 }
0x1f19   :  { %4527 = vmatprep.mubr.msk.f32.mxu0 %vm5145_vm8, %v5141_v25 }
0x1feb   :  { %v2922_v41 = vpop.f32.mrb[32].mxu0 }
0x1fec   :  { %v2926_v7 = vmul.f32 0.17677669, %v2922_v41  ;;  %v4524_v12 = vpop.f32.mrb[33].mxu0 }
0x1fee   :  { %v2927_v32 = vsel %vm155_vm10, %v2926_v7, -1e+09 }
0x1fef   :  { %v2928_v35 = vsel %vm1099_vm11, %v2927_v32, -inf }
0x1ff0   :  { %2929 = vmax.xlane.f32.xlu0 %v2928_v35 }
0x1ff4   :  { %2657 = vadd.xlane.f32.xlu0 %v2656_v44 }
0x207d   :  { %v2930_v15 = vpop.xlane.xlu0 %2929 }
0x207e   :  { %v2931_v45 = vsub.f32 %v2927_v32, %v2930_v15 }
0x2080   :  { %v2932_v4 = vmul.f32 1.442695, %v2931_v45 }
0x2081   :  { %v2658_v62 = vpop.xlane.xlu0 %2657 }
0x2082   :  { %5064 = vpow2.f32 %v2932_v4  ;;  %v2662_v30 = vmul.f32 0.03125, %v2658_v62 }
0x2084   :  { %v2664_v58 = vadd.f32 1e-06, %v2662_v30 }
0x208c   :  { %v5065_v61 = vpop.eup %5064 }
0x208d   :  { %v2934_v5 = vsel %vm1099_vm11, %v5065_v61, 0.0 }
0x208e   :  { %2935 = vadd.xlane.f32.xlu1 %v2934_v5 }
0x209f   :  { %2939 = vrot.lane.b32.xlu1 %v2845_v28, %s5143_s23 }
0x20c3   :  { %2660 = vadd.xlane.f32.xlu1 %v2659_v47 }
0x211b   :  { %v2936_v49 = vpop.xlane.xlu1 %2935 }
0x211c   :  { %5066 = vrcp.f32 %v2936_v49 }
0x211d   :  { %5068 = vrsqrt.f32 %v2664_v58 }
0x211f   :  { %v2940_v54 = vpop.permute.xlu1 %2939 }
0x2120   :  { %4526 = vmatpush3.msra.mxu0 %v2940_v54 }
0x2121   :  { %4878 = vmatprep.subr.bf16.mxu0 %v5144_v0 }
0x2126   :  { %v5067_v29 = vpop.eup %5066 }
0x2127   :  { %v2938_v48 = vmul.f32 %v5067_v29, %v5065_v61  ;;  %v5069_v24 = vpop.eup %5068 }
0x2129   :  { %4528 = vmatmul.mubr.msk.f32.vlgmr.msra.gmra.mrb[34].mxu0 %vm1099_vm11, %v2938_v48 }
0x212a   :  { %4880 = vmatpush3.bf16.msra.mxu0 %v5624_v33  ;;  %4549 = vmatprep.mubr.msk.f32.mxu0 %vm5145_vm8, %v5141_v25  ;;  %v5934_v33 = vmul.f32 %v5069_v24, %v2652_v39 }
0x212b   :  { %4881 = vmatprep.subr.bf16.mxu0 %v5144_v0 }
0x212e   :  { %4883 = vmatpush3.bf16.msra.mxu0 %v5633_v37 }
0x212f   :  { %4892 = vmatprep.subr.bf16.mxu0 %v5144_v0 }
0x2150   :  { %v2661_v59 = vpop.xlane.xlu1 %2660 }
0x2151   :  { %v2663_v2 = vmul.f32 0.03125, %v2661_v59 }
0x2153   :  { %v2665_v22 = vadd.f32 1e-06, %v2663_v2 }
0x2155   :  { %5070 = vrsqrt.f32 %v2665_v22 }
0x215f   :  { %v5071_v37 = vpop.eup %5070 }
0x2160   :  { %v5942_v9 = vmul.f32 %v5071_v37, %v2653_v60 }
0x21fc   :  { %v3011_v40 = vpop.f32.mrb[34].mxu0 }
0x21fd   :  { %v4529_v26 = vpop.f32.mrb[35].mxu0  ;;  %4539 = vmatmul.mubr.msk.f32.vlgmr.msra.gmra.mrb[26].mxu1 %vm254_vm3, %v3011_v40 }
0x21fe   :  { %4887 = vmatpush3.bf16.msra.mxu1 %v5585_v52  ;;  %4560 = vmatprep.mubr.msk.f32.mxu1 %vm254_vm3, %v5934_v33 }
0x21ff   :  { %4889 = vmatprep.subr.bf16.mxu1 %v5594_v6 }
0x2202   :  { %4891 = vmatpush3.bf16.msra.mxu1 %v5594_v6 }
0x2203   :  { %4896 = vmatprep.subr.bf16.mxu1 %v5144_v0 }
0x2205   :  { %4561 = vmatmul.mubr.msk.f32.vlgmr.msra.gmra.mrb[28].mxu1 %vm254_vm3, %v5942_v9 }
0x2206   :  { %4574 = vmatprep.mubr.msk.f32.mxu1 %vm5145_vm8, %v5141_v25 }
0x22d0   :  { %v3084_v51 = vpop.f32.mrb[26].mxu1 }
0x22d1   :  { %v5950_v52 = vadd.f32 %v3084_v51, %v5897_v38  ;;  %v4540_v43 = vpop.f32.mrb[27].mxu1 }
0x22d3   :  { %v3089_v42 = vmul.f32 %v5950_v52, %v5950_v52 }
0x22d5   :  { %v3090_v6 = vsel %vm254_vm3, %v3089_v42, 0.0 }
0x22d6   :  { %3091 = vadd.xlane.f32.xlu0 %v3090_v6 }
0x22d8   :  { %v4562_v34 = vpop.f32.mrb[28].mxu1 }
0x22d9   :  { %v3242_v53 = vpop.f32.mrb[29].mxu1 }
0x22da   :  { %v5005_v3 = vpack.i.bf16 %v4562_v34, %v3242_v53  ;;  %v4893_v28 = vpack.c.bf16 %v4562_v34, %v3242_v53 }
0x2363   :  { %v3092_v56 = vpop.xlane.xlu0 %3091 }
0x2364   :  { %v3093_v50 = vmul.f32 0.03125, %v3092_v56 }
0x2366   :  { %v3094_v39 = vadd.f32 1e-06, %v3093_v50 }
0x2368   :  { %5072 = vrsqrt.f32 %v3094_v39 }
0x2372   :  { %v5073_v41 = vpop.eup %5072 }
0x2373   :  { %v3096_v7 = vmul.f32 %v5073_v41, %v5950_v52 }
0x2375   :  { %4550 = vmatmul.mubr.msk.f32.vlgmr.msra.gmra.mrb[36].mxu0 %vm254_vm3, %v3096_v7 }
0x2376   :  { %4895 = vmatpush3.bf16.xpose.msk.msra.mxu0 %vm5351_vm4, %v4893_v28  ;;  %4567 = vmatprep.mubr.msk.f32.mxu0 %vm5145_vm8, %v5141_v25 }
0x2377   :  { %4899 = vmatprep.subr.bf16.mxu0 %v5144_v0 }
0x2448   :  { %v3166_v38 = vpop.f32.mrb[36].mxu0 }
0x2449   :  { %v4551_v12 = vpop.f32.mrb[37].mxu0  ;;  %4568 = vmatmul.mubr.msk.f32.vlgmr.msra.gmra.mrb[38].mxu0 %vm254_vm3, %v3166_v38 }
0x244a   :  { %4901 = vmatpush3.bf16.msra.mxu0 %v5662_v18  ;;  %4585 = vmatprep.mubr.msk.f32.mxu0 %vm5145_vm8, %v5141_v25 }
0x244b   :  { %4902 = vmatprep.subr.bf16.mxu0 %v5144_v0 }
0x244e   :  { %4904 = vmatpush3.bf16.msra.mxu0 %v5668_v20 }
0x244f   :  { %4911 = vmatprep.subr.bf16.mxu0 %v5144_v0 }
0x251c   :  { %v3326_v32 = vpop.f32.mrb[38].mxu0 }
0x251d   :  { %v3330_v35 = vmul.f32 0.17677669, %v3326_v32  ;;  %v4569_v14 = vpop.f32.mrb[39].mxu0 }
0x251f   :  { %v3331_v44 = vsel %vm2277_vm15, %v3330_v35, -1e+09  ;;  %v89_v35 = vld [vmem:[%s6158_s29 + $0x8] sm:$0xff] }
0x2520   :  { %v3332_v15 = vsel %vm450_vm7, %v3331_v44, -inf  ;;  %vm3733_vm6 = vcmp.eq.s32.totalorder %v89_v35, 0 }
0x2521   :  { %3333 = vmax.xlane.f32.xlu0 %v3332_v15  ;;  %v6034_v14 = vsel %vm3733_vm6, 4294967196, %v89_v35 }
0x25ae   :  { %v3334_v45 = vpop.xlane.xlu0 %3333 }
0x25af   :  { %v3335_v18 = vsub.f32 %v3331_v44, %v3334_v45 }
0x25b1   :  { %v3336_v4 = vmul.f32 1.442695, %v3335_v18  ;;  %v841_v18 = vld [vmem:[%s6159_s1] sm:$0xff] }
0x25b3   :  { %5074 = vpow2.f32 %v3336_v4 }
0x25bd   :  { %v5075_v61 = vpop.eup %5074 }
0x25be   :  { %v3338_v5 = vsel %vm450_vm7, %v5075_v61, 0.0 }
0x25bf   :  { %3339 = vadd.xlane.f32.xlu0 %v3338_v5 }
0x25d5   :  { %5006 = vrot.lane.b32.xlu0 %v5005_v3, %s5142_s7 }
0x264c   :  { %v3340_v20 = vpop.xlane.xlu0 %3339 }
0x264d   :  { %5076 = vrcp.f32 %v3340_v20 }
0x2650   :  { %v5007_v60 = vpop.permute.xlu0 %5006 }
0x2651   :  { %v5009_v46 = vunpack.i.h.bf16 %v5007_v60  ;;  %v5008_v47 = vunpack.i.l.bf16 %v5007_v60  ;;  %v843_v60 = vsub.f32 %v5596_v13, %v841_v18 }
0x2653   :  { %v4897_v27 = vpack.c.bf16 %v5009_v46, %v5008_v47 }
0x2655   :  { %4898 = vmatpush3.bf16.msra.mxu1 %v4897_v27 }
0x2656   :  { %4905 = vmatprep.subr.bf16.mxu1 %v5144_v0 }
0x2657   :  { %v5077_v49 = vpop.eup %5076 }
0x2658   :  { %v3342_v54 = vmul.f32 %v5077_v49, %v5075_v61  ;;  %v842_v61 = vld [vmem:[%s6159_s1 + $0x8] sm:$0xff] }
0x2659   :  { %v844_v47 = vsub.f32 %v5605_v16, %v842_v61 }
0x265a   :  { %4575 = vmatmul.mubr.msk.f32.vlgmr.msra.gmra.mrb[30].mxu1 %vm450_vm7, %v3342_v54  ;;  %vm3735_vm7 = vcmp.ne.s32.totalorder %v6034_v14, 4294967196  ;;  %v845_v54 = vmul.f32 %v843_v60, %v843_v60 }
0x265b   :  { %4907 = vmatpush3.bf16.msra.mxu1 %v5695_v55  ;;  %4596 = vmatprep.mubr.msk.f32.mxu1 %vm5145_vm8, %v5141_v25  ;;  %v3736_v44 = vsel %vm3735_vm7, %v6034_v14, 0 }
0x265c   :  { %4908 = vmatprep.subr.bf16.mxu1 %v5144_v0  ;;  %v847_v13 = vsel %vm254_vm3, %v845_v54, 0.0 }
0x265f   :  { %4910 = vmatpush3.bf16.msra.mxu1 %v5704_v1 }
0x2660   :  { %4923 = vmatprep.subr.bf16.mxu1 %v5144_v0 }
0x272d   :  { %v3418_v29 = vpop.f32.mrb[30].mxu1 }
0x272e   :  { %v4576_v48 = vpop.f32.mrb[31].mxu1  ;;  %4586 = vmatmul.mubr.msk.f32.vlgmr.msra.gmra.mrb[40].mxu0 %vm254_vm3, %v3418_v29 }
0x272f   :  { %4913 = vmatpush3.bf16.msra.mxu0 %v5718_v63  ;;  %4615 = vmatprep.mubr.msk.f32.mxu0 %vm5145_vm8, %v5141_v25 }
0x2730   :  { %4914 = vmatprep.subr.bf16.mxu0 %v5144_v0 }
0x2733   :  { %4916 = vmatpush3.bf16.msra.mxu0 %v5727_v8 }
0x2734   :  { %4917 = vmatprep.subr.bf16.mxu0 %v5144_v0 }
0x2737   :  { %4919 = vmatpush3.bf16.msra.mxu0 %v5737_v31 }
0x2738   :  { %4920 = vmatprep.subr.bf16.mxu0 %v5144_v0 }
0x273b   :  { %4922 = vmatpush3.bf16.msra.mxu0 %v5747_v36 }
0x2801   :  { %v3491_v55 = vpop.f32.mrb[40].mxu0 }
0x2802   :  { %v3495_v1 = vadd.f32 %v3491_v55, %v5950_v52  ;;  %v4587_v62 = vpop.f32.mrb[41].mxu0  ;;  %v846_v55 = vmul.f32 %v844_v47, %v844_v47 }
0x2804   :  { %v3496_v63 = vmul.f32 %v3495_v1, %v3495_v1 }
0x2806   :  { %v3497_v30 = vsel %vm254_vm3, %v3496_v63, 0.0 }
0x2807   :  { %3498 = vadd.xlane.f32.xlu0 %v3497_v30  ;;  %v2671_v30 = vld [vmem:[%s6159_s1 + $0x18] sm:$0xff] }
0x2894   :  { %v3499_v58 = vpop.xlane.xlu0 %3498 }
0x2895   :  { %v3500_v59 = vmul.f32 0.03125, %v3499_v58  ;;  %v848_v58 = vsel %vm254_vm3, %v846_v55, 0.0 }
0x2897   :  { %v3501_v2 = vadd.f32 1e-06, %v3500_v59  ;;  %v849_v59 = vadd.f32 %v848_v58, %v847_v13 }
0x2899   :  { %5078 = vrsqrt.f32 %v3501_v2  ;;  %v2670_v2 = vld [vmem:[%s6159_s1 + $0x10] sm:$0xff]  ;;  %s3815_s1 = sshll.u32 %s5148_s21, 4  ;;  %s3816_s1 = int_to_ptr.vmem [resolvable:$true] %s3815_s1 }
0x28a3   :  { %v5079_v8 = vpop.eup %5078 }
0x28a4   :  { %v3503_v22 = vmul.f32 %v5079_v8, %v3495_v1 }
0x28a6   :  { %4597 = vmatmul.mubr.msk.f32.vlgmr.msra.gmra.mrb[32].mxu1 %vm254_vm3, %v3503_v22  ;;  %v2673_v22 = vsub.f32 %v5942_v9, %v2671_v30 }
0x28a7   :  { %4926 = vmatpush3.bf16.xpose.msk.msra.mxu1 %vm5351_vm4, %v5277_v10  ;;  %4634 = vmatprep.mubr.msk.f32.mxu1 %vm5145_vm8, %v5141_v25 }
0x28a8   :  { %4927 = vmatprep.subr.bf16.mxu1 %v5144_v0 }
0x28af   :  { %4930 = vmatpush3.bf16.xpose.msk.msra.mxu1 %vm5351_vm4, %v5279_v11 }
0x28b0   :  { %4931 = vmatprep.subr.bf16.mxu1 %v5144_v0 }
0x28b7   :  { %4934 = vmatpush3.bf16.xpose.msk.msra.mxu1 %vm5351_vm4, %v5290_v17  ;;  %v1939_v17 = vsel %vm170_vm0, %v5807_v19, -inf }
0x28b8   :  { %4935 = vmatprep.subr.bf16.mxu1 %v5144_v0 }
0x28bf   :  { %4938 = vmatpush3.bf16.xpose.msk.msra.mxu1 %vm5351_vm4, %v5300_v21  ;;  %v88_v21 = vld [vmem:[%s6158_s29] sm:$0xff] }
0x28c0   :  { %vm1929_vm2 = vcmp.eq.s32.totalorder %v88_v21, 0 }
0x28c1   :  { %v1930_v57 = vsel %vm1929_vm2, 4294967196, %v88_v21 }
0x28c2   :  { %vm1931_vm4 = vcmp.ne.s32.totalorder %v1930_v57, 4294967196 }
0x28c3   :  { %v1932_v0 = vsel %vm1931_vm4, %v1930_v57, 0  ;;  %v3898_v16 = vsel %vm1931_vm4, 1.0, %v5141_v25 }
0x28c4   :  { %v1970_v9 = vsel %vm1959_vm9, %v3898_v16, 0.0 }
0x2979   :  { %v3573_v10 = vpop.f32.mrb[32].mxu1 }
0x297a   :  { %v3577_v31 = vmax.f32 %v3573_v10, 0.0  ;;  %v4598_v36 = vpop.f32.mrb[33].mxu1 }
0x297b   :  { %v2672_v36 = vsub.f32 %v5934_v33, %v2670_v2 }
0x297c   :  { %4616 = vmatmul.mubr.msk.f32.vlgmr.msra.gmra.mrb[42].mxu0 %vm170_vm0, %v3577_v31  ;;  %v152_v31 = vcvt.s32.f32 %v5305_v23 }
0x2a4f   :  { %v3647_v24 = vpop.f32.mrb[42].mxu0 }
0x2a50   :  { %v3651_v40 = vadd.f32 %v3647_v24, %v3495_v1  ;;  %v4617_v11 = vpop.f32.mrb[43].mxu0 }
0x2a52   :  { %v3652_v26 = vmul.f32 %v3651_v40, %v3651_v40 }
0x2a54   :  { %v3653_v37 = vsel %vm254_vm3, %v3652_v26, 0.0  ;;  %v2675_v26 = vmul.f32 %v2673_v22, %v2673_v22 }
0x2a55   :  { %3654 = vadd.xlane.f32.xlu1 %v3653_v37  ;;  %v2674_v37 = vmul.f32 %v2672_v36, %v2672_v36 }
0x2a56   :  { %v2677_v21 = vsel %vm254_vm3, %v2675_v26, 0.0 }
0x2a57   :  { %v2676_v33 = vsel %vm254_vm3, %v2674_v37, 0.0 }
0x2a58   :  { %v2678_v57 = vadd.f32 %v2677_v21, %v2676_v33  ;;  %v3800_v33 = vld [vmem:[#allocation2] sm:$0x1] }
0x2a59   :  { %1940 = vmax.xlane.f32.xlu1 %v1939_v17 }
0x2a6a   :  { %1934 = vperm.xlu1 %4994, %v1932_v0  }
0x2ae2   :  { %v3655_v51 = vpop.xlane.xlu1 %3654 }
0x2ae3   :  { %v3656_v52 = vmul.f32 0.03125, %v3655_v51 }
0x2ae5   :  { %v3657_v43 = vadd.f32 1e-06, %v3656_v52 }
0x2ae6   :  { %v6020_v42 = vpop.xlane.xlu1 %1940 }
0x2ae7   :  { %5080 = vrsqrt.f32 %v3657_v43  ;;  %v1942_v6 = vsub.f32 %v5807_v19, %v6020_v42 }
0x2ae9   :  { %v1943_v34 = vmul.f32 1.442695, %v1942_v6 }
0x2aea   :  { %v1935_v53 = vpop.permute.xlu1 %1934 }
0x2aeb   :  { %5082 = vpow2.f32 %v1943_v34  ;;  %vm1936_vm5 = vcmp.eq.s32.totalorder %v5305_v23, %v1935_v53 }
0x2aec   :  { %v3897_v56 = vsel %vm1936_vm5, 1.0, %v5141_v25 }
0x2aed   :  { %v1951_v41 = vmul.f32 %v3897_v56, %v5807_v19 }
0x2aef   :  { %v1952_v7 = vsel %vm170_vm0, %v1951_v41, 0.0 }
0x2af1   :  { %v5081_v3 = vpop.eup %5080 }
0x2af2   :  { %v3659_v28 = vmul.f32 %v5081_v3, %v3651_v40 }
0x2af4   :  { %4635 = vmatmul.mubr.msk.f32.vlgmr.msra.gmra.mrb[34].mxu1 %vm254_vm3, %v3659_v28  ;;  %vm1982_vm3 = vcmp.eq.f32.partialorder %v5807_v19, %v6020_v42 }
0x2af5   :  { %v5083_v50 = vpop.eup %5082 }
0x2af6   :  { %v1945_v39 = vsel %vm170_vm0, %v5083_v50, 0.0 }
0x2af7   :  { %1946 = vadd.xlane.f32.xlu0 %v1945_v39 }
0x2afb   :  { %1953 = vadd.xlane.f32.xlu0 %v1952_v7 }
0x2b84   :  { %v1947_v15 = vpop.xlane.xlu0 %1946 }
0x2b85   :  { %5084 = vlog2.f32 %v1947_v15 }
0x2b88   :  { %v1954_v1 = vpop.xlane.xlu0 %1953 }
0x2b8f   :  { %v5085_v45 = vpop.eup %5084 }
0x2b90   :  { %v1949_v5 = vmul.f32 0.6931472, %v5085_v45 }
0x2b92   :  { %v1950_v49 = vadd.f32 %v1949_v5, %v6020_v42 }
0x2b94   :  { %v1957_v62 = vsub.f32 %v1950_v49, %v1954_v1 }
0x2b96   :  { %v1958_v8 = vmul.f32 %v3898_v16, %v1957_v62 }
0x2b98   :  { %v1960_v40 = vsel %vm1959_vm9, %v1958_v8, 0.0 }
0x2bc7   :  { %v3729_v38 = vpop.f32.mrb[34].mxu1 }
0x2bc8   :  { %v4636_v12 = vpop.f32.mrb[35].mxu1  ;;  %v3743_v32 = vsel %vm170_vm0, %v3729_v38, -inf }
0x2bc9   :  { %3744 = vmax.xlane.f32.xlu1 %v3743_v32 }
0x2bda   :  { %3738 = vperm.xlu1 %4994, %v3736_v44  }
0x2c56   :  { %v6043_v4 = vpop.xlane.xlu1 %3744 }
0x2c57   :  { %v3746_v20 = vsub.f32 %v3729_v38, %v6043_v4  ;;  %vm3785_vm10 = vcmp.eq.f32.partialorder %v3729_v38, %v6043_v4 }
0x2c58   :  { %v3786_v11 = vsel %vm3785_vm10, %v152_v31, 64.0 }
0x2c59   :  { %v3747_v46 = vmul.f32 1.442695, %v3746_v20  ;;  %v3787_v17 = vsel %vm170_vm0, %v3786_v11, inf }
0x2c5a   :  { %v3739_v27 = vpop.permute.xlu1 %3738 }
0x2c5b   :  { %5086 = vpow2.f32 %v3747_v46  ;;  %vm3740_vm8 = vcmp.eq.s32.totalorder %v5305_v23, %v3739_v27 }
0x2c5c   :  { %v3943_v29 = vsel %vm3740_vm8, 1.0, %v5141_v25 }
0x2c5d   :  { %v3755_v48 = vmul.f32 %v3943_v29, %v3729_v38 }
0x2c5f   :  { %v3756_v63 = vsel %vm170_vm0, %v3755_v48, 0.0  ;;  %v3944_v48 = vsel %vm3735_vm7, 1.0, %v5141_v25  ;;  %v1983_v25 = vsel %vm1982_vm3, %v152_v31, 64.0 }
0x2c60   :  { %3757 = vadd.xlane.f32.xlu0 %v3756_v63  ;;  %v1984_v14 = vsel %vm170_vm0, %v1983_v25, inf }
0x2c64   :  { %850 = vadd.xlane.f32.xlu0 %v849_v59 }
0x2c65   :  { %v5087_v10 = vpop.eup %5086 }
0x2c66   :  { %v3749_v24 = vsel %vm170_vm0, %v5087_v10, 0.0  ;;  %vm3798_vm0 = vcmask 0  }
0x2c67   :  { %3750 = vadd.xlane.f32.xlu1 %v3749_v24 }
0x2c68   :  { %1961 = vadd.xlane.f32.xlu0 %v1960_v40 }
0x2c6b   :  { %3788 = vmin.xlane.f32.xlu1 %v3787_v17 }
0x2c6c   :  { %1971 = vadd.xlane.f32.xlu0 %v1970_v9 }
0x2c70   :  { %2679 = vadd.xlane.f32.xlu0 %v2678_v57  ;;  %v3801_v57 = vmul.f32 0.5, %v3800_v33 }
0x2ced   :  { %v3758_v0 = vpop.xlane.xlu0 %3757 }
0x2cf1   :  { %v851_v51 = vpop.xlane.xlu0 %850 }
0x2cf2   :  { %v852_v52 = vrot.slane %v851_v51, 4 }
0x2cf4   :  { %v853_v43 = vadd.f32 %v852_v52, %v851_v51  ;;  %v3751_v6 = vpop.xlane.xlu1 %3750 }
0x2cf5   :  { %5088 = vlog2.f32 %v3751_v6  ;;  %v1962_v34 = vpop.xlane.xlu0 %1961 }
0x2cf6   :  { %v854_v53 = vrot.slane %v853_v43, 2  ;;  %v1963_v3 = vrot.slane %v1962_v34, 4 }
0x2cf8   :  { %v1964_v28 = vadd.f32 %v1963_v3, %v1962_v34  ;;  %v3789_v56 = vpop.xlane.xlu1 %3788  ;;  %v855_v50 = vadd.f32 %v854_v53, %v853_v43 }
0x2cf9   :  { %v4965_v39 = vtrunc.f32 %v3789_v56  ;;  %v1972_v41 = vpop.xlane.xlu0 %1971 }
0x2cfa   :  { %v1965_v7 = vrot.slane %v1964_v28, 2  ;;  %v1973_v38 = vrot.slane %v1972_v41, 4  ;;  %v856_v12 = vrot.slane %v855_v50, 1 }
0x2cfb   :  { %v4966_v32 = vcvt.f32.s32 %v4965_v39 }
0x2cfc   :  { %v1974_v35 = vadd.f32 %v1973_v38, %v1972_v41  ;;  %v857_v44 = vadd.f32 %v856_v12, %v855_v50  ;;  %v1966_v15 = vadd.f32 %v1965_v7, %v1964_v28 }
0x2cfd   :  { %3791 = vst.msk [vmem:[%s6142_s20 + $0x8] sm:$0xff] %vm1959_vm9, %v4966_v32  ;;  %v2680_v45 = vpop.xlane.xlu0 %2679 }
0x2cfe   :  { %v1975_v18 = vrot.slane %v1974_v35, 2  ;;  %v2681_v61 = vrot.slane %v2680_v45, 4  ;;  %4951 = vpush %v857_v44  ;;  %v1967_v5 = vrot.slane %v1966_v15, 1 }
0x2cff   :  { %v5089_v20 = vpop.eup %5088 }
0x2d00   :  { %v3753_v60 = vmul.f32 0.6931472, %v5089_v20  ;;  %v2682_v46 = vadd.f32 %v2681_v61, %v2680_v45  ;;  %v1968_v47 = vadd.f32 %v1967_v5, %v1966_v15  ;;  %v1976_v27 = vadd.f32 %v1975_v18, %v1974_v35 }
0x2d02   :  { %v3754_v49 = vadd.f32 %v3753_v60, %v6043_v4  ;;  %v2683_v54 = vrot.slane %v2682_v46, 2  ;;  %4953 = vpush %v1968_v47  ;;  %v1977_v29 = vrot.slane %v1976_v27, 1  ;;  %v3773_v4 = vsel %vm1959_vm9, %v3944_v48, 0.0 }
0x2d04   :  { %v3761_v55 = vsub.f32 %v3754_v49, %v3758_v0  ;;  %v1978_v1 = vadd.f32 %v1977_v29, %v1976_v27  ;;  %v2684_v62 = vadd.f32 %v2683_v54, %v2682_v46 }
0x2d06   :  { %v3762_v63 = vmul.f32 %v3944_v48, %v3761_v55  ;;  %4955 = vpush %v1978_v1  ;;  %v2685_v13 = vrot.slane %v2684_v62, 1 }
0x2d08   :  { %v3763_v16 = vsel %vm1959_vm9, %v3762_v63, 0.0  ;;  %v2686_v30 = vadd.f32 %v2685_v13, %v2684_v62 }
0x2d09   :  { %3764 = vadd.xlane.f32.xlu0 %v3763_v16 }
0x2d0a   :  { %4959 = vpush %v2686_v30 }
0x2d0d   :  { %3774 = vadd.xlane.f32.xlu0 %v3773_v4 }
0x2d11   :  { %1985 = vmin.xlane.f32.xlu0 %v1984_v14 }
0x2d2f   :  { %s4952_s27 = spop %4951 }
0x2d33   :  { %s4954_s15 = spop %4953 }
0x2d37   :  { %s4956_s5 = spop %4955 }
0x2d3b   :  { %s4960_s28 = spop %4959 }
0x2d3c   :  { %s2688_s4 = sadd.f32 %s4960_s28, %s4952_s27 }
0x2d3e   :  { %s3805_s11 = smul.f32 0.0009765625, %s2688_s4 }
0x2d96   :  { %v3765_v58 = vpop.xlane.xlu0 %3764 }
0x2d97   :  { %v3766_v59 = vrot.slane %v3765_v58, 4 }
0x2d99   :  { %v3767_v2 = vadd.f32 %v3766_v59, %v3765_v58 }
0x2d9a   :  { %v3775_v8 = vpop.xlane.xlu0 %3774 }
0x2d9b   :  { %v3768_v22 = vrot.slane %v3767_v2, 2  ;;  %v3776_v10 = vrot.slane %v3775_v8, 4 }
0x2d9d   :  { %v3777_v36 = vadd.f32 %v3776_v10, %v3775_v8  ;;  %v3769_v24 = vadd.f32 %v3768_v22, %v3767_v2 }
0x2d9e   :  { %v1986_v40 = vpop.xlane.xlu0 %1985 }
0x2d9f   :  { %v3778_v11 = vrot.slane %v3777_v36, 2  ;;  %v4957_v26 = vtrunc.f32 %v1986_v40  ;;  %v3770_v9 = vrot.slane %v3769_v24, 1 }
0x2da1   :  { %v4958_v19 = vcvt.f32.s32 %v4957_v26  ;;  %v3771_v42 = vadd.f32 %v3770_v9, %v3769_v24  ;;  %v3779_v37 = vadd.f32 %v3778_v11, %v3777_v36 }
0x2da3   :  { %1988 = vst.msk [vmem:[%s6142_s20] sm:$0xff] %vm1959_vm9, %v4958_v19  ;;  %v3780_v23 = vrot.slane %v3779_v37, 1  ;;  %s5147_s20 = smov [#allocation5]  }
0x2da4   :  { %4961 = vpush %v3771_v42  ;;  %s3825_s23 = sshll.u32 %s5147_s20, 4  ;;  %s3826_s23 = int_to_ptr.vmem [resolvable:$true] %s3825_s23 }
0x2da5   :  { %v3781_v31 = vadd.f32 %v3780_v23, %v3779_v37  ;;  %s5092_s24 = scalar_lea.vmem %s3826_s23, 16  ;;  %s5096_s13 = scalar_lea.vmem %s3826_s23, 32 }
0x2da6   :  { %p5093_p0 = scmp.ne.s32.totalorder %s3826_s23, %s5092_s24  ;;  %p5097_p1 = scmp.lt.s32.totalorder %s3826_s23, %s3826_s23 }
0x2da7   :  { %4963 = vpush %v3781_v31  ;;  %p5098_p2 = scmp.lt.s32.totalorder %s5096_s13, %s5092_s24 }
0x2da9   :  { %p5099_p3 = por %p5098_p2, %p5097_p1 }
0x2dab   :  { %p5100_p4 = pnand %p5099_p3, %p5093_p0 }
0x2dd5   :  { %s4962_s9 = spop %4961 }
0x2dd6   :  { %s3783_s7 = sadd.f32 %s4962_s9, %s4954_s15 }
0x2dd8   :  { %s4964_s8 = spop %4963 }
0x2dd9   :  { %s3784_s17 = sadd.f32 %s4964_s8, %s4956_s5 }
0x2ddb   :  { %s3792_s22 = smax.f32 %s5146_s14, %s3784_s17 }
0x2ddc   :  { %v3793_v17 = vstv %s3792_s22 }
0x2ddd   :  { %5090 = vrcp.f32 %v3793_v17 }
0x2de7   :  { %v5091_v21 = vpop.eup %5090 }
0x2de8   :  { %4967 = vpush %v5091_v21 }
0x2e19   :  { %s4968_s29 = spop %4967 }
0x2e1a   :  { %s3796_s30 = smul.f32 %s4968_s29, %s3783_s7 }
0x2e1c   :  { %v3797_v0 = vstv %s3796_s30  ;;  %s3802_s0 = smul.f32 0.5, %s3796_s30 }
0x2e1d   :  { %3799 = vst.msk [vmem:[#allocation5] sm:$0x1] %vm3798_vm0, %v3797_v0 }
0x2e1e   :  { %v3803_v51 = vstv %s3802_s0 }
0x2e1f   :  { %5103 = shalt.err (!%p5100_p4)
}
0x2e20   :  { %s5104_s3 = scalar_lea.hbm %s6141_s19, 16 }
0x2e21   :  { %p5105_p5 = scmp.ne.s32.totalorder %s6141_s19, %s5104_s3  ;;  %p5108_p6 = scmp.lt.u32.totalorder %s5104_s3, %s6141_s19 }
0x2e23   :  { %p5110_p7 = pnand %p5108_p6, %p5105_p5 }
0x2e25   :  { %5113 = shalt.err (!%p5110_p7)
}
0x2e26   :  { %3828 = dma.vmem_to_hbm [thread:$0]  %s3826_s23, 16, %s6141_s19, [#allocation6]   ;;  %v3804_v52 = vadd.f32 %v3803_v51, %v3801_v57  ;;  %v3806_v43 = vstv %s3805_s11 }
0x2e27   :  { %s5114_s15 = scalar_lea.vmem %s3816_s1, 16  ;;  %s5118_s5 = scalar_lea.vmem %s3816_s1, 32 }
0x2e28   :  { %v3807_v6 = vadd.f32 %v3806_v43, %v3804_v52  ;;  %p5115_p8 = scmp.ne.s32.totalorder %s3816_s1, %s5114_s15  ;;  %p5119_p9 = scmp.lt.s32.totalorder %s3816_s1, %s3816_s1 }
0x2e29   :  { %p5120_p10 = scmp.lt.s32.totalorder %s5118_s5, %s5114_s15 }
0x2e2a   :  { %3808 = vst.msk [vmem:[#allocation3] sm:$0x1] %vm3798_vm0, %v3807_v6 }
0x2e2b   :  { %p5121_p11 = por %p5120_p10, %p5119_p9 }
0x2e2d   :  { %p5122_p12 = pnand %p5121_p11, %p5115_p8 }
0x2e2f   :  { %5125 = shalt.err (!%p5122_p12)
}
0x2e30   :  { %s5126_s8 = scalar_lea.hbm %s6140_s18, 16 }
0x2e31   :  { %p5127_p13 = scmp.ne.s32.totalorder %s6140_s18, %s5126_s8  ;;  %p5130_p0 = scmp.lt.u32.totalorder %s5126_s8, %s6140_s18 }
0x2e33   :  { %p5132_p1 = pnand %p5130_p0, %p5127_p13 }
0x2e35   :  { %5135 = shalt.err (!%p5132_p1)
}
0x2e36   :  { %3818 = dma.vmem_to_hbm [thread:$0]  %s3816_s1, 16, %s6140_s18, [#allocation4]  }
0x2e37   :  { %5136 = dma.done.wait [#allocation4], 16  }
0x2e38   :  { %5137 = vsyncadd [#allocation4], 4294967280 }
0x2e39   :  { %5138 = dma.done.wait [#allocation6], 16  }
0x2e3a   :  { %5139 = vsyncadd [#allocation6], 4294967280 }
0x2e3b   :  { %3839 = vsyncpa [#allocation4], 1 }
0x2e3c   :  { %3840 = vsyncpa [#allocation6], 1 }

// kernel: code_reviewer_forward.2
= control target key start
LH: loop header
LB: loop body
LE: loop exit
PB: predicated region body
PF: predicated region fallthrough
CT: control target
= control target key end

     0   :  { %s5943_s0 = inlined_call_operand.vmem [shape: s32[32,1], index: 0, kind: input, shape index: {}]   ;;  %s5944_s1 = inlined_call_operand.vmem [shape: s32[2,16], index: 1, kind: input, shape index: {}]   ;;  %s5945_s2 = inlined_call_operand.vmem [shape: s32[16,1], index: 2, kind: input, shape index: {}]   ;;  %s5946_s3 = inlined_call_operand.vmem [shape: s32[16,1], index: 3, kind: input, shape index: {}]   ;;  %s5947_s4 = inlined_call_operand.vmem [shape: f32[64,32], index: 4, kind: input, shape index: {}]   ;;  %s5948_s5 = inlined_call_operand.vmem [shape: f32[32,96], index: 5, kind: input, shape index: {}]   ;;  %s5949_s6 = inlined_call_operand.vmem [shape: f32[32,32], index: 6, kind: input, shape index: {}]   ;;  %s5950_s7 = inlined_call_operand.vmem [shape: f32[32,64], index: 7, kind: input, shape index: {}]   ;;  %s5951_s8 = inlined_call_operand.vmem [shape: f32[64,32], index: 8, kind: input, shape index: {}]   ;;  %s5952_s9 = inlined_call_operand.vmem [shape: f32[32,96], index: 9, kind: input, shape index: {}]   ;;  %s5953_s10 = inlined_call_operand.vmem [shape: f32[32,32], index: 10, kind: input, shape index: {}]   ;;  %s5954_s11 = inlined_call_operand.vmem [shape: f32[32,32], index: 11, kind: input, shape index: {}]   ;;  %s5955_s12 = inlined_call_operand.vmem [shape: f32[32,64], index: 12, kind: input, shape index: {}]   ;;  %s5956_s13 = inlined_call_operand.vmem [shape: f32[32,32], index: 13, kind: input, shape index: {}]   ;;  %s5957_s14 = inlined_call_operand.vmem [shape: f32[32,64], index: 14, kind: input, shape index: {}]   ;;  %s5958_s15 = inlined_call_operand.vmem [shape: f32[64,32], index: 15, kind: input, shape index: {}]   ;;  %s5959_s16 = inlined_call_operand.hbm [shape: f32[1,1], index: 16, kind: output, shape index: {0}]   ;;  %s5960_s17 = inlined_call_operand.vmem [shape: f32[16,1], index: 17, kind: output, shape index: {1}]   ;;  %s5961_s18 = inlined_call_operand.vmem [shape: f32[32,32], index: 18, kind: output, shape index: {2}]  }
   0x1   :  { %5965 = sst [smem:[#allocation5_spill]] %s5943_s0 }
   0x2   :  { %5966 = sst [smem:[#allocation6_spill]] %s5944_s1 }
   0x3   :  { %5967 = sst [smem:[#allocation7_spill]] %s5945_s2 }
   0x4   :  { %s5968_s29 = sld [smem:[#allocation5_spill]]  ;;  %v65_v1 = vld [vmem:[%s5947_s4] sm:$0xff]  ;;  %v5029_v2 = vmov 0   ;;  %v66_v3 = vld [vmem:[%s5947_s4 + $0x8] sm:$0xff]  ;;  %v67_v4 = vld [vmem:[%s5947_s4 + $0x10] sm:$0xff] }
   0x5   :  { %4883 = vset.pattern.permute.xlu0 %v5029_v2  ;;  %v68_v5 = vld [vmem:[%s5947_s4 + $0x18] sm:$0xff]  ;;  %4899 = vset.pattern.permute.xlu1 %v5029_v2  ;;  %v5152_v7 = vpack.c.bf16 %v66_v3, %v65_v1  ;;  %v69_v9 = vld [vmem:[%s5947_s4 + $0x20] sm:$0xff]  ;;  %v70_v10 = vld [vmem:[%s5947_s4 + $0x28] sm:$0xff] }
   0x6   :  { %v5154_v8 = vpack.c.bf16 %v68_v5, %v67_v4 }
   0xa   :  { %v57_v0 = vld [vmem:[%s5968_s29] sm:$0xff]  ;;  %v58_v6 = vld [vmem:[%s5968_s29 + $0x8] sm:$0xff] }
   0xb   :  { %134 = vperm.xlu0 %4883, %v57_v0  }
   0xc   :  { %24 = vsyncpa [#allocation3], 0  ;;  %4562 = vmatprep.subr.bf16.mxu0 %v5152_v7  ;;  %v5165_v11 = vpack.c.bf16 %v70_v10, %v69_v9  ;;  %v71_v12 = vld [vmem:[%s5947_s4 + $0x30] sm:$0xff]  ;;  %v72_v13 = vld [vmem:[%s5947_s4 + $0x38] sm:$0xff]  ;;  %v125_v15 = vlaneseq  ;;  %vm145_vm0 = vcmask 523264   ;;  %v5030_v18 = vmov 0.0  }
   0xd   :  { %4564 = vmatpush3.bf16.msra.mxu0 %v5152_v7  ;;  %v5175_v14 = vpack.c.bf16 %v72_v13, %v71_v12  ;;  %vm229_vm3 = vcmask 261120   ;;  %v73_v28 = vld [vmem:[%s5948_s5] sm:$0xff]  ;;  %v74_v29 = vld [vmem:[%s5948_s5 + $0x8] sm:$0xff]  ;;  %v75_v30 = vld [vmem:[%s5948_s5 + $0x10] sm:$0xff]  ;;  %s5971_s28 = sld [smem:[#allocation6_spill]]  ;;  %vm425_vm7 = vcmask 130048  }
   0xe   :  { %4566 = vmatprep.subr.bf16.mxu0 %v5154_v8  ;;  %v5180_v16 = vand.u32 127, %v125_v15  ;;  %v5207_v31 = vpack.c.bf16 %v74_v29, %v73_v28  ;;  %v76_v32 = vld [vmem:[%s5948_s5 + $0x18] sm:$0xff]  ;;  %s5031_s5 = smov 96   ;;  %vm5226_vm4 = vmpackc.low %vm229_vm3, %vm229_vm3  ;;  %v5238_v53 = vshrl.u32 %v125_v15, 7  ;;  %s5032_s30 = smov 64   ;;  %vm5034_vm8 = vmmov 0  }
   0xf   :  { %137 = vperm.xlu0 %4883, %v58_v6   ;;  %v5212_v33 = vpack.c.bf16 %v76_v32, %v75_v30  ;;  %s5972_s24 = sld [smem:[#allocation7_spill]]  ;;  %vm1057_vm11 = vcmask 64512   ;;  %s5036_s26 = smov [#allocation2]  }
  0x10   :  { %v420_v54 = vsub.s32 0, %v5238_v53  ;;  %vm130_vm10 = vcmp.le.s32.totalorder %v5180_v16, %v5238_v53 }
  0x11   :  { %4568 = vmatpush3.bf16.msra.mxu0 %v5154_v8 }
  0x12   :  { %4570 = vmatprep.subr.bf16.mxu0 %v5165_v11 }
  0x13   :  { %v131_v52 = vld [vmem:[%s5971_s28] sm:$0x1] }
  0x14   :  { %vm132_vm5 = vcmp.ne.s32.totalorder %v131_v52, 0  ;;  %v84_v52 = vld [vmem:[%s5950_s7 + $0x18] sm:$0xff] }
  0x15   :  { %4572 = vmatpush3.bf16.msra.mxu0 %v5165_v11  ;;  %v417_v55 = vsel %vm132_vm5, 1, %v5029_v2 }
  0x16   :  { %4574 = vmatprep.subr.bf16.mxu0 %v5175_v14  ;;  %v5244_v56 = vrot.slane %v417_v55, %v420_v54 }
  0x18   :  { %vm422_vm6 = vcmp.eq.s32.totalorder %v5244_v56, 1  ;;  %v110_v56 = vld [vmem:[%s5956_s13 + $0x8] sm:$0xff] }
  0x19   :  { %4576 = vmatpush3.bf16.msra.mxu0 %v5175_v14 }
  0x1a   :  { %4578 = vmatprep.subr.bf16.mxu0 %v5207_v31 }
  0x8a   :  { %v135_v17 = vpop.permute.xlu0 %134 }
  0x8b   :  { %vm139_vm1 = vcmp.eq.s32.totalorder %v5180_v16, %v135_v17  ;;  %v77_v17 = vld [vmem:[%s5949_s6] sm:$0xff] }
  0x8c   :  { %v3777_v19 = vsel %vm139_vm1, 1.0, %v5030_v18 }
  0x8d   :  { %4113 = vmatprep.mubr.msk.f32.mxu0 %vm145_vm0, %v3777_v19  ;;  %v78_v19 = vld [vmem:[%s5949_s6 + $0x8] sm:$0xff] }
  0x8e   :  { %v138_v20 = vpop.permute.xlu0 %137 }
  0x8f   :  { %vm140_vm2 = vcmp.eq.s32.totalorder %v5180_v16, %v138_v20  ;;  %v79_v20 = vld [vmem:[%s5949_s6 + $0x10] sm:$0xff] }
  0x90   :  { %v3778_v21 = vsel %vm140_vm2, 1.0, %v5030_v18 }
  0x91   :  { %4114 = vmatmul.mubr.msk.f32.vlgmr.msra.gmra.mrb[0].mxu0 %vm145_vm0, %v3778_v21  ;;  %v5265_v21 = vpack.c.bf16 %v78_v19, %v77_v17 }
  0x92   :  { %4580 = vmatpush3.bf16.msra.mxu0 %v5207_v31 }
  0x93   :  { %4582 = vmatprep.subr.bf16.mxu0 %v5212_v33 }
  0x96   :  { %4584 = vmatpush3.bf16.msra.mxu0 %v5212_v33 }
 0x164   :  { %v5188_v22 = vpop.f32.mrb[0].mxu0 }
 0x165   :  { %v5190_v23 = vpop.f32.mrb[1].mxu0  ;;  %v228_v26 = vmul.f32 %v5188_v22, %v5188_v22 }
 0x166   :  { %v227_v24 = vmul.f32 %v5190_v23, %v5190_v23 }
 0x167   :  { %v233_v27 = vsel %vm229_vm3, %v228_v26, 0.0 }
 0x168   :  { %v230_v25 = vsel %vm229_vm3, %v227_v24, 0.0  ;;  %v80_v24 = vld [vmem:[%s5949_s6 + $0x18] sm:$0xff] }
 0x169   :  { %231 = vadd.xlane.f32.xlu1 %v230_v25  ;;  %v5270_v25 = vpack.c.bf16 %v80_v24, %v79_v20 }
 0x16d   :  { %234 = vadd.xlane.f32.xlu1 %v233_v27 }
 0x1f6   :  { %v232_v34 = vpop.xlane.xlu1 %231 }
 0x1f7   :  { %v237_v35 = vmul.f32 0.03125, %v232_v34 }
 0x1f9   :  { %v239_v36 = vadd.f32 1e-06, %v237_v35 }
 0x1fa   :  { %v235_v37 = vpop.xlane.xlu1 %234 }
 0x1fb   :  { %4915 = vrsqrt.f32 %v239_v36  ;;  %v238_v38 = vmul.f32 0.03125, %v235_v37 }
 0x1fd   :  { %v240_v39 = vadd.f32 1e-06, %v238_v38 }
 0x1ff   :  { %4917 = vrsqrt.f32 %v240_v39 }
 0x205   :  { %v4916_v40 = vpop.eup %4915 }
 0x206   :  { %v243_v41 = vmul.f32 %v4916_v40, %v5190_v23 }
 0x208   :  { %4124 = vmatprep.mubr.msk.f32.mxu0 %vm229_vm3, %v243_v41 }
 0x209   :  { %v4918_v42 = vpop.eup %4917 }
 0x20a   :  { %v244_v43 = vmul.f32 %v4918_v42, %v5188_v22 }
 0x20c   :  { %4125 = vmatmul.mubr.msk.f32.vlgmr.msra.gmra.mrb[2].mxu0 %vm229_vm3, %v244_v43 }
 0x2df   :  { %v4126_v44 = vpop.f32.mrb[2].mxu0 }
 0x2e0   :  { %v317_v45 = vpop.f32.mrb[3].mxu0 }
 0x2e1   :  { %v4889_v46 = vpack.i.bf16 %v4126_v44, %v317_v45  ;;  %4131 = vmatprep.mubr.msk.f32.mxu1 %vm229_vm3, %v317_v45 }
 0x2e3   :  { %4885 = vrot.lane.b32.xlu0 %v4889_v46, %s5031_s5 }
 0x355   :  { %v4886_v47 = vpop.permute.xlu0 %4885 }
 0x356   :  { %v4888_v48 = vunpack.i.h.bf16 %v4886_v47  ;;  %v4887_v49 = vunpack.i.l.bf16 %v4886_v47 }
 0x358   :  { %v4585_v51 = vpack.c.bf16 %v4888_v48, %v4887_v49  ;;  %v82_v48 = vld [vmem:[%s5950_s7 + $0x8] sm:$0xff] }
 0x35a   :  { %4587 = vmatprep.subr.msk.bf16.mxu1 %vm5226_vm4, %v4585_v51 }
 0x35b   :  { %4590 = vmatpush3.bf16.xpose.msk.msra.mxu1 %vm5226_vm4, %v4585_v51  ;;  %v83_v51 = vld [vmem:[%s5950_s7 + $0x10] sm:$0xff] }
 0x35c   :  { %4596 = vmatprep.subr.bf16.mxu1 %v5265_v21  ;;  %v5310_v55 = vpack.c.bf16 %v84_v52, %v83_v51 }
 0x362   :  { %4132 = vmatmul.mubr.msk.f32.vlgmr.msra.gmra.mrb[0].mxu1 %vm229_vm3, %v4126_v44 }
 0x363   :  { %4598 = vmatpush3.bf16.msra.mxu1 %v5265_v21 }
 0x364   :  { %4600 = vmatprep.subr.bf16.mxu1 %v5270_v25 }
 0x367   :  { %4602 = vmatpush3.bf16.msra.mxu1 %v5270_v25 }
 0x435   :  { %v4133_v57 = vpop.f32.mrb[0].mxu1 }
 0x436   :  { %v416_v58 = vmul.f32 0.17677669, %v4133_v57  ;;  %v406_v59 = vpop.f32.mrb[1].mxu1  ;;  %v5033_v57 = vmov 0.0|0.0  }
 0x437   :  { %v415_v60 = vmul.f32 0.17677669, %v406_v59  ;;  %v86_v59 = vld [vmem:[%s5951_s8 + $0x8] sm:$0xff] }
 0x438   :  { %v424_v61 = vsel %vm422_vm6, %v416_v58, -1e+09  ;;  %v85_v58 = vld [vmem:[%s5951_s8] sm:$0xff] }
 0x439   :  { %v429_v62 = vsel %vm425_vm7, %v424_v61, -inf  ;;  %v423_v63 = vsel %vm422_vm6, %v415_v60, -1e+09  ;;  %v87_v60 = vld [vmem:[%s5951_s8 + $0x10] sm:$0xff] }
 0x43a   :  { %430 = vmax.xlane.f32.xlu0 %v429_v62  ;;  %v426_v0 = vsel %vm425_vm7, %v423_v63, -inf  ;;  %v88_v62 = vld [vmem:[%s5951_s8 + $0x18] sm:$0xff] }
 0x43b   :  { %427 = vmax.xlane.f32.xlu1 %v426_v0  ;;  %v89_v0 = vld [vmem:[%s5951_s8 + $0x20] sm:$0xff] }
 0x4c7   :  { %v431_v1 = vpop.xlane.xlu0 %430 }
 0x4c8   :  { %v433_v3 = vsub.f32 %v424_v61, %v431_v1  ;;  %v428_v4 = vpop.xlane.xlu1 %427  ;;  %v5325_v61 = vpack.c.bf16 %v86_v59, %v85_v58  ;;  %v90_v1 = vld [vmem:[%s5951_s8 + $0x28] sm:$0xff] }
 0x4c9   :  { %v432_v5 = vsub.f32 %v423_v63, %v428_v4  ;;  %v5330_v63 = vpack.c.bf16 %v88_v62, %v87_v60 }
 0x4ca   :  { %v436_v6 = vmul.f32 1.442695, %v433_v3  ;;  %4612 = vmatprep.subr.bf16.mxu1 %v5325_v61  ;;  %v5341_v3 = vpack.c.bf16 %v90_v1, %v89_v0 }
 0x4cb   :  { %v434_v9 = vmul.f32 1.442695, %v432_v5 }
 0x4cc   :  { %4919 = vpow2.f32 %v436_v6 }
 0x4cd   :  { %4921 = vpow2.f32 %v434_v9 }
 0x4d6   :  { %v4920_v10 = vpop.eup %4919 }
 0x4d7   :  { %v441_v12 = vsel %vm425_vm7, %v4920_v10, 0.0  ;;  %v4922_v13 = vpop.eup %4921 }
 0x4d8   :  { %442 = vadd.xlane.f32.xlu1 %v441_v12  ;;  %v438_v15 = vsel %vm425_vm7, %v4922_v13, 0.0 }
 0x4dc   :  { %439 = vadd.xlane.f32.xlu1 %v438_v15 }
 0x4ed   :  { %4890 = vrot.lane.b32.xlu1 %v4889_v46, %s5032_s30 }
 0x565   :  { %v443_v26 = vpop.xlane.xlu1 %442 }
 0x566   :  { %4923 = vrcp.f32 %v443_v26  ;;  %v91_v26 = vld [vmem:[%s5951_s8 + $0x30] sm:$0xff] }
 0x569   :  { %v440_v27 = vpop.xlane.xlu1 %439 }
 0x56a   :  { %4925 = vrcp.f32 %v440_v27  ;;  %v92_v27 = vld [vmem:[%s5951_s8 + $0x38] sm:$0xff] }
 0x56d   :  { %v4891_v28 = vpop.permute.xlu1 %4890 }
 0x56e   :  { %v4893_v29 = vunpack.i.h.bf16 %v4891_v28  ;;  %v4892_v30 = vunpack.i.l.bf16 %v4891_v28  ;;  %v5371_v28 = vpack.c.bf16 %v92_v27, %v91_v26 }
 0x570   :  { %v4591_v32 = vpack.c.bf16 %v4893_v29, %v4892_v30  ;;  %v4924_v34 = vpop.eup %4923 }
 0x571   :  { %v447_v37 = vmul.f32 %v4924_v34, %v4920_v10 }
 0x572   :  { %4592 = vmatprep.subr.bf16.mxu0 %v4591_v32 }
 0x573   :  { %4594 = vmatpush3.bf16.msra.mxu0 %v4591_v32 }
 0x574   :  { %v4926_v35 = vpop.eup %4925 }
 0x575   :  { %v446_v36 = vmul.f32 %v4926_v35, %v4922_v13 }
 0x577   :  { %4138 = vmatprep.mubr.msk.f32.mxu0 %vm425_vm7, %v446_v36 }
 0x578   :  { %4139 = vmatmul.mubr.msk.f32.vlgmr.msra.gmra.mrb[4].mxu0 %vm425_vm7, %v447_v37 }
 0x64b   :  { %v4140_v38 = vpop.f32.mrb[4].mxu0 }
 0x64c   :  { %v526_v39 = vpop.f32.mrb[5].mxu0 }
 0x64d   :  { %4149 = vmatprep.mubr.msk.f32.mxu1 %vm229_vm3, %v526_v39  ;;  %v93_v39 = vld [vmem:[%s5952_s9] sm:$0xff] }
 0x64e   :  { %4150 = vmatmul.mubr.msk.f32.vlgmr.msra.gmra.mrb[2].mxu1 %vm229_vm3, %v4140_v38 }
 0x64f   :  { %4614 = vmatpush3.bf16.msra.mxu1 %v5325_v61 }
 0x650   :  { %4616 = vmatprep.subr.bf16.mxu1 %v5330_v63 }
 0x653   :  { %4618 = vmatpush3.bf16.msra.mxu1 %v5330_v63 }
 0x654   :  { %4620 = vmatprep.subr.bf16.mxu1 %v5341_v3 }
 0x657   :  { %4622 = vmatpush3.bf16.msra.mxu1 %v5341_v3 }
 0x658   :  { %4624 = vmatprep.subr.bf16.mxu1 %v5371_v28 }
 0x65b   :  { %4626 = vmatpush3.bf16.msra.mxu1 %v5371_v28 }
 0x65c   :  { %4639 = vmatprep.subr.bf16.mxu1 %v5033_v57 }
 0x721   :  { %v4151_v40 = vpop.f32.mrb[2].mxu1 }
 0x722   :  { %v5281_v41 = vadd.f32 %v4151_v40, %v5188_v22  ;;  %v607_v42 = vpop.f32.mrb[3].mxu1  ;;  %v61_v22 = vld [vmem:[%s5972_s24] sm:$0xff]  ;;  %v94_v40 = vld [vmem:[%s5952_s9 + $0x8] sm:$0xff] }
 0x723   :  { %v5284_v43 = vadd.f32 %v607_v42, %v5190_v23  ;;  %v81_v23 = vld [vmem:[%s5950_s7] sm:$0xff]  ;;  %v95_v42 = vld [vmem:[%s5952_s9 + $0x10] sm:$0xff]  ;;  %s5035_s7 = smov 1.0  }
 0x724   :  { %v619_v44 = vmul.f32 %v5281_v41, %v5281_v41  ;;  %v5301_v49 = vpack.c.bf16 %v82_v48, %v81_v23 }
 0x725   :  { %v618_v45 = vmul.f32 %v5284_v43, %v5284_v43 }
 0x726   :  { %v623_v46 = vsel %vm229_vm3, %v619_v44, 0.0  ;;  %4604 = vmatprep.subr.bf16.mxu0 %v5301_v49  ;;  %v5394_v44 = vpack.c.bf16 %v94_v40, %v93_v39 }
 0x727   :  { %624 = vadd.xlane.f32.xlu0 %v623_v46  ;;  %v620_v47 = vsel %vm229_vm3, %v618_v45, 0.0  ;;  %4606 = vmatpush3.bf16.msra.mxu0 %v5301_v49  ;;  %v96_v45 = vld [vmem:[%s5952_s9 + $0x18] sm:$0xff] }
 0x728   :  { %621 = vadd.xlane.f32.xlu1 %v620_v47  ;;  %4608 = vmatprep.subr.bf16.mxu0 %v5310_v55  ;;  %v5400_v46 = vpack.c.bf16 %v96_v45, %v95_v42 }
 0x72b   :  { %4610 = vmatpush3.bf16.msra.mxu0 %v5310_v55 }
 0x72c   :  { %4627 = vmatprep.subr.bf16.mxu0 %v5033_v57 }
 0x73d   :  { %819 = vperm.xlu0 %4883, %v61_v22  }
 0x7b4   :  { %v625_v4 = vpop.xlane.xlu0 %624 }
 0x7b5   :  { %v627_v5 = vmul.f32 0.03125, %v625_v4  ;;  %v622_v6 = vpop.xlane.xlu1 %621 }
 0x7b6   :  { %v626_v9 = vmul.f32 0.03125, %v622_v6 }
 0x7b7   :  { %v629_v10 = vadd.f32 1e-06, %v627_v5 }
 0x7b8   :  { %v628_v12 = vadd.f32 1e-06, %v626_v9 }
 0x7b9   :  { %4927 = vrsqrt.f32 %v629_v10 }
 0x7ba   :  { %4929 = vrsqrt.f32 %v628_v12 }
 0x7bc   :  { %v820_v20 = vpop.permute.xlu0 %819 }
 0x7bd   :  { %vm821_vm9 = vcmp.eq.s32.totalorder %v5180_v16, %v820_v20 }
 0x7be   :  { %v3795_v24 = vsel %vm821_vm9, 1.0, %v5030_v18  ;;  %vm3753_vm9 = vcmask 0  }
 0x7c3   :  { %v4928_v13 = vpop.eup %4927 }
 0x7c4   :  { %v4930_v15 = vpop.eup %4929  ;;  %v633_v19 = vmul.f32 %v4928_v13, %v5281_v41 }
 0x7c5   :  { %v632_v17 = vmul.f32 %v4930_v15, %v5284_v43 }
 0x7c7   :  { %4160 = vmatprep.mubr.msk.f32.mxu0 %vm229_vm3, %v632_v17 }
 0x7c8   :  { %4161 = vmatmul.mubr.msk.f32.vlgmr.msra.gmra.mrb[6].mxu0 %vm229_vm3, %v633_v19 }
 0x7c9   :  { %4629 = vmatpush3.bf16.msra.mxu0 %v5152_v7  ;;  %4198 = vmatprep.mubr.msk.f32.mxu0 %vm5034_vm8, %v5030_v18 }
 0x7ca   :  { %4630 = vmatprep.subr.bf16.mxu0 %v5033_v57 }
 0x7cd   :  { %4632 = vmatpush3.bf16.msra.mxu0 %v5154_v8 }
 0x7ce   :  { %4633 = vmatprep.subr.bf16.mxu0 %v5033_v57 }
 0x7d1   :  { %4635 = vmatpush3.bf16.msra.mxu0 %v5165_v11 }
 0x7d2   :  { %4636 = vmatprep.subr.bf16.mxu0 %v5033_v57 }
 0x7d5   :  { %4638 = vmatpush3.bf16.msra.mxu0 %v5175_v14 }
 0x7d6   :  { %4212 = vmatprep.subr.mxu0 %v5030_v18 }
 0x7d8   :  { %4199 = vmatmul.mubr.msk.f32.vlgmr.msra.gmra.mrb[8].mxu0 %vm145_vm0, %v3795_v24 }
 0x7d9   :  { %4214 = vmatprep.mubr.msk.f32.mxu0 %vm5034_vm8, %v5030_v18 }
 0x89b   :  { %v4162_v29 = vpop.f32.mrb[6].mxu0 }
 0x89c   :  { %v706_v30 = vpop.f32.mrb[7].mxu0  ;;  %v716_v34 = vmax.f32 %v4162_v29, 0.0 }
 0x89d   :  { %v715_v32 = vmax.f32 %v706_v30, 0.0 }
 0x89f   :  { %4179 = vmatprep.mubr.msk.f32.mxu1 %vm145_vm0, %v715_v32 }
 0x8a0   :  { %4180 = vmatmul.mubr.msk.f32.vlgmr.msra.gmra.mrb[4].mxu1 %vm145_vm0, %v716_v34 }
 0x8a1   :  { %4209 = vmatprep.mubr.msk.f32.mxu1 %vm5034_vm8, %v5030_v18  ;;  %4641 = vmatpush3.bf16.msra.mxu1 %v5394_v44 }
 0x8a2   :  { %4642 = vmatprep.subr.bf16.mxu1 %v5033_v57 }
 0x8a5   :  { %4644 = vmatpush3.bf16.msra.mxu1 %v5400_v46 }
 0x8a6   :  { %4645 = vmatprep.subr.bf16.mxu1 %v5033_v57 }
 0x8ab   :  { %v5380_v35 = vpop.f32.mrb[8].mxu0 }
 0x8ac   :  { %v4200_v36 = vpop.f32.mrb[9].mxu0  ;;  %v897_v37 = vmul.f32 %v5380_v35, %v5380_v35 }
 0x8ad   :  { %v97_v36 = vld [vmem:[%s5953_s10] sm:$0xff] }
 0x8ae   :  { %v898_v38 = vsel %vm229_vm3, %v897_v37, 0.0  ;;  %v98_v37 = vld [vmem:[%s5953_s10 + $0x8] sm:$0xff] }
 0x8af   :  { %899 = vadd.xlane.f32.xlu0 %v898_v38  ;;  %v99_v38 = vld [vmem:[%s5953_s10 + $0x10] sm:$0xff]  ;;  %v5440_v39 = vpack.c.bf16 %v98_v37, %v97_v36 }
 0x93c   :  { %v900_v47 = vpop.xlane.xlu0 %899 }
 0x93d   :  { %v901_v22 = vmul.f32 0.03125, %v900_v47 }
 0x93f   :  { %v902_v23 = vadd.f32 1e-06, %v901_v22 }
 0x941   :  { %4931 = vrsqrt.f32 %v902_v23 }
 0x94b   :  { %v4932_v48 = vpop.eup %4931 }
 0x94c   :  { %v904_v51 = vmul.f32 %v4932_v48, %v5380_v35 }
 0x94e   :  { %4210 = vmatmul.mubr.msk.f32.vlgmr.msra.gmra.mrb[6].mxu1 %vm229_vm3, %v904_v51 }
 0x94f   :  { %4230 = vmatprep.mubr.msk.f32.mxu1 %vm5034_vm8, %v5030_v18  ;;  %4647 = vmatpush3.bf16.msra.mxu1 %v5440_v39 }
 0x950   :  { %4648 = vmatprep.subr.bf16.mxu1 %v5033_v57 }
 0x973   :  { %v4181_v52 = vpop.f32.mrb[4].mxu1 }
 0x974   :  { %v789_v58 = vpop.f32.mrb[5].mxu1  ;;  %v799_v0 = vadd.f32 %v4181_v52, %v5281_v41 }
 0x975   :  { %v798_v30 = vadd.f32 %v789_v58, %v5284_v43  ;;  %v100_v43 = vld [vmem:[%s5953_s10 + $0x18] sm:$0xff] }
 0x976   :  { %v801_v10 = vmul.f32 %v799_v0, %v799_v0  ;;  %v5446_v40 = vpack.c.bf16 %v100_v43, %v99_v38 }
 0x977   :  { %v800_v32 = vmul.f32 %v798_v30, %v798_v30 }
 0x978   :  { %v805_v12 = vsel %vm229_vm3, %v801_v10, 0.0  ;;  %4650 = vmatpush3.bf16.msra.mxu1 %v5446_v40 }
 0x979   :  { %v802_v34 = vsel %vm229_vm3, %v800_v32, 0.0 }
 0xa21   :  { %v974_v59 = vpop.f32.mrb[6].mxu1 }
 0xa22   :  { %979 = vrot.lane.b32.xlu1 %v974_v59, %s5031_s5  ;;  %v4211_v60 = vpop.f32.mrb[7].mxu1 }
 0xa23   :  { %v106_v60 = vld [vmem:[%s5955_s12 + $0x8] sm:$0xff] }
 0xa94   :  { %v980_v62 = vpop.permute.xlu1 %979 }
 0xa95   :  { %4213 = vmatpush3.xpose.msk.msra.mxu0 %vm229_vm3, %v980_v62 }
 0xa96   :  { %4217 = vmatprep.subr.mxu0 %v5030_v18 }
 0xa98   :  { %4215 = vmatmul.mubr.msk.f32.vlgmr.msra.gmra.mrb[10].mxu0 %vm229_vm3, %v974_v59 }
 0xa99   :  { %4219 = vmatprep.mubr.msk.f32.mxu0 %vm5034_vm8, %v5030_v18 }
 0xb6b   :  { %v1051_v1 = vpop.f32.mrb[10].mxu0 }
 0xb6c   :  { %v1055_v4 = vmul.f32 0.17677669, %v1051_v1  ;;  %v4216_v5 = vpop.f32.mrb[11].mxu0  ;;  %v108_v1 = vld [vmem:[%s5955_s12 + $0x18] sm:$0xff] }
 0xb6e   :  { %v1056_v6 = vsel %vm130_vm10, %v1055_v4, -1e+09 }
 0xb6f   :  { %v1058_v9 = vsel %vm1057_vm11, %v1056_v6, -inf }
 0xb70   :  { %1059 = vmax.xlane.f32.xlu1 %v1058_v9 }
 0xb74   :  { %806 = vadd.xlane.f32.xlu1 %v805_v12 }
 0xbfd   :  { %v1060_v13 = vpop.xlane.xlu1 %1059 }
 0xbfe   :  { %v1061_v41 = vsub.f32 %v1056_v6, %v1060_v13 }
 0xc00   :  { %v1062_v15 = vmul.f32 1.442695, %v1061_v41 }
 0xc01   :  { %v807_v17 = vpop.xlane.xlu1 %806 }
 0xc02   :  { %4933 = vpow2.f32 %v1062_v15  ;;  %v809_v19 = vmul.f32 0.03125, %v807_v17 }
 0xc04   :  { %v811_v20 = vadd.f32 1e-06, %v809_v19 }
 0xc06   :  { %4935 = vrsqrt.f32 %v811_v20 }
 0xc0c   :  { %v4934_v24 = vpop.eup %4933 }
 0xc0d   :  { %v1064_v26 = vsel %vm1057_vm11, %v4934_v24, 0.0 }
 0xc0e   :  { %1065 = vadd.xlane.f32.xlu0 %v1064_v26 }
 0xc10   :  { %v4936_v27 = vpop.eup %4935 }
 0xc11   :  { %v815_v29 = vmul.f32 %v4936_v27, %v799_v0  ;;  %v107_v0 = vld [vmem:[%s5955_s12 + $0x10] sm:$0xff] }
 0xc12   :  { %v5473_v4 = vpack.c.bf16 %v108_v1, %v107_v0  ;;  %v103_v27 = vld [vmem:[%s5954_s11 + $0x10] sm:$0xff]  ;;  %v109_v0 = vld [vmem:[%s5956_s13] sm:$0xff] }
 0xc13   :  { %817 = vst.msk [vmem:[%s5961_s18 + $0x8] sm:$0xff] %vm229_vm3, %v815_v29  ;;  %v111_v1 = vld [vmem:[%s5956_s13 + $0x10] sm:$0xff] }
 0xc24   :  { %1069 = vrot.lane.b32.xlu0 %v974_v59, %s5032_s30  ;;  %v105_v59 = vld [vmem:[%s5955_s12] sm:$0xff] }
 0xc25   :  { %v5464_v62 = vpack.c.bf16 %v106_v60, %v105_v59 }
 0xc27   :  { %4658 = vmatprep.subr.bf16.mxu1 %v5464_v62 }
 0xc43   :  { %803 = vadd.xlane.f32.xlu0 %v802_v34 }
 0xc9b   :  { %v1066_v42 = vpop.xlane.xlu0 %1065 }
 0xc9c   :  { %4937 = vrcp.f32 %v1066_v42 }
 0xc9f   :  { %v1070_v45 = vpop.permute.xlu0 %1069 }
 0xca0   :  { %4218 = vmatpush3.msra.mxu0 %v1070_v45 }
 0xca1   :  { %4651 = vmatprep.subr.bf16.mxu0 %v5033_v57 }
 0xca6   :  { %v4938_v47 = vpop.eup %4937 }
 0xca7   :  { %v1068_v22 = vmul.f32 %v4938_v47, %v4934_v24  ;;  %v101_v24 = vld [vmem:[%s5954_s11] sm:$0xff] }
 0xca9   :  { %4220 = vmatmul.mubr.msk.f32.vlgmr.msra.gmra.mrb[12].mxu0 %vm1057_vm11, %v1068_v22 }
 0xcaa   :  { %4241 = vmatprep.mubr.msk.f32.mxu0 %vm5034_vm8, %v5030_v18 }
 0xcd0   :  { %v804_v23 = vpop.xlane.xlu0 %803 }
 0xcd1   :  { %v808_v48 = vmul.f32 0.03125, %v804_v23 }
 0xcd3   :  { %v810_v51 = vadd.f32 1e-06, %v808_v48 }
 0xcd5   :  { %4939 = vrsqrt.f32 %v810_v51 }
 0xcdf   :  { %v4940_v52 = vpop.eup %4939 }
 0xce0   :  { %v814_v58 = vmul.f32 %v4940_v52, %v798_v30 }
 0xce2   :  { %816 = vst.msk [vmem:[%s5961_s18] sm:$0xff] %vm229_vm3, %v814_v58 }
 0xd7c   :  { %v1141_v5 = vpop.f32.mrb[12].mxu0 }
 0xd7d   :  { %v4221_v6 = vpop.f32.mrb[13].mxu0  ;;  %4231 = vmatmul.mubr.msk.f32.vlgmr.msra.gmra.mrb[8].mxu1 %vm229_vm3, %v1141_v5  ;;  %v5534_v5 = vpack.c.bf16 %v110_v56, %v109_v0  ;;  %v122_v0 = vld [vmem:[%s5958_s15 + $0x28] sm:$0xff] }
 0xd7e   :  { %4660 = vmatpush3.bf16.msra.mxu1 %v5464_v62  ;;  %4252 = vmatprep.mubr.msk.f32.mxu1 %vm229_vm3, %v814_v58  ;;  %v112_v6 = vld [vmem:[%s5956_s13 + $0x18] sm:$0xff] }
 0xd7f   :  { %4662 = vmatprep.subr.bf16.mxu1 %v5473_v4 }
 0xd82   :  { %4664 = vmatpush3.bf16.msra.mxu1 %v5473_v4 }
 0xd83   :  { %4669 = vmatprep.subr.bf16.mxu1 %v5033_v57 }
 0xd85   :  { %4253 = vmatmul.mubr.msk.f32.vlgmr.msra.gmra.mrb[10].mxu1 %vm229_vm3, %v815_v29  ;;  %v104_v29 = vld [vmem:[%s5954_s11 + $0x18] sm:$0xff] }
 0xd86   :  { %4266 = vmatprep.mubr.msk.f32.mxu1 %vm5034_vm8, %v5030_v18  ;;  %v5505_v30 = vpack.c.bf16 %v104_v29, %v103_v27 }
 0xe50   :  { %v1214_v9 = vpop.f32.mrb[8].mxu1 }
 0xe51   :  { %v5485_v10 = vadd.f32 %v1214_v9, %v5380_v35  ;;  %v4232_v12 = vpop.f32.mrb[9].mxu1  ;;  %v102_v35 = vld [vmem:[%s5954_s11 + $0x8] sm:$0xff]  ;;  %v5540_v9 = vpack.c.bf16 %v112_v6, %v111_v1  ;;  %v123_v1 = vld [vmem:[%s5958_s15 + $0x30] sm:$0xff]  ;;  %v124_v6 = vld [vmem:[%s5958_s15 + $0x38] sm:$0xff] }
 0xe52   :  { %v5496_v26 = vpack.c.bf16 %v102_v35, %v101_v24 }
 0xe53   :  { %v1219_v13 = vmul.f32 %v5485_v10, %v5485_v10 }
 0xe54   :  { %4653 = vmatpush3.bf16.msra.mxu0 %v5496_v26 }
 0xe55   :  { %v1220_v41 = vsel %vm229_vm3, %v1219_v13, 0.0  ;;  %4654 = vmatprep.subr.bf16.mxu0 %v5033_v57 }
 0xe56   :  { %1221 = vadd.xlane.f32.xlu1 %v1220_v41 }
 0xe58   :  { %v4254_v15 = vpop.f32.mrb[10].mxu1  ;;  %4656 = vmatpush3.bf16.msra.mxu0 %v5505_v30 }
 0xe59   :  { %v1372_v17 = vpop.f32.mrb[11].mxu1  ;;  %4665 = vmatprep.subr.bf16.mxu0 %v5033_v57 }
 0xe5a   :  { %v4894_v19 = vpack.i.bf16 %v4254_v15, %v1372_v17  ;;  %v4666_v20 = vpack.c.bf16 %v4254_v15, %v1372_v17 }
 0xee3   :  { %v1222_v32 = vpop.xlane.xlu1 %1221 }
 0xee4   :  { %v1223_v34 = vmul.f32 0.03125, %v1222_v32 }
 0xee6   :  { %v1224_v36 = vadd.f32 1e-06, %v1223_v34 }
 0xee8   :  { %4941 = vrsqrt.f32 %v1224_v36 }
 0xef2   :  { %v4942_v37 = vpop.eup %4941 }
 0xef3   :  { %v1226_v38 = vmul.f32 %v4942_v37, %v5485_v10  ;;  %v60_v37 = vld [vmem:[%s5968_s29 + $0x18] sm:$0xff] }
 0xef5   :  { %4242 = vmatmul.mubr.msk.f32.vlgmr.msra.gmra.mrb[14].mxu0 %vm229_vm3, %v1226_v38  ;;  %v113_v38 = vld [vmem:[%s5957_s14] sm:$0xff] }
 0xef6   :  { %4668 = vmatpush3.bf16.xpose.msk.msra.mxu0 %vm5226_vm4, %v4666_v20  ;;  %4259 = vmatprep.mubr.msk.f32.mxu0 %vm5034_vm8, %v5030_v18 }
 0xef7   :  { %4672 = vmatprep.subr.bf16.mxu0 %v5033_v57 }
 0xfc8   :  { %v1296_v43 = vpop.f32.mrb[14].mxu0 }
 0xfc9   :  { %v4243_v42 = vpop.f32.mrb[15].mxu0  ;;  %4260 = vmatmul.mubr.msk.f32.vlgmr.msra.gmra.mrb[16].mxu0 %vm229_vm3, %v1296_v43 }
 0xfca   :  { %4277 = vmatprep.mubr.msk.f32.mxu0 %vm5034_vm8, %v5030_v18  ;;  %4674 = vmatpush3.bf16.msra.mxu0 %v5534_v5  ;;  %v115_v42 = vld [vmem:[%s5957_s14 + $0x10] sm:$0xff] }
 0xfcb   :  { %4675 = vmatprep.subr.bf16.mxu0 %v5033_v57 }
 0xfce   :  { %4677 = vmatpush3.bf16.msra.mxu0 %v5540_v9 }
 0xfcf   :  { %4684 = vmatprep.subr.bf16.mxu0 %v5033_v57 }
0x109c   :  { %v1456_v45 = vpop.f32.mrb[16].mxu0 }
0x109d   :  { %v1460_v47 = vmul.f32 0.17677669, %v1456_v45  ;;  %v4261_v22 = vpop.f32.mrb[17].mxu0  ;;  %v116_v45 = vld [vmem:[%s5957_s14 + $0x18] sm:$0xff] }
0x109e   :  { %v59_v22 = vld [vmem:[%s5968_s29 + $0x10] sm:$0xff]  ;;  %s3761_s29 = sshll.u32 %s5036_s26, 4  ;;  %s3762_s29 = int_to_ptr.vmem [resolvable:$true] %s3761_s29 }
0x109f   :  { %v1461_v23 = vsel %vm422_vm6, %v1460_v47, -1e+09  ;;  %v5576_v47 = vpack.c.bf16 %v116_v45, %v115_v42  ;;  %s5005_s9 = scalar_lea.vmem %s3762_s29, 16  ;;  %s5009_s0 = scalar_lea.vmem %s3762_s29, 32 }
0x10a0   :  { %v1462_v48 = vsel %vm425_vm7, %v1461_v23, -inf  ;;  %p5006_p0 = scmp.ne.s32.totalorder %s3762_s29, %s5005_s9  ;;  %p5010_p1 = scmp.lt.s32.totalorder %s3762_s29, %s3762_s29 }
0x10a1   :  { %1463 = vmax.xlane.f32.xlu1 %v1462_v48  ;;  %v118_v48 = vld [vmem:[%s5958_s15 + $0x8] sm:$0xff]  ;;  %p5011_p2 = scmp.lt.s32.totalorder %s5009_s0, %s5005_s9 }
0x10a3   :  { %p5012_p3 = por %p5011_p2, %p5010_p1 }
0x10a5   :  { %p5013_p4 = pnand %p5012_p3, %p5006_p0 }
0x112e   :  { %v1464_v51 = vpop.xlane.xlu1 %1463 }
0x112f   :  { %v1465_v52 = vsub.f32 %v1461_v23, %v1464_v51  ;;  %v117_v23 = vld [vmem:[%s5958_s15] sm:$0xff] }
0x1130   :  { %v5590_v51 = vpack.c.bf16 %v118_v48, %v117_v23 }
0x1131   :  { %v1466_v58 = vmul.f32 1.442695, %v1465_v52  ;;  %v119_v52 = vld [vmem:[%s5958_s15 + $0x10] sm:$0xff] }
0x1133   :  { %4943 = vpow2.f32 %v1466_v58  ;;  %v120_v58 = vld [vmem:[%s5958_s15 + $0x18] sm:$0xff] }
0x113d   :  { %v4944_v59 = vpop.eup %4943 }
0x113e   :  { %v1468_v60 = vsel %vm425_vm7, %v4944_v59, 0.0 }
0x113f   :  { %1469 = vadd.xlane.f32.xlu1 %v1468_v60  ;;  %v121_v60 = vld [vmem:[%s5958_s15 + $0x20] sm:$0xff] }
0x1140   :  { %v5609_v56 = vpack.c.bf16 %v122_v0, %v121_v60 }
0x1150   :  { %4895 = vrot.lane.b32.xlu1 %v4894_v19, %s5031_s5 }
0x1154   :  { %1957 = vperm.xlu1 %4899, %v59_v22  }
0x11cc   :  { %v1470_v12 = vpop.xlane.xlu1 %1469 }
0x11cd   :  { %4945 = vrcp.f32 %v1470_v12  ;;  %v5619_v12 = vpack.c.bf16 %v124_v6, %v123_v1 }
0x11d0   :  { %v4896_v13 = vpop.permute.xlu1 %4895 }
0x11d1   :  { %v4898_v41 = vunpack.i.h.bf16 %v4896_v13  ;;  %v4897_v15 = vunpack.i.l.bf16 %v4896_v13 }
0x11d3   :  { %v4670_v17 = vpack.c.bf16 %v4898_v41, %v4897_v15 }
0x11d5   :  { %4671 = vmatpush3.bf16.msra.mxu1 %v4670_v17 }
0x11d6   :  { %4678 = vmatprep.subr.bf16.mxu1 %v5033_v57 }
0x11d7   :  { %v4946_v19 = vpop.eup %4945 }
0x11d8   :  { %v1472_v20 = vmul.f32 %v4946_v19, %v4944_v59  ;;  %v5599_v59 = vpack.c.bf16 %v120_v58, %v119_v52 }
0x11da   :  { %4267 = vmatmul.mubr.msk.f32.vlgmr.msra.gmra.mrb[12].mxu1 %vm425_vm7, %v1472_v20  ;;  %v1958_v20 = vpop.permute.xlu1 %1957 }
0x11db   :  { %4288 = vmatprep.mubr.msk.f32.mxu1 %vm5034_vm8, %v5030_v18  ;;  %vm1962_vm12 = vcmp.eq.s32.totalorder %v5180_v16, %v1958_v20 }
0x12ad   :  { %v1548_v24 = vpop.f32.mrb[12].mxu1 }
0x12ae   :  { %v4268_v35 = vpop.f32.mrb[13].mxu1  ;;  %4278 = vmatmul.mubr.msk.f32.vlgmr.msra.gmra.mrb[18].mxu0 %vm229_vm3, %v1548_v24 }
0x12af   :  { %4307 = vmatprep.mubr.msk.f32.mxu0 %vm5034_vm8, %v5030_v18  ;;  %4686 = vmatpush3.bf16.msra.mxu0 %v5590_v51 }
0x12b0   :  { %4687 = vmatprep.subr.bf16.mxu0 %v5033_v57 }
0x12b3   :  { %4689 = vmatpush3.bf16.msra.mxu0 %v5599_v59 }
0x12b4   :  { %4690 = vmatprep.subr.bf16.mxu0 %v5033_v57 }
0x12b7   :  { %4692 = vmatpush3.bf16.msra.mxu0 %v5609_v56 }
0x12b8   :  { %4693 = vmatprep.subr.bf16.mxu0 %v5033_v57 }
0x12bb   :  { %4695 = vmatpush3.bf16.msra.mxu0 %v5619_v12 }
0x12bc   :  { %4713 = vmatprep.subr.bf16.mxu0 %v5152_v7 }
0x1381   :  { %v1621_v27 = vpop.f32.mrb[18].mxu0 }
0x1382   :  { %v5553_v29 = vadd.f32 %v1621_v27, %v5485_v10  ;;  %v4279_v32 = vpop.f32.mrb[19].mxu0  ;;  %v114_v10 = vld [vmem:[%s5957_s14 + $0x8] sm:$0xff] }
0x1383   :  { %v5567_v43 = vpack.c.bf16 %v114_v10, %v113_v38  ;;  %v3823_v32 = vsel %vm1962_vm12, 1.0, %v5030_v18 }
0x1384   :  { %v1626_v34 = vmul.f32 %v5553_v29, %v5553_v29 }
0x1385   :  { %4680 = vmatpush3.bf16.msra.mxu1 %v5567_v43 }
0x1386   :  { %v1627_v36 = vsel %vm229_vm3, %v1626_v34, 0.0  ;;  %4681 = vmatprep.subr.bf16.mxu1 %v5033_v57 }
0x1387   :  { %1628 = vadd.xlane.f32.xlu0 %v1627_v36 }
0x1389   :  { %4683 = vmatpush3.bf16.msra.mxu1 %v5576_v47 }
0x138a   :  { %4696 = vmatprep.subr.bf16.mxu1 %v5033_v57 }
0x139d   :  { %1960 = vperm.xlu0 %4883, %v60_v37  }
0x1414   :  { %v1629_v13 = vpop.xlane.xlu0 %1628 }
0x1415   :  { %v1630_v41 = vmul.f32 0.03125, %v1629_v13 }
0x1417   :  { %v1631_v15 = vadd.f32 1e-06, %v1630_v41 }
0x1419   :  { %4947 = vrsqrt.f32 %v1631_v15 }
0x141c   :  { %v1961_v34 = vpop.permute.xlu0 %1960 }
0x141d   :  { %vm1963_vm13 = vcmp.eq.s32.totalorder %v5180_v16, %v1961_v34 }
0x141e   :  { %v3824_v36 = vsel %vm1963_vm13, 1.0, %v5030_v18 }
0x1423   :  { %v4948_v17 = vpop.eup %4947 }
0x1424   :  { %v1633_v19 = vmul.f32 %v4948_v17, %v5553_v29 }
0x1426   :  { %4289 = vmatmul.mubr.msk.f32.vlgmr.msra.gmra.mrb[14].mxu1 %vm229_vm3, %v1633_v19 }
0x1427   :  { %4699 = vmatpush3.bf16.xpose.msk.msra.mxu1 %vm5226_vm4, %v5152_v7  ;;  %4326 = vmatprep.mubr.msk.f32.mxu1 %vm5034_vm8, %v5030_v18 }
0x1428   :  { %4700 = vmatprep.subr.bf16.mxu1 %v5033_v57 }
0x142f   :  { %4703 = vmatpush3.bf16.xpose.msk.msra.mxu1 %vm5226_vm4, %v5154_v8 }
0x1430   :  { %4704 = vmatprep.subr.bf16.mxu1 %v5033_v57 }
0x1437   :  { %4707 = vmatpush3.bf16.xpose.msk.msra.mxu1 %vm5226_vm4, %v5165_v11 }
0x1438   :  { %4708 = vmatprep.subr.bf16.mxu1 %v5033_v57 }
0x143f   :  { %4711 = vmatpush3.bf16.xpose.msk.msra.mxu1 %vm5226_vm4, %v5175_v14 }
0x14f9   :  { %v1703_v24 = vpop.f32.mrb[14].mxu1 }
0x14fa   :  { %v1707_v35 = vmax.f32 %v1703_v24, 0.0  ;;  %v4290_v27 = vpop.f32.mrb[15].mxu1 }
0x14fc   :  { %4308 = vmatmul.mubr.msk.f32.vlgmr.msra.gmra.mrb[20].mxu0 %vm145_vm0, %v1707_v35 }
0x14fd   :  { %4715 = vmatpush3.bf16.msra.mxu0 %v5152_v7  ;;  %4345 = vmatprep.mubr.msk.f32.mxu0 %vm145_vm0, %v3823_v32 }
0x14fe   :  { %4717 = vmatprep.subr.bf16.mxu0 %v5154_v8 }
0x1501   :  { %4719 = vmatpush3.bf16.msra.mxu0 %v5154_v8 }
0x1502   :  { %4721 = vmatprep.subr.bf16.mxu0 %v5165_v11 }
0x1505   :  { %4723 = vmatpush3.bf16.msra.mxu0 %v5165_v11 }
0x1506   :  { %4725 = vmatprep.subr.bf16.mxu0 %v5175_v14 }
0x1509   :  { %4727 = vmatpush3.bf16.msra.mxu0 %v5175_v14 }
0x150a   :  { %4729 = vmatprep.subr.bf16.mxu0 %v5207_v31 }
0x150c   :  { %4346 = vmatmul.mubr.msk.f32.vlgmr.msra.gmra.mrb[22].mxu0 %vm145_vm0, %v3824_v36 }
0x150d   :  { %4731 = vmatpush3.bf16.msra.mxu0 %v5207_v31 }
0x150e   :  { %4733 = vmatprep.subr.bf16.mxu0 %v5212_v33 }
0x1511   :  { %4735 = vmatpush3.bf16.msra.mxu0 %v5212_v33 }
0x15cf   :  { %v1777_v37 = vpop.f32.mrb[20].mxu0 }
0x15d0   :  { %v4309_v38 = vpop.f32.mrb[21].mxu0  ;;  %v1781_v10 = vadd.f32 %v1777_v37, %v5553_v29 }
0x15d2   :  { %v1782_v33 = vmul.f32 %v1781_v10, %v1781_v10 }
0x15d4   :  { %v1783_v52 = vsel %vm229_vm3, %v1782_v33, 0.0 }
0x15df   :  { %v5662_v42 = vpop.f32.mrb[22].mxu0 }
0x15e0   :  { %v5664_v45 = vpop.f32.mrb[23].mxu0  ;;  %v2050_v22 = vmul.f32 %v5662_v42, %v5662_v42 }
0x15e1   :  { %v2049_v23 = vmul.f32 %v5664_v45, %v5664_v45 }
0x15e2   :  { %v2054_v31 = vsel %vm229_vm3, %v2050_v22, 0.0 }
0x15e3   :  { %2055 = vadd.xlane.f32.xlu0 %v2054_v31  ;;  %v2051_v48 = vsel %vm229_vm3, %v2049_v23, 0.0 }
0x15e4   :  { %2052 = vadd.xlane.f32.xlu1 %v2051_v48 }
0x15e8   :  { %1784 = vadd.xlane.f32.xlu1 %v1783_v52 }
0x1670   :  { %v2056_v29 = vpop.xlane.xlu0 %2055 }
0x1671   :  { %v2058_v58 = vmul.f32 0.03125, %v2056_v29  ;;  %v2053_v60 = vpop.xlane.xlu1 %2052 }
0x1672   :  { %v2057_v0 = vmul.f32 0.03125, %v2053_v60 }
0x1673   :  { %v2060_v1 = vadd.f32 1e-06, %v2058_v58 }
0x1674   :  { %v2059_v6 = vadd.f32 1e-06, %v2057_v0 }
0x1675   :  { %4949 = vrsqrt.f32 %v2060_v1  ;;  %v1785_v13 = vpop.xlane.xlu1 %1784 }
0x1676   :  { %4951 = vrsqrt.f32 %v2059_v6  ;;  %v1786_v41 = vmul.f32 0.03125, %v1785_v13 }
0x1678   :  { %v1787_v15 = vadd.f32 1e-06, %v1786_v41 }
0x167a   :  { %4953 = vrsqrt.f32 %v1787_v15 }
0x167f   :  { %v4950_v17 = vpop.eup %4949 }
0x1680   :  { %v4952_v19 = vpop.eup %4951  ;;  %v2064_v24 = vmul.f32 %v4950_v17, %v5662_v42 }
0x1681   :  { %v2063_v20 = vmul.f32 %v4952_v19, %v5664_v45 }
0x1683   :  { %4356 = vmatprep.mubr.msk.f32.mxu0 %vm229_vm3, %v2063_v20 }
0x1684   :  { %v4954_v35 = vpop.eup %4953  ;;  %4357 = vmatmul.mubr.msk.f32.vlgmr.msra.gmra.mrb[24].mxu0 %vm229_vm3, %v2064_v24 }
0x1685   :  { %v1789_v27 = vmul.f32 %v4954_v35, %v1781_v10  ;;  %v1954_v10 = vld [vmem:[%s5971_s28 + $0x1] sm:$0x1] }
0x1686   :  { %vm1955_vm14 = vcmp.ne.s32.totalorder %v1954_v10, 0 }
0x1687   :  { %4327 = vmatmul.mubr.msk.f32.vlgmr.msra.gmra.mrb[16].mxu1 %vm229_vm3, %v1789_v27  ;;  %v2237_v33 = vsel %vm1955_vm14, 1, %v5029_v2 }
0x1688   :  { %v5698_v52 = vrot.slane %v2237_v33, %v420_v54 }
0x168a   :  { %vm2242_vm15 = vcmp.eq.s32.totalorder %v5698_v52, 1 }
0x1757   :  { %v4358_v32 = vpop.f32.mrb[24].mxu0 }
0x1758   :  { %v2137_v34 = vpop.f32.mrb[25].mxu0 }
0x1759   :  { %v4905_v36 = vpack.i.bf16 %v4358_v32, %v2137_v34  ;;  %4363 = vmatprep.mubr.msk.f32.mxu1 %vm229_vm3, %v2137_v34 }
0x175a   :  { %v5679_v37 = vpop.f32.mrb[16].mxu1 }
0x175b   :  { %4901 = vrot.lane.b32.xlu1 %v4905_v36, %s5031_s5  ;;  %v4328_v38 = vpop.f32.mrb[17].mxu1 }
0x17cd   :  { %v4902_v22 = vpop.permute.xlu1 %4901 }
0x17ce   :  { %v4904_v23 = vunpack.i.h.bf16 %v4902_v22  ;;  %v4903_v31 = vunpack.i.l.bf16 %v4902_v22 }
0x17d0   :  { %v4736_v48 = vpack.c.bf16 %v4904_v23, %v4903_v31 }
0x17d2   :  { %4738 = vmatprep.subr.msk.bf16.mxu1 %vm5226_vm4, %v4736_v48 }
0x17d3   :  { %4741 = vmatpush3.bf16.xpose.msk.msra.mxu1 %vm5226_vm4, %v4736_v48 }
0x17d4   :  { %4747 = vmatprep.subr.bf16.mxu1 %v5265_v21 }
0x17da   :  { %4364 = vmatmul.mubr.msk.f32.vlgmr.msra.gmra.mrb[18].mxu1 %vm229_vm3, %v4358_v32 }
0x17db   :  { %4749 = vmatpush3.bf16.msra.mxu1 %v5265_v21 }
0x17dc   :  { %4751 = vmatprep.subr.bf16.mxu1 %v5270_v25 }
0x17df   :  { %4753 = vmatpush3.bf16.msra.mxu1 %v5270_v25 }
0x17e0   :  { %4763 = vmatprep.subr.bf16.mxu1 %v5325_v61 }
0x18ad   :  { %v4365_v29 = vpop.f32.mrb[18].mxu1 }
0x18ae   :  { %v2226_v58 = vpop.f32.mrb[19].mxu1  ;;  %v2236_v21 = vmul.f32 0.17677669, %v4365_v29 }
0x18af   :  { %v2235_v60 = vmul.f32 0.17677669, %v2226_v58 }
0x18b0   :  { %v2244_v1 = vsel %vm2242_vm15, %v2236_v21, -1e+09 }
0x18b1   :  { %v2243_v25 = vsel %vm2242_vm15, %v2235_v60, -1e+09  ;;  %v2248_v2 = vsel %vm425_vm7, %v2244_v1, -inf }
0x18b2   :  { %v2245_v0 = vsel %vm425_vm7, %v2243_v25, -inf }
0x18b3   :  { %2246 = vmax.xlane.f32.xlu0 %v2245_v0 }
0x18b7   :  { %2249 = vmax.xlane.f32.xlu0 %v2248_v2 }
0x1940   :  { %v2247_v54 = vpop.xlane.xlu0 %2246 }
0x1941   :  { %v2251_v6 = vsub.f32 %v2243_v25, %v2247_v54 }
0x1943   :  { %v2253_v13 = vmul.f32 1.442695, %v2251_v6 }
0x1944   :  { %v2250_v41 = vpop.xlane.xlu0 %2249 }
0x1945   :  { %4955 = vpow2.f32 %v2253_v13  ;;  %v2252_v15 = vsub.f32 %v2244_v1, %v2250_v41 }
0x1947   :  { %v2255_v17 = vmul.f32 1.442695, %v2252_v15 }
0x1949   :  { %4957 = vpow2.f32 %v2255_v17 }
0x194f   :  { %v4956_v19 = vpop.eup %4955 }
0x1950   :  { %v2257_v20 = vsel %vm425_vm7, %v4956_v19, 0.0 }
0x1951   :  { %2258 = vadd.xlane.f32.xlu1 %v2257_v20 }
0x1953   :  { %v4958_v24 = vpop.eup %4957 }
0x1954   :  { %v2260_v35 = vsel %vm425_vm7, %v4958_v24, 0.0 }
0x1955   :  { %2261 = vadd.xlane.f32.xlu0 %v2260_v35 }
0x196b   :  { %4906 = vrot.lane.b32.xlu0 %v4905_v36, %s5032_s30 }
0x19de   :  { %v2259_v27 = vpop.xlane.xlu1 %2258 }
0x19df   :  { %4959 = vrcp.f32 %v2259_v27 }
0x19e2   :  { %v2262_v32 = vpop.xlane.xlu0 %2261 }
0x19e3   :  { %4961 = vrcp.f32 %v2262_v32 }
0x19e6   :  { %v4907_v34 = vpop.permute.xlu0 %4906 }
0x19e7   :  { %v4909_v38 = vunpack.i.h.bf16 %v4907_v34  ;;  %v4908_v22 = vunpack.i.l.bf16 %v4907_v34 }
0x19e9   :  { %v4960_v23 = vpop.eup %4959  ;;  %v4742_v31 = vpack.c.bf16 %v4909_v38, %v4908_v22 }
0x19ea   :  { %v2265_v48 = vmul.f32 %v4960_v23, %v4956_v19 }
0x19eb   :  { %4743 = vmatprep.subr.bf16.mxu0 %v4742_v31 }
0x19ec   :  { %4745 = vmatpush3.bf16.msra.mxu0 %v4742_v31  ;;  %4370 = vmatprep.mubr.msk.f32.mxu0 %vm425_vm7, %v2265_v48 }
0x19ed   :  { %v4962_v10 = vpop.eup %4961  ;;  %4755 = vmatprep.subr.bf16.mxu0 %v5301_v49 }
0x19ee   :  { %v2266_v33 = vmul.f32 %v4962_v10, %v4958_v24 }
0x19f0   :  { %4371 = vmatmul.mubr.msk.f32.vlgmr.msra.gmra.mrb[26].mxu0 %vm425_vm7, %v2266_v33 }
0x19f1   :  { %4757 = vmatpush3.bf16.msra.mxu0 %v5301_v49 }
0x19f2   :  { %4759 = vmatprep.subr.bf16.mxu0 %v5310_v55 }
0x19f5   :  { %4761 = vmatpush3.bf16.msra.mxu0 %v5310_v55 }
0x19f6   :  { %4778 = vmatprep.subr.bf16.mxu0 %v5033_v57 }
0x1ac3   :  { %v4372_v36 = vpop.f32.mrb[26].mxu0 }
0x1ac4   :  { %v2345_v29 = vpop.f32.mrb[27].mxu0 }
0x1ac5   :  { %4381 = vmatprep.mubr.msk.f32.mxu1 %vm229_vm3, %v2345_v29 }
0x1ac6   :  { %4382 = vmatmul.mubr.msk.f32.vlgmr.msra.gmra.mrb[20].mxu1 %vm229_vm3, %v4372_v36 }
0x1ac7   :  { %4765 = vmatpush3.bf16.msra.mxu1 %v5325_v61 }
0x1ac8   :  { %4767 = vmatprep.subr.bf16.mxu1 %v5330_v63 }
0x1acb   :  { %4769 = vmatpush3.bf16.msra.mxu1 %v5330_v63 }
0x1acc   :  { %4771 = vmatprep.subr.bf16.mxu1 %v5341_v3 }
0x1acf   :  { %4773 = vmatpush3.bf16.msra.mxu1 %v5341_v3 }
0x1ad0   :  { %4775 = vmatprep.subr.bf16.mxu1 %v5371_v28 }
0x1ad3   :  { %4777 = vmatpush3.bf16.msra.mxu1 %v5371_v28 }
0x1ad4   :  { %4790 = vmatprep.subr.bf16.mxu1 %v5033_v57 }
0x1b99   :  { %v4383_v49 = vpop.f32.mrb[20].mxu1 }
0x1b9a   :  { %v5728_v55 = vadd.f32 %v4383_v49, %v5662_v42  ;;  %v2426_v58 = vpop.f32.mrb[21].mxu1  ;;  %v62_v42 = vld [vmem:[%s5972_s24 + $0x8] sm:$0xff] }
0x1b9b   :  { %v5731_v61 = vadd.f32 %v2426_v58, %v5664_v45 }
0x1b9c   :  { %v2438_v63 = vmul.f32 %v5728_v55, %v5728_v55 }
0x1b9d   :  { %v2437_v3 = vmul.f32 %v5731_v61, %v5731_v61 }
0x1b9e   :  { %v2442_v21 = vsel %vm229_vm3, %v2438_v63, 0.0 }
0x1b9f   :  { %2443 = vadd.xlane.f32.xlu1 %v2442_v21  ;;  %v2439_v28 = vsel %vm229_vm3, %v2437_v3, 0.0 }
0x1ba0   :  { %2440 = vadd.xlane.f32.xlu0 %v2439_v28 }
0x1bb0   :  { %2638 = vperm.xlu1 %4899, %v62_v42  }
0x1c2c   :  { %v2444_v60 = vpop.xlane.xlu1 %2443 }
0x1c2d   :  { %v2446_v45 = vmul.f32 0.03125, %v2444_v60  ;;  %v2441_v25 = vpop.xlane.xlu0 %2440 }
0x1c2e   :  { %v2445_v0 = vmul.f32 0.03125, %v2441_v25 }
0x1c2f   :  { %v2448_v1 = vadd.f32 1e-06, %v2446_v45 }
0x1c30   :  { %v2447_v2 = vadd.f32 1e-06, %v2445_v0  ;;  %v2639_v15 = vpop.permute.xlu1 %2638 }
0x1c31   :  { %4963 = vrsqrt.f32 %v2448_v1  ;;  %vm2640_vm1 = vcmp.eq.s32.totalorder %v5180_v16, %v2639_v15 }
0x1c32   :  { %4965 = vrsqrt.f32 %v2447_v2  ;;  %v3841_v17 = vsel %vm2640_vm1, 1.0, %v5030_v18 }
0x1c3b   :  { %v4964_v54 = vpop.eup %4963 }
0x1c3c   :  { %v4966_v6 = vpop.eup %4965  ;;  %v2452_v41 = vmul.f32 %v4964_v54, %v5728_v55 }
0x1c3d   :  { %v2451_v13 = vmul.f32 %v4966_v6, %v5731_v61 }
0x1c3f   :  { %4392 = vmatprep.mubr.msk.f32.mxu0 %vm229_vm3, %v2451_v13 }
0x1c40   :  { %4393 = vmatmul.mubr.msk.f32.vlgmr.msra.gmra.mrb[28].mxu0 %vm229_vm3, %v2452_v41 }
0x1c41   :  { %4780 = vmatpush3.bf16.msra.mxu0 %v5152_v7  ;;  %4430 = vmatprep.mubr.msk.f32.mxu0 %vm5034_vm8, %v5030_v18 }
0x1c42   :  { %4781 = vmatprep.subr.bf16.mxu0 %v5033_v57 }
0x1c45   :  { %4783 = vmatpush3.bf16.msra.mxu0 %v5154_v8 }
0x1c46   :  { %4784 = vmatprep.subr.bf16.mxu0 %v5033_v57 }
0x1c49   :  { %4786 = vmatpush3.bf16.msra.mxu0 %v5165_v11 }
0x1c4a   :  { %4787 = vmatprep.subr.bf16.mxu0 %v5033_v57 }
0x1c4d   :  { %4789 = vmatpush3.bf16.msra.mxu0 %v5175_v14 }
0x1c4e   :  { %4444 = vmatprep.subr.mxu0 %v5030_v18 }
0x1c50   :  { %4431 = vmatmul.mubr.msk.f32.vlgmr.msra.gmra.mrb[30].mxu0 %vm145_vm0, %v3841_v17 }
0x1c51   :  { %4446 = vmatprep.mubr.msk.f32.mxu0 %vm5034_vm8, %v5030_v18 }
0x1d13   :  { %v4394_v19 = vpop.f32.mrb[28].mxu0 }
0x1d14   :  { %v2525_v20 = vpop.f32.mrb[29].mxu0  ;;  %v2535_v35 = vmax.f32 %v4394_v19, 0.0 }
0x1d15   :  { %v2534_v24 = vmax.f32 %v2525_v20, 0.0 }
0x1d17   :  { %4411 = vmatprep.mubr.msk.f32.mxu1 %vm145_vm0, %v2534_v24 }
0x1d18   :  { %4412 = vmatmul.mubr.msk.f32.vlgmr.msra.gmra.mrb[22].mxu1 %vm145_vm0, %v2535_v35 }
0x1d19   :  { %4792 = vmatpush3.bf16.msra.mxu1 %v5394_v44  ;;  %4441 = vmatprep.mubr.msk.f32.mxu1 %vm5034_vm8, %v5030_v18 }
0x1d1a   :  { %4793 = vmatprep.subr.bf16.mxu1 %v5033_v57 }
0x1d1d   :  { %4795 = vmatpush3.bf16.msra.mxu1 %v5400_v46 }
0x1d1e   :  { %4796 = vmatprep.subr.bf16.mxu1 %v5033_v57 }
0x1d23   :  { %v5769_v27 = vpop.f32.mrb[30].mxu0 }
0x1d24   :  { %v4432_v32 = vpop.f32.mrb[31].mxu0  ;;  %v2716_v34 = vmul.f32 %v5769_v27, %v5769_v27 }
0x1d26   :  { %v2717_v38 = vsel %vm229_vm3, %v2716_v34, 0.0 }
0x1d27   :  { %2718 = vadd.xlane.f32.xlu1 %v2717_v38 }
0x1db4   :  { %v2719_v22 = vpop.xlane.xlu1 %2718 }
0x1db5   :  { %v2720_v44 = vmul.f32 0.03125, %v2719_v22 }
0x1db7   :  { %v2721_v23 = vadd.f32 1e-06, %v2720_v44 }
0x1db9   :  { %4967 = vrsqrt.f32 %v2721_v23 }
0x1dc3   :  { %v4968_v31 = vpop.eup %4967 }
0x1dc4   :  { %v2723_v48 = vmul.f32 %v4968_v31, %v5769_v27 }
0x1dc6   :  { %4442 = vmatmul.mubr.msk.f32.vlgmr.msra.gmra.mrb[24].mxu1 %vm229_vm3, %v2723_v48 }
0x1dc7   :  { %4798 = vmatpush3.bf16.msra.mxu1 %v5440_v39  ;;  %4462 = vmatprep.mubr.msk.f32.mxu1 %vm5034_vm8, %v5030_v18 }
0x1dc8   :  { %4799 = vmatprep.subr.bf16.mxu1 %v5033_v57 }
0x1dcb   :  { %4801 = vmatpush3.bf16.msra.mxu1 %v5446_v40 }
0x1dcc   :  { %4809 = vmatprep.subr.bf16.mxu1 %v5464_v62 }
0x1deb   :  { %v4413_v46 = vpop.f32.mrb[22].mxu1 }
0x1dec   :  { %v2608_v10 = vpop.f32.mrb[23].mxu1  ;;  %v2618_v6 = vadd.f32 %v4413_v46, %v5728_v55 }
0x1ded   :  { %v2617_v39 = vadd.f32 %v2608_v10, %v5731_v61 }
0x1dee   :  { %v2620_v13 = vmul.f32 %v2618_v6, %v2618_v6 }
0x1def   :  { %v2619_v21 = vmul.f32 %v2617_v39, %v2617_v39 }
0x1df0   :  { %v2624_v41 = vsel %vm229_vm3, %v2620_v13, 0.0 }
0x1df1   :  { %v2621_v28 = vsel %vm229_vm3, %v2619_v21, 0.0 }
0x1e99   :  { %v2793_v33 = vpop.f32.mrb[24].mxu1 }
0x1e9a   :  { %2798 = vrot.lane.b32.xlu0 %v2793_v33, %s5031_s5  ;;  %v4443_v36 = vpop.f32.mrb[25].mxu1 }
0x1f0c   :  { %v2799_v29 = vpop.permute.xlu0 %2798 }
0x1f0d   :  { %4445 = vmatpush3.xpose.msk.msra.mxu0 %vm229_vm3, %v2799_v29 }
0x1f0e   :  { %4449 = vmatprep.subr.mxu0 %v5030_v18 }
0x1f10   :  { %4447 = vmatmul.mubr.msk.f32.vlgmr.msra.gmra.mrb[32].mxu0 %vm229_vm3, %v2793_v33 }
0x1f11   :  { %4451 = vmatprep.mubr.msk.f32.mxu0 %vm5034_vm8, %v5030_v18 }
0x1fe3   :  { %v2870_v40 = vpop.f32.mrb[32].mxu0 }
0x1fe4   :  { %v2874_v49 = vmul.f32 0.17677669, %v2870_v40  ;;  %v4448_v58 = vpop.f32.mrb[33].mxu0 }
0x1fe6   :  { %v2875_v63 = vsel %vm130_vm10, %v2874_v49, -1e+09 }
0x1fe7   :  { %v2876_v3 = vsel %vm1057_vm11, %v2875_v63, -inf }
0x1fe8   :  { %2877 = vmax.xlane.f32.xlu0 %v2876_v3 }
0x1fec   :  { %2622 = vadd.xlane.f32.xlu0 %v2621_v28 }
0x2075   :  { %v2878_v42 = vpop.xlane.xlu0 %2877 }
0x2076   :  { %v2879_v60 = vsub.f32 %v2875_v63, %v2878_v42 }
0x2078   :  { %v2880_v45 = vmul.f32 1.442695, %v2879_v60 }
0x2079   :  { %v2623_v25 = vpop.xlane.xlu0 %2622 }
0x207a   :  { %4969 = vpow2.f32 %v2880_v45  ;;  %v2627_v61 = vmul.f32 0.03125, %v2623_v25 }
0x207c   :  { %v2629_v0 = vadd.f32 1e-06, %v2627_v61 }
0x207e   :  { %4971 = vrsqrt.f32 %v2629_v0 }
0x2084   :  { %v4970_v1 = vpop.eup %4969 }
0x2085   :  { %v2882_v2 = vsel %vm1057_vm11, %v4970_v1, 0.0 }
0x2086   :  { %2883 = vadd.xlane.f32.xlu1 %v2882_v2 }
0x2088   :  { %v4972_v53 = vpop.eup %4971 }
0x2089   :  { %v2633_v54 = vmul.f32 %v4972_v53, %v2617_v39 }
0x208b   :  { %2635 = vst.msk [vmem:[%s5961_s18 + $0x10] sm:$0xff] %vm229_vm3, %v2633_v54 }
0x2097   :  { %2887 = vrot.lane.b32.xlu1 %v2793_v33, %s5032_s30 }
0x20bb   :  { %2625 = vadd.xlane.f32.xlu1 %v2624_v41 }
0x2113   :  { %v2884_v15 = vpop.xlane.xlu1 %2883 }
0x2114   :  { %4973 = vrcp.f32 %v2884_v15 }
0x2117   :  { %v2888_v17 = vpop.permute.xlu1 %2887 }
0x2118   :  { %4450 = vmatpush3.msra.mxu0 %v2888_v17 }
0x2119   :  { %4802 = vmatprep.subr.bf16.mxu0 %v5033_v57 }
0x211e   :  { %v4974_v19 = vpop.eup %4973 }
0x211f   :  { %v2886_v20 = vmul.f32 %v4974_v19, %v4970_v1 }
0x2121   :  { %4452 = vmatmul.mubr.msk.f32.vlgmr.msra.gmra.mrb[34].mxu0 %vm1057_vm11, %v2886_v20 }
0x2122   :  { %4804 = vmatpush3.bf16.msra.mxu0 %v5496_v26  ;;  %4473 = vmatprep.mubr.msk.f32.mxu0 %vm5034_vm8, %v5030_v18 }
0x2123   :  { %4805 = vmatprep.subr.bf16.mxu0 %v5033_v57 }
0x2126   :  { %4807 = vmatpush3.bf16.msra.mxu0 %v5505_v30 }
0x2127   :  { %4816 = vmatprep.subr.bf16.mxu0 %v5033_v57 }
0x2148   :  { %v2626_v55 = vpop.xlane.xlu1 %2625 }
0x2149   :  { %v2628_v24 = vmul.f32 0.03125, %v2626_v55 }
0x214b   :  { %v2630_v35 = vadd.f32 1e-06, %v2628_v24 }
0x214d   :  { %4975 = vrsqrt.f32 %v2630_v35 }
0x2157   :  { %v4976_v32 = vpop.eup %4975 }
0x2158   :  { %v2634_v34 = vmul.f32 %v4976_v32, %v2618_v6 }
0x215a   :  { %2636 = vst.msk [vmem:[%s5961_s18 + $0x18] sm:$0xff] %vm229_vm3, %v2634_v34 }
0x21f4   :  { %v2959_v26 = vpop.f32.mrb[34].mxu0 }
0x21f5   :  { %v4453_v38 = vpop.f32.mrb[35].mxu0  ;;  %4463 = vmatmul.mubr.msk.f32.vlgmr.msra.gmra.mrb[26].mxu1 %vm229_vm3, %v2959_v26 }
0x21f6   :  { %4811 = vmatpush3.bf16.msra.mxu1 %v5464_v62  ;;  %4484 = vmatprep.mubr.msk.f32.mxu1 %vm229_vm3, %v2633_v54 }
0x21f7   :  { %4813 = vmatprep.subr.bf16.mxu1 %v5473_v4 }
0x21fa   :  { %4815 = vmatpush3.bf16.msra.mxu1 %v5473_v4 }
0x21fb   :  { %4820 = vmatprep.subr.bf16.mxu1 %v5033_v57 }
0x21fd   :  { %4485 = vmatmul.mubr.msk.f32.vlgmr.msra.gmra.mrb[28].mxu1 %vm229_vm3, %v2634_v34 }
0x21fe   :  { %4498 = vmatprep.mubr.msk.f32.mxu1 %vm5034_vm8, %v5030_v18 }
0x22c8   :  { %v3032_v30 = vpop.f32.mrb[26].mxu1 }
0x22c9   :  { %v5824_v22 = vadd.f32 %v3032_v30, %v5769_v27  ;;  %v4464_v44 = vpop.f32.mrb[27].mxu1 }
0x22cb   :  { %v3037_v62 = vmul.f32 %v5824_v22, %v5824_v22 }
0x22cd   :  { %v3038_v23 = vsel %vm229_vm3, %v3037_v62, 0.0 }
0x22ce   :  { %3039 = vadd.xlane.f32.xlu0 %v3038_v23 }
0x22d0   :  { %v4486_v31 = vpop.f32.mrb[28].mxu1 }
0x22d1   :  { %v3190_v4 = vpop.f32.mrb[29].mxu1 }
0x22d2   :  { %v4910_v48 = vpack.i.bf16 %v4486_v31, %v3190_v4  ;;  %v4817_v46 = vpack.c.bf16 %v4486_v31, %v3190_v4 }
0x235b   :  { %v3040_v10 = vpop.xlane.xlu0 %3039 }
0x235c   :  { %v3041_v33 = vmul.f32 0.03125, %v3040_v10 }
0x235e   :  { %v3042_v36 = vadd.f32 1e-06, %v3041_v33 }
0x2360   :  { %4977 = vrsqrt.f32 %v3042_v36 }
0x236a   :  { %v4978_v29 = vpop.eup %4977 }
0x236b   :  { %v3044_v39 = vmul.f32 %v4978_v29, %v5824_v22 }
0x236d   :  { %4474 = vmatmul.mubr.msk.f32.vlgmr.msra.gmra.mrb[36].mxu0 %vm229_vm3, %v3044_v39  ;;  %v64_v39 = vld [vmem:[%s5946_s3 + $0x8] sm:$0xff] }
0x236e   :  { %4819 = vmatpush3.bf16.xpose.msk.msra.mxu0 %vm5226_vm4, %v4817_v46  ;;  %4491 = vmatprep.mubr.msk.f32.mxu0 %vm5034_vm8, %v5030_v18  ;;  %vm3681_vm6 = vcmp.eq.s32.totalorder %v64_v39, 0 }
0x236f   :  { %4823 = vmatprep.subr.bf16.mxu0 %v5033_v57 }
0x2440   :  { %v3114_v27 = vpop.f32.mrb[36].mxu0 }
0x2441   :  { %v4475_v40 = vpop.f32.mrb[37].mxu0  ;;  %4492 = vmatmul.mubr.msk.f32.vlgmr.msra.gmra.mrb[38].mxu0 %vm229_vm3, %v3114_v27  ;;  %v3682_v27 = vsel %vm3681_vm6, 4294967196, %v64_v39 }
0x2442   :  { %4825 = vmatpush3.bf16.msra.mxu0 %v5534_v5  ;;  %4509 = vmatprep.mubr.msk.f32.mxu0 %vm5034_vm8, %v5030_v18 }
0x2443   :  { %4826 = vmatprep.subr.bf16.mxu0 %v5033_v57 }
0x2446   :  { %4828 = vmatpush3.bf16.msra.mxu0 %v5540_v9 }
0x2447   :  { %4835 = vmatprep.subr.bf16.mxu0 %v5033_v57 }
0x2514   :  { %v3274_v49 = vpop.f32.mrb[38].mxu0 }
0x2515   :  { %v3278_v58 = vmul.f32 0.17677669, %v3274_v49  ;;  %v4493_v63 = vpop.f32.mrb[39].mxu0 }
0x2517   :  { %v3279_v3 = vsel %vm2242_vm15, %v3278_v58, -1e+09 }
0x2518   :  { %v3280_v21 = vsel %vm425_vm7, %v3279_v3, -inf }
0x2519   :  { %3281 = vmax.xlane.f32.xlu0 %v3280_v21 }
0x25a6   :  { %v3282_v28 = vpop.xlane.xlu0 %3281 }
0x25a7   :  { %v3283_v5 = vsub.f32 %v3279_v3, %v3282_v28 }
0x25a9   :  { %v3284_v42 = vmul.f32 1.442695, %v3283_v5 }
0x25ab   :  { %4979 = vpow2.f32 %v3284_v42 }
0x25b5   :  { %v4980_v60 = vpop.eup %4979 }
0x25b6   :  { %v3286_v45 = vsel %vm425_vm7, %v4980_v60, 0.0 }
0x25b7   :  { %3287 = vadd.xlane.f32.xlu0 %v3286_v45 }
0x25cd   :  { %4911 = vrot.lane.b32.xlu0 %v4910_v48, %s5031_s5 }
0x2644   :  { %v3288_v9 = vpop.xlane.xlu0 %3287 }
0x2645   :  { %4981 = vrcp.f32 %v3288_v9 }
0x2648   :  { %v4912_v25 = vpop.permute.xlu0 %4911 }
0x2649   :  { %v4914_v61 = vunpack.i.h.bf16 %v4912_v25  ;;  %v4913_v0 = vunpack.i.l.bf16 %v4912_v25 }
0x264b   :  { %v4821_v52 = vpack.c.bf16 %v4914_v61, %v4913_v0 }
0x264d   :  { %4822 = vmatpush3.bf16.msra.mxu1 %v4821_v52 }
0x264e   :  { %4829 = vmatprep.subr.bf16.mxu1 %v5033_v57 }
0x264f   :  { %v4982_v1 = vpop.eup %4981 }
0x2650   :  { %v3290_v2 = vmul.f32 %v4982_v1, %v4980_v60 }
0x2652   :  { %4499 = vmatmul.mubr.msk.f32.vlgmr.msra.gmra.mrb[30].mxu1 %vm425_vm7, %v3290_v2 }
0x2653   :  { %4831 = vmatpush3.bf16.msra.mxu1 %v5567_v43  ;;  %4520 = vmatprep.mubr.msk.f32.mxu1 %vm5034_vm8, %v5030_v18 }
0x2654   :  { %4832 = vmatprep.subr.bf16.mxu1 %v5033_v57 }
0x2657   :  { %4834 = vmatpush3.bf16.msra.mxu1 %v5576_v47 }
0x2658   :  { %4847 = vmatprep.subr.bf16.mxu1 %v5033_v57 }
0x2725   :  { %v3366_v53 = vpop.f32.mrb[30].mxu1 }
0x2726   :  { %v4500_v54 = vpop.f32.mrb[31].mxu1  ;;  %4510 = vmatmul.mubr.msk.f32.vlgmr.msra.gmra.mrb[40].mxu0 %vm229_vm3, %v3366_v53 }
0x2727   :  { %4837 = vmatpush3.bf16.msra.mxu0 %v5590_v51  ;;  %4539 = vmatprep.mubr.msk.f32.mxu0 %vm5034_vm8, %v5030_v18 }
0x2728   :  { %4838 = vmatprep.subr.bf16.mxu0 %v5033_v57 }
0x272b   :  { %4840 = vmatpush3.bf16.msra.mxu0 %v5599_v59 }
0x272c   :  { %4841 = vmatprep.subr.bf16.mxu0 %v5033_v57 }
0x272f   :  { %4843 = vmatpush3.bf16.msra.mxu0 %v5609_v56 }
0x2730   :  { %4844 = vmatprep.subr.bf16.mxu0 %v5033_v57 }
0x2733   :  { %4846 = vmatpush3.bf16.msra.mxu0 %v5619_v12 }
0x27f9   :  { %v3439_v43 = vpop.f32.mrb[40].mxu0 }
0x27fa   :  { %v3443_v47 = vadd.f32 %v3439_v43, %v5824_v22  ;;  %v4511_v6 = vpop.f32.mrb[41].mxu0 }
0x27fc   :  { %v3444_v51 = vmul.f32 %v3443_v47, %v3443_v47 }
0x27fe   :  { %v3445_v13 = vsel %vm229_vm3, %v3444_v51, 0.0 }
0x27ff   :  { %3446 = vadd.xlane.f32.xlu0 %v3445_v13 }
0x288c   :  { %v3447_v41 = vpop.xlane.xlu0 %3446 }
0x288d   :  { %v3448_v15 = vmul.f32 0.03125, %v3447_v41 }
0x288f   :  { %v3449_v17 = vadd.f32 1e-06, %v3448_v15 }
0x2891   :  { %4983 = vrsqrt.f32 %v3449_v17 }
0x289b   :  { %v4984_v59 = vpop.eup %4983 }
0x289c   :  { %v3451_v19 = vmul.f32 %v4984_v59, %v3443_v47 }
0x289e   :  { %4521 = vmatmul.mubr.msk.f32.vlgmr.msra.gmra.mrb[32].mxu1 %vm229_vm3, %v3451_v19 }
0x289f   :  { %4850 = vmatpush3.bf16.xpose.msk.msra.mxu1 %vm5226_vm4, %v5152_v7  ;;  %4558 = vmatprep.mubr.msk.f32.mxu1 %vm5034_vm8, %v5030_v18  ;;  %vm1917_vm8 = vcmask 7168  }
0x28a0   :  { %4851 = vmatprep.subr.bf16.mxu1 %v5033_v57 }
0x28a7   :  { %4854 = vmatpush3.bf16.xpose.msk.msra.mxu1 %vm5226_vm4, %v5154_v8 }
0x28a8   :  { %4855 = vmatprep.subr.bf16.mxu1 %v5033_v57 }
0x28af   :  { %4858 = vmatpush3.bf16.xpose.msk.msra.mxu1 %vm5226_vm4, %v5165_v11  ;;  %v1897_v11 = vsel %vm145_vm0, %v5679_v37, -inf }
0x28b0   :  { %4859 = vmatprep.subr.bf16.mxu1 %v5033_v57 }
0x28b7   :  { %4862 = vmatpush3.bf16.xpose.msk.msra.mxu1 %vm5226_vm4, %v5175_v14  ;;  %v63_v14 = vld [vmem:[%s5946_s3] sm:$0xff] }
0x28b8   :  { %vm1887_vm2 = vcmp.eq.s32.totalorder %v63_v14, 0 }
0x28b9   :  { %v1888_v50 = vsel %vm1887_vm2, 4294967196, %v63_v14 }
0x28ba   :  { %vm1889_vm4 = vcmp.ne.s32.totalorder %v1888_v50, 4294967196 }
0x28bb   :  { %v1890_v57 = vsel %vm1889_vm4, %v1888_v50, 0  ;;  %v3822_v9 = vsel %vm1889_vm4, 1.0, %v5030_v18 }
0x28bc   :  { %v1928_v53 = vsel %vm1917_vm8, %v3822_v9, 0.0 }
0x2971   :  { %v3521_v7 = vpop.f32.mrb[32].mxu1 }
0x2972   :  { %v3525_v56 = vmax.f32 %v3521_v7, 0.0  ;;  %v4522_v12 = vpop.f32.mrb[33].mxu1 }
0x2974   :  { %4540 = vmatmul.mubr.msk.f32.vlgmr.msra.gmra.mrb[42].mxu0 %vm145_vm0, %v3525_v56 }
0x2a47   :  { %v3595_v20 = vpop.f32.mrb[42].mxu0 }
0x2a48   :  { %v3599_v55 = vadd.f32 %v3595_v20, %v3443_v47  ;;  %v4541_v8 = vpop.f32.mrb[43].mxu0 }
0x2a4a   :  { %v3600_v24 = vmul.f32 %v3599_v55, %v3599_v55 }
0x2a4c   :  { %v3601_v35 = vsel %vm229_vm3, %v3600_v24, 0.0 }
0x2a4d   :  { %3602 = vadd.xlane.f32.xlu1 %v3601_v35 }
0x2a51   :  { %1898 = vmax.xlane.f32.xlu1 %v1897_v11 }
0x2a62   :  { %1892 = vperm.xlu1 %4899, %v1890_v57  }
0x2ada   :  { %v3603_v32 = vpop.xlane.xlu1 %3602 }
0x2adb   :  { %v3604_v34 = vmul.f32 0.03125, %v3603_v32 }
0x2add   :  { %v3605_v26 = vadd.f32 1e-06, %v3604_v34 }
0x2ade   :  { %v1899_v38 = vpop.xlane.xlu1 %1898 }
0x2adf   :  { %4985 = vrsqrt.f32 %v3605_v26  ;;  %v1900_v30 = vsub.f32 %v5679_v37, %v1899_v38 }
0x2ae1   :  { %v1901_v22 = vmul.f32 1.442695, %v1900_v30  ;;  %v1940_v17 = vmul.f32 100.0, %v1900_v30 }
0x2ae2   :  { %v1893_v44 = vpop.permute.xlu1 %1892 }
0x2ae3   :  { %4987 = vpow2.f32 %v1901_v22  ;;  %vm1894_vm5 = vcmp.eq.s32.totalorder %v5180_v16, %v1893_v44  ;;  %v1941_v7 = vmul.f32 1.442695, %v1940_v17 }
0x2ae4   :  { %v3821_v31 = vsel %vm1894_vm5, 1.0, %v5030_v18 }
0x2ae5   :  { %v1909_v46 = vmul.f32 %v3821_v31, %v5679_v37 }
0x2ae7   :  { %v1910_v10 = vsel %vm145_vm0, %v1909_v46, 0.0 }
0x2ae9   :  { %v4986_v62 = vpop.eup %4985 }
0x2aea   :  { %v3607_v23 = vmul.f32 %v4986_v62, %v3599_v55 }
0x2aec   :  { %4559 = vmatmul.mubr.msk.f32.vlgmr.msra.gmra.mrb[34].mxu1 %vm229_vm3, %v3607_v23  ;;  %vm3683_vm3 = vcmp.ne.s32.totalorder %v3682_v27, 4294967196 }
0x2aed   :  { %v4988_v4 = vpop.eup %4987  ;;  %v3684_v40 = vsel %vm3683_vm3, %v3682_v27, 0  ;;  %v3868_v8 = vsel %vm3683_vm3, 1.0, %v5030_v18 }
0x2aee   :  { %v1903_v48 = vsel %vm145_vm0, %v4988_v4, 0.0  ;;  %v3721_v14 = vsel %vm1917_vm8, %v3868_v8, 0.0 }
0x2aef   :  { %1904 = vadd.xlane.f32.xlu0 %v1903_v48 }
0x2af3   :  { %1911 = vadd.xlane.f32.xlu0 %v1910_v10 }
0x2b7c   :  { %v1905_v37 = vpop.xlane.xlu0 %1904 }
0x2b7d   :  { %4989 = vlog2.f32 %v1905_v37 }
0x2b80   :  { %v1912_v5 = vpop.xlane.xlu0 %1911 }
0x2b87   :  { %v4990_v49 = vpop.eup %4989 }
0x2b88   :  { %v1907_v58 = vmul.f32 0.6931472, %v4990_v49 }
0x2b8a   :  { %v1908_v3 = vadd.f32 %v1907_v58, %v1899_v38 }
0x2b8c   :  { %v1915_v60 = vsub.f32 %v1908_v3, %v1912_v5  ;;  %v127_v3 = vcvt.s32.f32 %v5180_v16 }
0x2b8e   :  { %v1916_v0 = vmul.f32 %v3822_v9, %v1915_v60 }
0x2b90   :  { %v1918_v52 = vsel %vm1917_vm8, %v1916_v0, 0.0 }
0x2bbf   :  { %v3677_v33 = vpop.f32.mrb[34].mxu1 }
0x2bc0   :  { %v4560_v36 = vpop.f32.mrb[35].mxu1  ;;  %v3691_v29 = vsel %vm145_vm0, %v3677_v33, -inf }
0x2bc1   :  { %3692 = vmax.xlane.f32.xlu1 %v3691_v29 }
0x2bd2   :  { %3686 = vperm.xlu1 %4899, %v3684_v40  }
0x2c4e   :  { %v3693_v63 = vpop.xlane.xlu1 %3692 }
0x2c4f   :  { %v3694_v21 = vsub.f32 %v3677_v33, %v3693_v63 }
0x2c51   :  { %v3695_v28 = vmul.f32 1.442695, %v3694_v21  ;;  %v3733_v56 = vmul.f32 100.0, %v3694_v21 }
0x2c52   :  { %v3687_v42 = vpop.permute.xlu1 %3686 }
0x2c53   :  { %4991 = vpow2.f32 %v3695_v28  ;;  %vm3688_vm7 = vcmp.eq.s32.totalorder %v5180_v16, %v3687_v42  ;;  %v3734_v55 = vmul.f32 1.442695, %v3733_v56 }
0x2c54   :  { %v3867_v45 = vsel %vm3688_vm7, 1.0, %v5030_v18 }
0x2c55   :  { %v3703_v25 = vmul.f32 %v3867_v45, %v3677_v33 }
0x2c57   :  { %v3704_v61 = vsel %vm145_vm0, %v3703_v25, 0.0 }
0x2c58   :  { %3705 = vadd.xlane.f32.xlu0 %v3704_v61 }
0x2c5c   :  { %1919 = vadd.xlane.f32.xlu0 %v1918_v52 }
0x2c5d   :  { %v4992_v1 = vpop.eup %4991 }
0x2c5e   :  { %v3697_v2 = vsel %vm145_vm0, %v4992_v1, 0.0 }
0x2c5f   :  { %3698 = vadd.xlane.f32.xlu1 %v3697_v2 }
0x2c60   :  { %1929 = vadd.xlane.f32.xlu0 %v1928_v53 }
0x2ce5   :  { %v3706_v54 = vpop.xlane.xlu0 %3705 }
0x2ce9   :  { %v1920_v43 = vpop.xlane.xlu0 %1919 }
0x2cea   :  { %v1921_v47 = vrot.slane %v1920_v43, 4 }
0x2cec   :  { %v1922_v6 = vadd.f32 %v1921_v47, %v1920_v43  ;;  %v3699_v51 = vpop.xlane.xlu1 %3698 }
0x2ced   :  { %4993 = vlog2.f32 %v3699_v51  ;;  %v1930_v57 = vpop.xlane.xlu0 %1929 }
0x2cee   :  { %v1923_v13 = vrot.slane %v1922_v6, 2  ;;  %4995 = vpow2.f32 %v1941_v7  ;;  %v1931_v32 = vrot.slane %v1930_v57, 4 }
0x2cef   :  { %4997 = vpow2.f32 %v3734_v55 }
0x2cf0   :  { %v1924_v41 = vadd.f32 %v1923_v13, %v1922_v6  ;;  %v1932_v26 = vadd.f32 %v1931_v32, %v1930_v57 }
0x2cf2   :  { %v1925_v15 = vrot.slane %v1924_v41, 1  ;;  %v1933_v30 = vrot.slane %v1932_v26, 2 }
0x2cf4   :  { %v1926_v59 = vadd.f32 %v1925_v15, %v1924_v41  ;;  %v1934_v22 = vadd.f32 %v1933_v30, %v1932_v26 }
0x2cf6   :  { %4863 = vpush %v1926_v59  ;;  %v1935_v44 = vrot.slane %v1934_v22, 1 }
0x2cf7   :  { %v4994_v19 = vpop.eup %4993 }
0x2cf8   :  { %v3701_v12 = vmul.f32 0.6931472, %v4994_v19  ;;  %v4996_v50 = vpop.eup %4995  ;;  %v1936_v62 = vadd.f32 %v1935_v44, %v1934_v22 }
0x2cf9   :  { %v1943_v34 = vsel %vm145_vm0, %v4996_v50, 0.0  ;;  %v4998_v38 = vpop.eup %4997 }
0x2cfa   :  { %v3702_v20 = vadd.f32 %v3701_v12, %v3693_v63  ;;  %v3736_v18 = vsel %vm145_vm0, %v4998_v38, 0.0  ;;  %4865 = vpush %v1936_v62 }
0x2cfc   :  { %v3709_v24 = vsub.f32 %v3702_v20, %v3706_v54 }
0x2cfe   :  { %v3710_v35 = vmul.f32 %v3868_v8, %v3709_v24 }
0x2d00   :  { %v3711_v11 = vsel %vm1917_vm8, %v3710_v35, 0.0 }
0x2d01   :  { %3712 = vadd.xlane.f32.xlu0 %v3711_v11 }
0x2d05   :  { %3722 = vadd.xlane.f32.xlu0 %v3721_v14 }
0x2d09   :  { %1944 = vadd.xlane.f32.xlu0 %v1943_v34 }
0x2d0d   :  { %3737 = vadd.xlane.f32.xlu0 %v3736_v18 }
0x2d27   :  { %s4864_s3 = spop %4863 }
0x2d2b   :  { %s4866_s11 = spop %4865 }
0x2d8e   :  { %v3713_v23 = vpop.xlane.xlu0 %3712 }
0x2d8f   :  { %v3714_v31 = vrot.slane %v3713_v23, 4 }
0x2d91   :  { %v3715_v4 = vadd.f32 %v3714_v31, %v3713_v23 }
0x2d92   :  { %v3723_v48 = vpop.xlane.xlu0 %3722 }
0x2d93   :  { %v3716_v46 = vrot.slane %v3715_v4, 2  ;;  %v3724_v10 = vrot.slane %v3723_v48, 4 }
0x2d95   :  { %v3725_v33 = vadd.f32 %v3724_v10, %v3723_v48  ;;  %v3717_v36 = vadd.f32 %v3716_v46, %v3715_v4 }
0x2d96   :  { %v1945_v29 = vpop.xlane.xlu0 %1944 }
0x2d97   :  { %v3726_v39 = vrot.slane %v3725_v33, 2  ;;  %4999 = vrcp.f32 %v1945_v29  ;;  %v3718_v27 = vrot.slane %v3717_v36, 1 }
0x2d99   :  { %v3719_v40 = vadd.f32 %v3718_v27, %v3717_v36  ;;  %v3727_v37 = vadd.f32 %v3726_v39, %v3725_v33 }
0x2d9a   :  { %v3738_v49 = vpop.xlane.xlu0 %3737 }
0x2d9b   :  { %5001 = vrcp.f32 %v3738_v49  ;;  %4868 = vpush %v3719_v40  ;;  %v3728_v58 = vrot.slane %v3727_v37, 1 }
0x2d9d   :  { %v3729_v63 = vadd.f32 %v3728_v58, %v3727_v37 }
0x2d9f   :  { %4870 = vpush %v3729_v63 }
0x2da1   :  { %v5000_v21 = vpop.eup %4999 }
0x2da2   :  { %v1947_v28 = vmul.f32 %v5000_v21, %v4996_v50 }
0x2da4   :  { %v1948_v5 = vmul.f32 %v1947_v28, %v127_v3 }
0x2da5   :  { %v5002_v42 = vpop.eup %5001 }
0x2da6   :  { %v1949_v60 = vsel %vm145_vm0, %v1948_v5, 0.0  ;;  %v3740_v45 = vmul.f32 %v5002_v42, %v4998_v38 }
0x2da7   :  { %1950 = vadd.xlane.f32.xlu0 %v1949_v60 }
0x2da8   :  { %v3741_v9 = vmul.f32 %v3740_v45, %v127_v3 }
0x2daa   :  { %v3742_v25 = vsel %vm145_vm0, %v3741_v9, 0.0 }
0x2dab   :  { %3743 = vadd.xlane.f32.xlu1 %v3742_v25 }
0x2dcc   :  { %s4869_s10 = spop %4868 }
0x2dcd   :  { %s3731_s25 = sadd.f32 %s4869_s10, %s4864_s3 }
0x2dd0   :  { %s4871_s6 = spop %4870 }
0x2dd1   :  { %s3732_s14 = sadd.f32 %s4871_s6, %s4866_s11 }
0x2dd3   :  { %s3747_s23 = smax.f32 %s5035_s7, %s3732_s14 }
0x2dd4   :  { %v3748_v16 = vstv %s3747_s23 }
0x2dd5   :  { %5003 = vrcp.f32 %v3748_v16 }
0x2ddf   :  { %v5004_v61 = vpop.eup %5003 }
0x2de0   :  { %4873 = vpush %v5004_v61 }
0x2e11   :  { %s4874_s27 = spop %4873 }
0x2e12   :  { %s3751_s13 = smul.f32 %s4874_s27, %s3731_s25 }
0x2e14   :  { %v3752_v0 = vstv %s3751_s13 }
0x2e15   :  { %3754 = vst.msk [vmem:[#allocation2] sm:$0x1] %vm3753_vm9, %v3752_v0 }
0x2e16   :  { %5016 = shalt.err (!%p5013_p4)
}
0x2e17   :  { %s5017_s1 = scalar_lea.hbm %s5959_s16, 16 }
0x2e18   :  { %p5018_p5 = scmp.ne.s32.totalorder %s5959_s16, %s5017_s1  ;;  %p5021_p6 = scmp.lt.u32.totalorder %s5017_s1, %s5959_s16 }
0x2e1a   :  { %p5023_p7 = pnand %p5021_p6, %p5018_p5 }
0x2e1c   :  { %5026 = shalt.err (!%p5023_p7)
}
0x2e1d   :  { %3764 = dma.vmem_to_hbm [thread:$0]  %s3762_s29, 16, %s5959_s16, [#allocation3]  }
0x2e34   :  { %v1951_v52 = vpop.xlane.xlu0 %1950 }
0x2e35   :  { %v4867_v1 = vround.rtne.f32 %v1951_v52 }
0x2e37   :  { %1953 = vst.msk [vmem:[%s5960_s17] sm:$0xff] %vm1917_vm8, %v4867_v1 }
0x2e38   :  { %v3744_v2 = vpop.xlane.xlu1 %3743 }
0x2e39   :  { %v4872_v53 = vround.rtne.f32 %v3744_v2 }
0x2e3b   :  { %3746 = vst.msk [vmem:[%s5960_s17 + $0x8] sm:$0xff] %vm1917_vm8, %v4872_v53 }
0x2e3c   :  { %5027 = dma.done.wait [#allocation3], 16  }
0x2e3d   :  { %5028 = vsyncadd [#allocation3], 4294967280 }
0x2e3e   :  { %3776 = vsyncpa [#allocation3], 1 }

</bundles_post_ra>
